<compile_context>
chip_gen: v5e
topology: v5e:2x2
jax: 0.10.0
libtpu: 0.0.40
codegen_flags: <defaults>
</compile_context>

<pallas_src>
import functools

import jax
import jax.numpy as jnp
from jax import lax
from jax.experimental import pallas as pl
from jax.experimental.pallas import tpu as pltpu


def _round_up(n, m):
    return ((n + m - 1) // m) * m


def _largest_tile(total, requested, step):
    """Largest multiple of `step` that divides `total` and is <= requested."""
    t = min(requested, total)
    t = max(step, (t // step) * step)
    while total % t != 0:
        t -= step
    return t


def _gru_recurrent_kernel(g_ref, h0_ref, uzr_ref, uh_ref, out_ref, *,
                          hidden, time_block, seq_len):
    """Runs up to `time_block` GRU steps for one batch tile.

    g_ref:   (time_block, TB, 3*hidden)  precomputed x@[Wz|Wr|Wh]+b (bf16/f32)
    h0_ref:  (TB, hidden)                initial hidden state (f32)
    uzr_ref: (hidden, 2*hidden)          fused [Uz | Ur] (compute dtype)
    uh_ref:  (hidden, hidden)            Uh              (compute dtype)
    out_ref: (TB, hidden)                carried hidden state / final output
    """
    s = pl.program_id(1)

    # First time block for this batch tile: seed the carried state from h0.
    @pl.when(s == 0)
    def _():
        out_ref[...] = h0_ref[...]

    u_zr = uzr_ref[...]
    u_h = uh_ref[...]
    cdt = u_zr.dtype
    t_base = s * time_block
    needs_mask = (seq_len % time_block) != 0
    # Full unroll only when the live per-step tiles plausibly fit the 64-vreg
    # file; otherwise partial unroll to avoid VMEM spill traffic.
    tb_rows = out_ref.shape[0]
    unroll = True if (hidden <= 128 or tb_rows <= 64) else 4

    def sigmoid(v):
        # sigmoid(x) == 0.5*(tanh(0.5*x)+1): one EUP push instead of exp+recip.
        return 0.5 * jnp.tanh(0.5 * v) + 0.5

    def step(tt, h):
        g = g_ref[tt]                                          # (TB, 3*hidden)
        zr = jnp.dot(h.astype(cdt), u_zr,
                     preferred_element_type=jnp.float32)       # (TB, 2*hidden)
        z = sigmoid(g[:, :hidden] + zr[:, :hidden])
        r = sigmoid(g[:, hidden:2 * hidden] + zr[:, hidden:])
        # Python precedence in the module: r * h @ Uh == (r * h) @ Uh
        cand = jnp.tanh(
            g[:, 2 * hidden:]
            + jnp.dot((r * h).astype(cdt), u_h,
                      preferred_element_type=jnp.float32))
        h_new = h + z * (cand - h)          # == (1 - z) * h + z * cand
        if needs_mask:
            # Masked tail: steps past the true sequence length are identity.
            h_new = jnp.where(t_base + tt < seq_len, h_new, h)
        return h_new

    out_ref[...] = lax.fori_loop(0, time_block, step, out_ref[...],
                                 unroll=unroll)


def gru_forward(x, params, h_prev=None, *, time_block=16, batch_block=128,
                compute_dtype=jnp.bfloat16):
    """x: (B, T, I) float32 — PyTorch axis convention. Returns (B, H)."""
    B, T, I = x.shape
    H = params["Wz"].shape[1]

    f32 = jnp.float32
    cdt = jnp.dtype(compute_dtype)
    Hp = _round_up(H, 128)    # lane-dense hidden dim
    Bp = _round_up(B, 8)      # sublane-aligned batch

    def pad_mat(w, rows, cols):
        w = w.astype(f32)
        return jnp.pad(w, ((0, rows - w.shape[0]), (0, cols - w.shape[1])))

    def pad_vec(v, n):
        return jnp.pad(v.astype(f32), (0, n - v.shape[0]))

    # Fused, padded parameters.
    w_in = jnp.concatenate(
        [pad_mat(params["Wz"], I, Hp),
         pad_mat(params["Wr"], I, Hp),
         pad_mat(params["Wh"], I, Hp)], axis=1)                 # (I, 3*Hp)
    b_in = jnp.concatenate(
        [pad_vec(params["bz"], Hp),
         pad_vec(params["br"], Hp),
         pad_vec(params["bh"], Hp)])                            # (3*Hp,)
    # Recurrent weights in the compute dtype (bf16 by default): bf16 MXU
    # operands with f32 accumulation, half the resident VMEM.
    u_zr = jnp.concatenate(
        [pad_mat(params["Uz"], Hp, Hp),
         pad_mat(params["Ur"], Hp, Hp)], axis=1).astype(cdt)    # (Hp, 2*Hp)
    u_h = pad_mat(params["Uh"], Hp, Hp).astype(cdt)             # (Hp, Hp)

    if h_prev is None:
        h0 = jnp.zeros((Bp, Hp), f32)
    else:
        h0 = pad_mat(h_prev, Bp, Hp)

    xp = jnp.pad(x.astype(f32), ((0, Bp - B), (0, 0), (0, 0)))  # (Bp, T, I)

    # Hoisted input projection for ALL time steps at once (one big MXU-dense
    # XLA matmul, biases folded in), produced time-major and cast to the
    # compute dtype so the streamed HBM slab is half-width.
    gates = (jnp.einsum("bti,ig->tbg", xp, w_in,
                        preferred_element_type=f32) + b_in).astype(cdt)

    # Batch tiling — megacore-aware: when there is enough batch, force >= 2
    # batch tiles so the second TensorCore (v7x) is not idle.
    tb_cap = batch_block
    if Bp >= 16:
        tb_cap = min(tb_cap, max(8, (Bp // 2) // 8 * 8))
    tb = _largest_tile(Bp, tb_cap, step=8)

    # Time tiling — keep the tuned time block and mask the ragged tail instead
    # of letting the tile collapse for awkward T.
    tt = min(time_block, T)
    Tp = _round_up(T, tt)
    if Tp > T:
        gates = jnp.pad(gates, ((0, Tp - T), (0, 0), (0, 0)))
    grid = (Bp // tb, Tp // tt)
    g3 = 3 * Hp

    # VMEM limit derived from actual block footprints (weights single-buffered,
    # streamed/output blocks double-buffered), 2x margin, capped at 64 MiB so
    # the same code stays inside v7x's physical VMEM.
    gate_blk = tt * tb * g3 * cdt.itemsize
    h0_blk = tb * Hp * 4
    out_blk = tb * Hp * 4
    w_bytes = (Hp * 2 * Hp + Hp * Hp) * cdt.itemsize
    need = 2 * gate_blk + 2 * h0_blk + 2 * out_blk + w_bytes
    vmem_limit = int(min(max(2 * need, 32 * 1024 * 1024), 64 * 1024 * 1024))

    kernel = functools.partial(_gru_recurrent_kernel, hidden=Hp,
                               time_block=tt, seq_len=T)

    def run(weight_buffering):
        grid_spec = pltpu.PrefetchScalarGridSpec(
            num_scalar_prefetch=0,
            grid=grid,
            in_specs=[
                # Streamed gate slab for this (batch tile, time block).
                pl.BlockSpec((tt, tb, g3), lambda b, s: (s, b, 0)),
                # Initial hidden state for this batch tile.
                pl.BlockSpec((tb, Hp), lambda b, s: (b, 0)),
                # Grid-invariant recurrent weights: constant block index =>
                # resident copy reused, never re-DMA'd across the time loop.
                pl.BlockSpec((Hp, 2 * Hp), lambda b, s: (0, 0),
                             pipeline_mode=weight_buffering),
                pl.BlockSpec((Hp, Hp), lambda b, s: (0, 0),
                             pipeline_mode=weight_buffering),
            ],
            out_specs=pl.BlockSpec((tb, Hp), lambda b, s: (b, 0)),
        )
        return pl.pallas_call(
            kernel,
            out_shape=jax.ShapeDtypeStruct((Bp, Hp), f32),
            grid_spec=grid_spec,
            compiler_params=pltpu.CompilerParams(
                # Batch tiles are independent -> megacore-shardable on v7x;
                # time is a true recurrence -> sequential.
                dimension_semantics=("parallel", "arbitrary"),
                vmem_limit_bytes=vmem_limit,
            ),
        )(gates, h0, u_zr, u_h)

    try:
        # Single-buffer the grid-invariant weights to halve their VMEM
        # footprint (zero pipelining cost — they never change block index).
        out = run(pl.Buffered(1))
    except Exception:  # fallback: default (double) buffering for the weights
        out = run(None)

    return out[:B, :H]


def init_gru_params(key, input_size, hidden_size):
    """Deterministic uniform(-stdv, stdv) init, stdv = 1/sqrt(hidden_size)."""
    stdv = 1.0 / (hidden_size ** 0.5)
    names_shapes = [
        ("Wz", (input_size, hidden_size)), ("Uz", (hidden_size, hidden_size)),
        ("bz", (hidden_size,)),
        ("Wr", (input_size, hidden_size)), ("Ur", (hidden_size, hidden_size)),
        ("br", (hidden_size,)),
        ("Wh", (input_size, hidden_size)), ("Uh", (hidden_size, hidden_size)),
        ("bh", (hidden_size,)),
    ]
    keys = jax.random.split(key, len(names_shapes))
    return {
        name: jax.random.uniform(k, shape, jnp.float32, -stdv, stdv)
        for (name, shape), k in zip(names_shapes, keys)
    }


def gru_reference(x, params, h_prev=None):
    """Pure-JAX reference mirroring the PyTorch module's forward loop."""
    B, T, I = x.shape
    H = params["Wz"].shape[1]
    h = h_prev if h_prev is not None else jnp.zeros((B, H), jnp.float32)
    for t in range(T):
        x_t = x[:, t, :]
        z_t = jax.nn.sigmoid(x_t @ params["Wz"] + h @ params["Uz"] + params["bz"])
        r_t = jax.nn.sigmoid(x_t @ params["Wr"] + h @ params["Ur"] + params["br"])
        h_cand = jnp.tanh(x_t @ params["Wh"] + (r_t * h) @ params["Uh"] + params["bh"])
        h = (1.0 - z_t) * h + z_t * h_cand
    return h


if __name__ == "__main__":
    key = jax.random.PRNGKey(0)
    k_param, k_x, k_h = jax.random.split(key, 3)

    batch, seq_len, input_size, hidden_size = 2, 16, 4, 32
    params = init_gru_params(k_param, input_size, hidden_size)
    x = jax.random.normal(k_x, (batch, seq_len, input_size), dtype=jnp.float32)
    h0 = jax.random.normal(k_h, (batch, hidden_size), dtype=jnp.float32)
    ref = gru_reference(x, params)

    # 1) f32 compute path: exact structural parity with the reference.
    out_f32 = jax.block_until_ready(
        gru_forward(x, params, compute_dtype=jnp.float32))
    assert out_f32.shape == (batch, hidden_size)
    assert jnp.allclose(out_f32, ref, atol=1e-5, rtol=1e-5), "f32 mismatch"

    # 2) default bf16 compute path (MXU-fast): relaxed tolerance.
    out_bf16 = jax.block_until_ready(gru_forward(x, params))
    assert jnp.allclose(out_bf16, ref, atol=3e-2, rtol=3e-2), "bf16 mismatch"

    # 3) explicit h_prev + T not divisible by time_block (masked time tail).
    x_tail = x[:, :13, :]
    out_tail = jax.block_until_ready(
        gru_forward(x_tail, params, h_prev=h0, time_block=8,
                    compute_dtype=jnp.float32))
    ref_tail = gru_reference(x_tail, params, h_prev=h0)
    assert jnp.allclose(out_tail, ref_tail, atol=1e-5, rtol=1e-5), \
        "masked-tail mismatch"

    print("KERNEL_OK")
</pallas_src>

<mosaic_0001>
module attributes {stable_mosaic.version = 11 : i64} {
  func.func @_gru_recurrent_kernel(%arg0: i32, %arg1: i32, %arg2: memref<16x8x384xf32, #tpu.memory_space<vmem>>, %arg3: memref<8x128xf32, #tpu.memory_space<vmem>>, %arg4: memref<128x256xf32, #tpu.memory_space<vmem>>, %arg5: memref<128x128xf32, #tpu.memory_space<vmem>>, %arg6: memref<8x128xf32, #tpu.memory_space<vmem>>) attributes {dimension_semantics = [#tpu.dimension_semantics<parallel>, #tpu.dimension_semantics<arbitrary>], iteration_bounds = array<i64: 1, 1>, scalar_prefetch = 0 : i64, scratch_operands = 0 : i64, tpu.core_type = #tpu.core_type<tc>, window_params = [{transform_indices = @transform_0, window_bounds = array<i64: 16, 8, 384>}, {transform_indices = @transform_1, window_bounds = array<i64: 8, 128>}, {pipeline_mode = #tpu.pipeline_mode<synchronous>, transform_indices = @transform_2, window_bounds = array<i64: 128, 256>}, {pipeline_mode = #tpu.pipeline_mode<synchronous>, transform_indices = @transform_3, window_bounds = array<i64: 128, 128>}, {transform_indices = @transform_4, window_bounds = array<i64: 8, 128>}]} {
    %c0_i32 = arith.constant 0 : i32
    %0 = arith.cmpi eq, %arg1, %c0_i32 : i32
    %1 = arith.extui %0 : i1 to i32
    %c0_i32_0 = arith.constant 0 : i32
    %2 = arith.cmpi ne, %1, %c0_i32_0 : i32
    scf.if %2 {
      %c0_168 = arith.constant 0 : index
      %c0_169 = arith.constant 0 : index
      %519 = vector.load %arg3[%c0_168, %c0_169] : memref<8x128xf32, #tpu.memory_space<vmem>>, vector<8x128xf32>
      %c0_170 = arith.constant 0 : index
      %c0_171 = arith.constant 0 : index
      %520 = vector.load %arg6[%c0_170, %c0_171] : memref<8x128xf32, #tpu.memory_space<vmem>>, vector<8x128xf32>
      tpu.vector_store %arg6[%c0_170, %c0_171], %519 {strides = array<i32>} : memref<8x128xf32, #tpu.memory_space<vmem>>, vector<8x128xf32>,
    } else {
    }
    %c0 = arith.constant 0 : index
    %c0_1 = arith.constant 0 : index
    %3 = vector.load %arg4[%c0, %c0_1] : memref<128x256xf32, #tpu.memory_space<vmem>>, vector<128x256xf32>
    %c0_2 = arith.constant 0 : index
    %c0_3 = arith.constant 0 : index
    %4 = vector.load %arg5[%c0_2, %c0_3] : memref<128x128xf32, #tpu.memory_space<vmem>>, vector<128x128xf32>
    %c0_4 = arith.constant 0 : index
    %c0_5 = arith.constant 0 : index
    %5 = vector.load %arg6[%c0_4, %c0_5] : memref<8x128xf32, #tpu.memory_space<vmem>>, vector<8x128xf32>
    %c0_i32_6 = arith.constant 0 : i32
    %6 = arith.index_cast %c0_i32_6 : i32 to index
    %c0_7 = arith.constant 0 : index
    %c0_8 = arith.constant 0 : index
    %7 = vector.load %arg2[%6, %c0_7, %c0_8] : memref<16x8x384xf32, #tpu.memory_space<vmem>>, vector<1x8x384xf32>
    %8 = vector.shape_cast %7 : vector<1x8x384xf32> to vector<8x384xf32>
    %cst = arith.constant dense<0.000000e+00> : vector<8x256xf32>
    %9 = tpu.matmul %5, %3, %cst {dimension_numbers = #tpu.dot_dimension_numbers<[1], [0], [0], [1], [0, 0, 1, 1], [], []>} : vector<8x128xf32>, vector<128x256xf32>, vector<8x256xf32> -> vector<8x256xf32>
    %10 = vector.extract_strided_slice %8 {offsets = [0, 0], sizes = [8, 128], strides = [1, 1]} : vector<8x384xf32> to vector<8x128xf32>
    %11 = vector.extract_strided_slice %9 {offsets = [0, 0], sizes = [8, 128], strides = [1, 1]} : vector<8x256xf32> to vector<8x128xf32>
    %12 = arith.addf %10, %11 : vector<8x128xf32>
    %cst_9 = arith.constant 5.000000e-01 : f32
    %13 = vector.broadcast %cst_9 : f32 to vector<8x128xf32>
    %14 = arith.mulf %13, %12 : vector<8x128xf32>
    %15 = math.tanh %14 : vector<8x128xf32>
    %cst_10 = arith.constant 5.000000e-01 : f32
    %16 = vector.broadcast %cst_10 : f32 to vector<8x128xf32>
    %17 = arith.mulf %16, %15 : vector<8x128xf32>
    %cst_11 = arith.constant 5.000000e-01 : f32
    %18 = vector.broadcast %cst_11 : f32 to vector<8x128xf32>
    %19 = arith.addf %17, %18 : vector<8x128xf32>
    %20 = vector.extract_strided_slice %8 {offsets = [0, 128], sizes = [8, 128], strides = [1, 1]} : vector<8x384xf32> to vector<8x128xf32>
    %21 = vector.extract_strided_slice %9 {offsets = [0, 128], sizes = [8, 128], strides = [1, 1]} : vector<8x256xf32> to vector<8x128xf32>
    %22 = arith.addf %20, %21 : vector<8x128xf32>
    %cst_12 = arith.constant 5.000000e-01 : f32
    %23 = vector.broadcast %cst_12 : f32 to vector<8x128xf32>
    %24 = arith.mulf %23, %22 : vector<8x128xf32>
    %25 = math.tanh %24 : vector<8x128xf32>
    %cst_13 = arith.constant 5.000000e-01 : f32
    %26 = vector.broadcast %cst_13 : f32 to vector<8x128xf32>
    %27 = arith.mulf %26, %25 : vector<8x128xf32>
    %cst_14 = arith.constant 5.000000e-01 : f32
    %28 = vector.broadcast %cst_14 : f32 to vector<8x128xf32>
    %29 = arith.addf %27, %28 : vector<8x128xf32>
    %30 = vector.extract_strided_slice %8 {offsets = [0, 256], sizes = [8, 128], strides = [1, 1]} : vector<8x384xf32> to vector<8x128xf32>
    %31 = arith.mulf %29, %5 : vector<8x128xf32>
    %cst_15 = arith.constant dense<0.000000e+00> : vector<8x128xf32>
    %32 = tpu.matmul %31, %4, %cst_15 {dimension_numbers = #tpu.dot_dimension_numbers<[1], [0], [0], [1], [0, 0, 1, 1], [], []>} : vector<8x128xf32>, vector<128x128xf32>, vector<8x128xf32> -> vector<8x128xf32>
    %33 = arith.addf %30, %32 : vector<8x128xf32>
    %34 = math.tanh %33 : vector<8x128xf32>
    %35 = arith.subf %34, %5 : vector<8x128xf32>
    %36 = arith.mulf %19, %35 : vector<8x128xf32>
    %37 = arith.addf %5, %36 : vector<8x128xf32>
    %c1_i32 = arith.constant 1 : i32
    %38 = arith.index_cast %c1_i32 : i32 to index
    %c0_16 = arith.constant 0 : index
    %c0_17 = arith.constant 0 : index
    %39 = vector.load %arg2[%38, %c0_16, %c0_17] : memref<16x8x384xf32, #tpu.memory_space<vmem>>, vector<1x8x384xf32>
    %40 = vector.shape_cast %39 : vector<1x8x384xf32> to vector<8x384xf32>
    %cst_18 = arith.constant dense<0.000000e+00> : vector<8x256xf32>
    %41 = tpu.matmul %37, %3, %cst_18 {dimension_numbers = #tpu.dot_dimension_numbers<[1], [0], [0], [1], [0, 0, 1, 1], [], []>} : vector<8x128xf32>, vector<128x256xf32>, vector<8x256xf32> -> vector<8x256xf32>
    %42 = vector.extract_strided_slice %40 {offsets = [0, 0], sizes = [8, 128], strides = [1, 1]} : vector<8x384xf32> to vector<8x128xf32>
    %43 = vector.extract_strided_slice %41 {offsets = [0, 0], sizes = [8, 128], strides = [1, 1]} : vector<8x256xf32> to vector<8x128xf32>
    %44 = arith.addf %42, %43 : vector<8x128xf32>
    %cst_19 = arith.constant 5.000000e-01 : f32
    %45 = vector.broadcast %cst_19 : f32 to vector<8x128xf32>
    %46 = arith.mulf %45, %44 : vector<8x128xf32>
    %47 = math.tanh %46 : vector<8x128xf32>
    %cst_20 = arith.constant 5.000000e-01 : f32
    %48 = vector.broadcast %cst_20 : f32 to vector<8x128xf32>
    %49 = arith.mulf %48, %47 : vector<8x128xf32>
    %cst_21 = arith.constant 5.000000e-01 : f32
    %50 = vector.broadcast %cst_21 : f32 to vector<8x128xf32>
    %51 = arith.addf %49, %50 : vector<8x128xf32>
    %52 = vector.extract_strided_slice %40 {offsets = [0, 128], sizes = [8, 128], strides = [1, 1]} : vector<8x384xf32> to vector<8x128xf32>
    %53 = vector.extract_strided_slice %41 {offsets = [0, 128], sizes = [8, 128], strides = [1, 1]} : vector<8x256xf32> to vector<8x128xf32>
    %54 = arith.addf %52, %53 : vector<8x128xf32>
    %cst_22 = arith.constant 5.000000e-01 : f32
    %55 = vector.broadcast %cst_22 : f32 to vector<8x128xf32>
    %56 = arith.mulf %55, %54 : vector<8x128xf32>
    %57 = math.tanh %56 : vector<8x128xf32>
    %cst_23 = arith.constant 5.000000e-01 : f32
    %58 = vector.broadcast %cst_23 : f32 to vector<8x128xf32>
    %59 = arith.mulf %58, %57 : vector<8x128xf32>
    %cst_24 = arith.constant 5.000000e-01 : f32
    %60 = vector.broadcast %cst_24 : f32 to vector<8x128xf32>
    %61 = arith.addf %59, %60 : vector<8x128xf32>
    %62 = vector.extract_strided_slice %40 {offsets = [0, 256], sizes = [8, 128], strides = [1, 1]} : vector<8x384xf32> to vector<8x128xf32>
    %63 = arith.mulf %61, %37 : vector<8x128xf32>
    %cst_25 = arith.constant dense<0.000000e+00> : vector<8x128xf32>
    %64 = tpu.matmul %63, %4, %cst_25 {dimension_numbers = #tpu.dot_dimension_numbers<[1], [0], [0], [1], [0, 0, 1, 1], [], []>} : vector<8x128xf32>, vector<128x128xf32>, vector<8x128xf32> -> vector<8x128xf32>
    %65 = arith.addf %62, %64 : vector<8x128xf32>
    %66 = math.tanh %65 : vector<8x128xf32>
    %67 = arith.subf %66, %37 : vector<8x128xf32>
    %68 = arith.mulf %51, %67 : vector<8x128xf32>
    %69 = arith.addf %37, %68 : vector<8x128xf32>
    %c2_i32 = arith.constant 2 : i32
    %70 = arith.index_cast %c2_i32 : i32 to index
    %c0_26 = arith.constant 0 : index
    %c0_27 = arith.constant 0 : index
    %71 = vector.load %arg2[%70, %c0_26, %c0_27] : memref<16x8x384xf32, #tpu.memory_space<vmem>>, vector<1x8x384xf32>
    %72 = vector.shape_cast %71 : vector<1x8x384xf32> to vector<8x384xf32>
    %cst_28 = arith.constant dense<0.000000e+00> : vector<8x256xf32>
    %73 = tpu.matmul %69, %3, %cst_28 {dimension_numbers = #tpu.dot_dimension_numbers<[1], [0], [0], [1], [0, 0, 1, 1], [], []>} : vector<8x128xf32>, vector<128x256xf32>, vector<8x256xf32> -> vector<8x256xf32>
    %74 = vector.extract_strided_slice %72 {offsets = [0, 0], sizes = [8, 128], strides = [1, 1]} : vector<8x384xf32> to vector<8x128xf32>
    %75 = vector.extract_strided_slice %73 {offsets = [0, 0], sizes = [8, 128], strides = [1, 1]} : vector<8x256xf32> to vector<8x128xf32>
    %76 = arith.addf %74, %75 : vector<8x128xf32>
    %cst_29 = arith.constant 5.000000e-01 : f32
    %77 = vector.broadcast %cst_29 : f32 to vector<8x128xf32>
    %78 = arith.mulf %77, %76 : vector<8x128xf32>
    %79 = math.tanh %78 : vector<8x128xf32>
    %cst_30 = arith.constant 5.000000e-01 : f32
    %80 = vector.broadcast %cst_30 : f32 to vector<8x128xf32>
    %81 = arith.mulf %80, %79 : vector<8x128xf32>
    %cst_31 = arith.constant 5.000000e-01 : f32
    %82 = vector.broadcast %cst_31 : f32 to vector<8x128xf32>
    %83 = arith.addf %81, %82 : vector<8x128xf32>
    %84 = vector.extract_strided_slice %72 {offsets = [0, 128], sizes = [8, 128], strides = [1, 1]} : vector<8x384xf32> to vector<8x128xf32>
    %85 = vector.extract_strided_slice %73 {offsets = [0, 128], sizes = [8, 128], strides = [1, 1]} : vector<8x256xf32> to vector<8x128xf32>
    %86 = arith.addf %84, %85 : vector<8x128xf32>
    %cst_32 = arith.constant 5.000000e-01 : f32
    %87 = vector.broadcast %cst_32 : f32 to vector<8x128xf32>
    %88 = arith.mulf %87, %86 : vector<8x128xf32>
    %89 = math.tanh %88 : vector<8x128xf32>
    %cst_33 = arith.constant 5.000000e-01 : f32
    %90 = vector.broadcast %cst_33 : f32 to vector<8x128xf32>
    %91 = arith.mulf %90, %89 : vector<8x128xf32>
    %cst_34 = arith.constant 5.000000e-01 : f32
    %92 = vector.broadcast %cst_34 : f32 to vector<8x128xf32>
    %93 = arith.addf %91, %92 : vector<8x128xf32>
    %94 = vector.extract_strided_slice %72 {offsets = [0, 256], sizes = [8, 128], strides = [1, 1]} : vector<8x384xf32> to vector<8x128xf32>
    %95 = arith.mulf %93, %69 : vector<8x128xf32>
    %cst_35 = arith.constant dense<0.000000e+00> : vector<8x128xf32>
    %96 = tpu.matmul %95, %4, %cst_35 {dimension_numbers = #tpu.dot_dimension_numbers<[1], [0], [0], [1], [0, 0, 1, 1], [], []>} : vector<8x128xf32>, vector<128x128xf32>, vector<8x128xf32> -> vector<8x128xf32>
    %97 = arith.addf %94, %96 : vector<8x128xf32>
    %98 = math.tanh %97 : vector<8x128xf32>
    %99 = arith.subf %98, %69 : vector<8x128xf32>
    %100 = arith.mulf %83, %99 : vector<8x128xf32>
    %101 = arith.addf %69, %100 : vector<8x128xf32>
    %c3_i32 = arith.constant 3 : i32
    %102 = arith.index_cast %c3_i32 : i32 to index
    %c0_36 = arith.constant 0 : index
    %c0_37 = arith.constant 0 : index
    %103 = vector.load %arg2[%102, %c0_36, %c0_37] : memref<16x8x384xf32, #tpu.memory_space<vmem>>, vector<1x8x384xf32>
    %104 = vector.shape_cast %103 : vector<1x8x384xf32> to vector<8x384xf32>
    %cst_38 = arith.constant dense<0.000000e+00> : vector<8x256xf32>
    %105 = tpu.matmul %101, %3, %cst_38 {dimension_numbers = #tpu.dot_dimension_numbers<[1], [0], [0], [1], [0, 0, 1, 1], [], []>} : vector<8x128xf32>, vector<128x256xf32>, vector<8x256xf32> -> vector<8x256xf32>
    %106 = vector.extract_strided_slice %104 {offsets = [0, 0], sizes = [8, 128], strides = [1, 1]} : vector<8x384xf32> to vector<8x128xf32>
    %107 = vector.extract_strided_slice %105 {offsets = [0, 0], sizes = [8, 128], strides = [1, 1]} : vector<8x256xf32> to vector<8x128xf32>
    %108 = arith.addf %106, %107 : vector<8x128xf32>
    %cst_39 = arith.constant 5.000000e-01 : f32
    %109 = vector.broadcast %cst_39 : f32 to vector<8x128xf32>
    %110 = arith.mulf %109, %108 : vector<8x128xf32>
    %111 = math.tanh %110 : vector<8x128xf32>
    %cst_40 = arith.constant 5.000000e-01 : f32
    %112 = vector.broadcast %cst_40 : f32 to vector<8x128xf32>
    %113 = arith.mulf %112, %111 : vector<8x128xf32>
    %cst_41 = arith.constant 5.000000e-01 : f32
    %114 = vector.broadcast %cst_41 : f32 to vector<8x128xf32>
    %115 = arith.addf %113, %114 : vector<8x128xf32>
    %116 = vector.extract_strided_slice %104 {offsets = [0, 128], sizes = [8, 128], strides = [1, 1]} : vector<8x384xf32> to vector<8x128xf32>
    %117 = vector.extract_strided_slice %105 {offsets = [0, 128], sizes = [8, 128], strides = [1, 1]} : vector<8x256xf32> to vector<8x128xf32>
    %118 = arith.addf %116, %117 : vector<8x128xf32>
    %cst_42 = arith.constant 5.000000e-01 : f32
    %119 = vector.broadcast %cst_42 : f32 to vector<8x128xf32>
    %120 = arith.mulf %119, %118 : vector<8x128xf32>
    %121 = math.tanh %120 : vector<8x128xf32>
    %cst_43 = arith.constant 5.000000e-01 : f32
    %122 = vector.broadcast %cst_43 : f32 to vector<8x128xf32>
    %123 = arith.mulf %122, %121 : vector<8x128xf32>
    %cst_44 = arith.constant 5.000000e-01 : f32
    %124 = vector.broadcast %cst_44 : f32 to vector<8x128xf32>
    %125 = arith.addf %123, %124 : vector<8x128xf32>
    %126 = vector.extract_strided_slice %104 {offsets = [0, 256], sizes = [8, 128], strides = [1, 1]} : vector<8x384xf32> to vector<8x128xf32>
    %127 = arith.mulf %125, %101 : vector<8x128xf32>
    %cst_45 = arith.constant dense<0.000000e+00> : vector<8x128xf32>
    %128 = tpu.matmul %127, %4, %cst_45 {dimension_numbers = #tpu.dot_dimension_numbers<[1], [0], [0], [1], [0, 0, 1, 1], [], []>} : vector<8x128xf32>, vector<128x128xf32>, vector<8x128xf32> -> vector<8x128xf32>
    %129 = arith.addf %126, %128 : vector<8x128xf32>
    %130 = math.tanh %129 : vector<8x128xf32>
    %131 = arith.subf %130, %101 : vector<8x128xf32>
    %132 = arith.mulf %115, %131 : vector<8x128xf32>
    %133 = arith.addf %101, %132 : vector<8x128xf32>
    %c4_i32 = arith.constant 4 : i32
    %134 = arith.index_cast %c4_i32 : i32 to index
    %c0_46 = arith.constant 0 : index
    %c0_47 = arith.constant 0 : index
    %135 = vector.load %arg2[%134, %c0_46, %c0_47] : memref<16x8x384xf32, #tpu.memory_space<vmem>>, vector<1x8x384xf32>
    %136 = vector.shape_cast %135 : vector<1x8x384xf32> to vector<8x384xf32>
    %cst_48 = arith.constant dense<0.000000e+00> : vector<8x256xf32>
    %137 = tpu.matmul %133, %3, %cst_48 {dimension_numbers = #tpu.dot_dimension_numbers<[1], [0], [0], [1], [0, 0, 1, 1], [], []>} : vector<8x128xf32>, vector<128x256xf32>, vector<8x256xf32> -> vector<8x256xf32>
    %138 = vector.extract_strided_slice %136 {offsets = [0, 0], sizes = [8, 128], strides = [1, 1]} : vector<8x384xf32> to vector<8x128xf32>
    %139 = vector.extract_strided_slice %137 {offsets = [0, 0], sizes = [8, 128], strides = [1, 1]} : vector<8x256xf32> to vector<8x128xf32>
    %140 = arith.addf %138, %139 : vector<8x128xf32>
    %cst_49 = arith.constant 5.000000e-01 : f32
    %141 = vector.broadcast %cst_49 : f32 to vector<8x128xf32>
    %142 = arith.mulf %141, %140 : vector<8x128xf32>
    %143 = math.tanh %142 : vector<8x128xf32>
    %cst_50 = arith.constant 5.000000e-01 : f32
    %144 = vector.broadcast %cst_50 : f32 to vector<8x128xf32>
    %145 = arith.mulf %144, %143 : vector<8x128xf32>
    %cst_51 = arith.constant 5.000000e-01 : f32
    %146 = vector.broadcast %cst_51 : f32 to vector<8x128xf32>
    %147 = arith.addf %145, %146 : vector<8x128xf32>
    %148 = vector.extract_strided_slice %136 {offsets = [0, 128], sizes = [8, 128], strides = [1, 1]} : vector<8x384xf32> to vector<8x128xf32>
    %149 = vector.extract_strided_slice %137 {offsets = [0, 128], sizes = [8, 128], strides = [1, 1]} : vector<8x256xf32> to vector<8x128xf32>
    %150 = arith.addf %148, %149 : vector<8x128xf32>
    %cst_52 = arith.constant 5.000000e-01 : f32
    %151 = vector.broadcast %cst_52 : f32 to vector<8x128xf32>
    %152 = arith.mulf %151, %150 : vector<8x128xf32>
    %153 = math.tanh %152 : vector<8x128xf32>
    %cst_53 = arith.constant 5.000000e-01 : f32
    %154 = vector.broadcast %cst_53 : f32 to vector<8x128xf32>
    %155 = arith.mulf %154, %153 : vector<8x128xf32>
    %cst_54 = arith.constant 5.000000e-01 : f32
    %156 = vector.broadcast %cst_54 : f32 to vector<8x128xf32>
    %157 = arith.addf %155, %156 : vector<8x128xf32>
    %158 = vector.extract_strided_slice %136 {offsets = [0, 256], sizes = [8, 128], strides = [1, 1]} : vector<8x384xf32> to vector<8x128xf32>
    %159 = arith.mulf %157, %133 : vector<8x128xf32>
    %cst_55 = arith.constant dense<0.000000e+00> : vector<8x128xf32>
    %160 = tpu.matmul %159, %4, %cst_55 {dimension_numbers = #tpu.dot_dimension_numbers<[1], [0], [0], [1], [0, 0, 1, 1], [], []>} : vector<8x128xf32>, vector<128x128xf32>, vector<8x128xf32> -> vector<8x128xf32>
    %161 = arith.addf %158, %160 : vector<8x128xf32>
    %162 = math.tanh %161 : vector<8x128xf32>
    %163 = arith.subf %162, %133 : vector<8x128xf32>
    %164 = arith.mulf %147, %163 : vector<8x128xf32>
    %165 = arith.addf %133, %164 : vector<8x128xf32>
    %c5_i32 = arith.constant 5 : i32
    %166 = arith.index_cast %c5_i32 : i32 to index
    %c0_56 = arith.constant 0 : index
    %c0_57 = arith.constant 0 : index
    %167 = vector.load %arg2[%166, %c0_56, %c0_57] : memref<16x8x384xf32, #tpu.memory_space<vmem>>, vector<1x8x384xf32>
    %168 = vector.shape_cast %167 : vector<1x8x384xf32> to vector<8x384xf32>
    %cst_58 = arith.constant dense<0.000000e+00> : vector<8x256xf32>
    %169 = tpu.matmul %165, %3, %cst_58 {dimension_numbers = #tpu.dot_dimension_numbers<[1], [0], [0], [1], [0, 0, 1, 1], [], []>} : vector<8x128xf32>, vector<128x256xf32>, vector<8x256xf32> -> vector<8x256xf32>
    %170 = vector.extract_strided_slice %168 {offsets = [0, 0], sizes = [8, 128], strides = [1, 1]} : vector<8x384xf32> to vector<8x128xf32>
    %171 = vector.extract_strided_slice %169 {offsets = [0, 0], sizes = [8, 128], strides = [1, 1]} : vector<8x256xf32> to vector<8x128xf32>
    %172 = arith.addf %170, %171 : vector<8x128xf32>
    %cst_59 = arith.constant 5.000000e-01 : f32
    %173 = vector.broadcast %cst_59 : f32 to vector<8x128xf32>
    %174 = arith.mulf %173, %172 : vector<8x128xf32>
    %175 = math.tanh %174 : vector<8x128xf32>
    %cst_60 = arith.constant 5.000000e-01 : f32
    %176 = vector.broadcast %cst_60 : f32 to vector<8x128xf32>
    %177 = arith.mulf %176, %175 : vector<8x128xf32>
    %cst_61 = arith.constant 5.000000e-01 : f32
    %178 = vector.broadcast %cst_61 : f32 to vector<8x128xf32>
    %179 = arith.addf %177, %178 : vector<8x128xf32>
    %180 = vector.extract_strided_slice %168 {offsets = [0, 128], sizes = [8, 128], strides = [1, 1]} : vector<8x384xf32> to vector<8x128xf32>
    %181 = vector.extract_strided_slice %169 {offsets = [0, 128], sizes = [8, 128], strides = [1, 1]} : vector<8x256xf32> to vector<8x128xf32>
    %182 = arith.addf %180, %181 : vector<8x128xf32>
    %cst_62 = arith.constant 5.000000e-01 : f32
    %183 = vector.broadcast %cst_62 : f32 to vector<8x128xf32>
    %184 = arith.mulf %183, %182 : vector<8x128xf32>
    %185 = math.tanh %184 : vector<8x128xf32>
    %cst_63 = arith.constant 5.000000e-01 : f32
    %186 = vector.broadcast %cst_63 : f32 to vector<8x128xf32>
    %187 = arith.mulf %186, %185 : vector<8x128xf32>
    %cst_64 = arith.constant 5.000000e-01 : f32
    %188 = vector.broadcast %cst_64 : f32 to vector<8x128xf32>
    %189 = arith.addf %187, %188 : vector<8x128xf32>
    %190 = vector.extract_strided_slice %168 {offsets = [0, 256], sizes = [8, 128], strides = [1, 1]} : vector<8x384xf32> to vector<8x128xf32>
    %191 = arith.mulf %189, %165 : vector<8x128xf32>
    %cst_65 = arith.constant dense<0.000000e+00> : vector<8x128xf32>
    %192 = tpu.matmul %191, %4, %cst_65 {dimension_numbers = #tpu.dot_dimension_numbers<[1], [0], [0], [1], [0, 0, 1, 1], [], []>} : vector<8x128xf32>, vector<128x128xf32>, vector<8x128xf32> -> vector<8x128xf32>
    %193 = arith.addf %190, %192 : vector<8x128xf32>
    %194 = math.tanh %193 : vector<8x128xf32>
    %195 = arith.subf %194, %165 : vector<8x128xf32>
    %196 = arith.mulf %179, %195 : vector<8x128xf32>
    %197 = arith.addf %165, %196 : vector<8x128xf32>
    %c6_i32 = arith.constant 6 : i32
    %198 = arith.index_cast %c6_i32 : i32 to index
    %c0_66 = arith.constant 0 : index
    %c0_67 = arith.constant 0 : index
    %199 = vector.load %arg2[%198, %c0_66, %c0_67] : memref<16x8x384xf32, #tpu.memory_space<vmem>>, vector<1x8x384xf32>
    %200 = vector.shape_cast %199 : vector<1x8x384xf32> to vector<8x384xf32>
    %cst_68 = arith.constant dense<0.000000e+00> : vector<8x256xf32>
    %201 = tpu.matmul %197, %3, %cst_68 {dimension_numbers = #tpu.dot_dimension_numbers<[1], [0], [0], [1], [0, 0, 1, 1], [], []>} : vector<8x128xf32>, vector<128x256xf32>, vector<8x256xf32> -> vector<8x256xf32>
    %202 = vector.extract_strided_slice %200 {offsets = [0, 0], sizes = [8, 128], strides = [1, 1]} : vector<8x384xf32> to vector<8x128xf32>
    %203 = vector.extract_strided_slice %201 {offsets = [0, 0], sizes = [8, 128], strides = [1, 1]} : vector<8x256xf32> to vector<8x128xf32>
    %204 = arith.addf %202, %203 : vector<8x128xf32>
    %cst_69 = arith.constant 5.000000e-01 : f32
    %205 = vector.broadcast %cst_69 : f32 to vector<8x128xf32>
    %206 = arith.mulf %205, %204 : vector<8x128xf32>
    %207 = math.tanh %206 : vector<8x128xf32>
    %cst_70 = arith.constant 5.000000e-01 : f32
    %208 = vector.broadcast %cst_70 : f32 to vector<8x128xf32>
    %209 = arith.mulf %208, %207 : vector<8x128xf32>
    %cst_71 = arith.constant 5.000000e-01 : f32
    %210 = vector.broadcast %cst_71 : f32 to vector<8x128xf32>
    %211 = arith.addf %209, %210 : vector<8x128xf32>
    %212 = vector.extract_strided_slice %200 {offsets = [0, 128], sizes = [8, 128], strides = [1, 1]} : vector<8x384xf32> to vector<8x128xf32>
    %213 = vector.extract_strided_slice %201 {offsets = [0, 128], sizes = [8, 128], strides = [1, 1]} : vector<8x256xf32> to vector<8x128xf32>
    %214 = arith.addf %212, %213 : vector<8x128xf32>
    %cst_72 = arith.constant 5.000000e-01 : f32
    %215 = vector.broadcast %cst_72 : f32 to vector<8x128xf32>
    %216 = arith.mulf %215, %214 : vector<8x128xf32>
    %217 = math.tanh %216 : vector<8x128xf32>
    %cst_73 = arith.constant 5.000000e-01 : f32
    %218 = vector.broadcast %cst_73 : f32 to vector<8x128xf32>
    %219 = arith.mulf %218, %217 : vector<8x128xf32>
    %cst_74 = arith.constant 5.000000e-01 : f32
    %220 = vector.broadcast %cst_74 : f32 to vector<8x128xf32>
    %221 = arith.addf %219, %220 : vector<8x128xf32>
    %222 = vector.extract_strided_slice %200 {offsets = [0, 256], sizes = [8, 128], strides = [1, 1]} : vector<8x384xf32> to vector<8x128xf32>
    %223 = arith.mulf %221, %197 : vector<8x128xf32>
    %cst_75 = arith.constant dense<0.000000e+00> : vector<8x128xf32>
    %224 = tpu.matmul %223, %4, %cst_75 {dimension_numbers = #tpu.dot_dimension_numbers<[1], [0], [0], [1], [0, 0, 1, 1], [], []>} : vector<8x128xf32>, vector<128x128xf32>, vector<8x128xf32> -> vector<8x128xf32>
    %225 = arith.addf %222, %224 : vector<8x128xf32>
    %226 = math.tanh %225 : vector<8x128xf32>
    %227 = arith.subf %226, %197 : vector<8x128xf32>
    %228 = arith.mulf %211, %227 : vector<8x128xf32>
    %229 = arith.addf %197, %228 : vector<8x128xf32>
    %c7_i32 = arith.constant 7 : i32
    %230 = arith.index_cast %c7_i32 : i32 to index
    %c0_76 = arith.constant 0 : index
    %c0_77 = arith.constant 0 : index
    %231 = vector.load %arg2[%230, %c0_76, %c0_77] : memref<16x8x384xf32, #tpu.memory_space<vmem>>, vector<1x8x384xf32>
    %232 = vector.shape_cast %231 : vector<1x8x384xf32> to vector<8x384xf32>
    %cst_78 = arith.constant dense<0.000000e+00> : vector<8x256xf32>
    %233 = tpu.matmul %229, %3, %cst_78 {dimension_numbers = #tpu.dot_dimension_numbers<[1], [0], [0], [1], [0, 0, 1, 1], [], []>} : vector<8x128xf32>, vector<128x256xf32>, vector<8x256xf32> -> vector<8x256xf32>
    %234 = vector.extract_strided_slice %232 {offsets = [0, 0], sizes = [8, 128], strides = [1, 1]} : vector<8x384xf32> to vector<8x128xf32>
    %235 = vector.extract_strided_slice %233 {offsets = [0, 0], sizes = [8, 128], strides = [1, 1]} : vector<8x256xf32> to vector<8x128xf32>
    %236 = arith.addf %234, %235 : vector<8x128xf32>
    %cst_79 = arith.constant 5.000000e-01 : f32
    %237 = vector.broadcast %cst_79 : f32 to vector<8x128xf32>
    %238 = arith.mulf %237, %236 : vector<8x128xf32>
    %239 = math.tanh %238 : vector<8x128xf32>
    %cst_80 = arith.constant 5.000000e-01 : f32
    %240 = vector.broadcast %cst_80 : f32 to vector<8x128xf32>
    %241 = arith.mulf %240, %239 : vector<8x128xf32>
    %cst_81 = arith.constant 5.000000e-01 : f32
    %242 = vector.broadcast %cst_81 : f32 to vector<8x128xf32>
    %243 = arith.addf %241, %242 : vector<8x128xf32>
    %244 = vector.extract_strided_slice %232 {offsets = [0, 128], sizes = [8, 128], strides = [1, 1]} : vector<8x384xf32> to vector<8x128xf32>
    %245 = vector.extract_strided_slice %233 {offsets = [0, 128], sizes = [8, 128], strides = [1, 1]} : vector<8x256xf32> to vector<8x128xf32>
    %246 = arith.addf %244, %245 : vector<8x128xf32>
    %cst_82 = arith.constant 5.000000e-01 : f32
    %247 = vector.broadcast %cst_82 : f32 to vector<8x128xf32>
    %248 = arith.mulf %247, %246 : vector<8x128xf32>
    %249 = math.tanh %248 : vector<8x128xf32>
    %cst_83 = arith.constant 5.000000e-01 : f32
    %250 = vector.broadcast %cst_83 : f32 to vector<8x128xf32>
    %251 = arith.mulf %250, %249 : vector<8x128xf32>
    %cst_84 = arith.constant 5.000000e-01 : f32
    %252 = vector.broadcast %cst_84 : f32 to vector<8x128xf32>
    %253 = arith.addf %251, %252 : vector<8x128xf32>
    %254 = vector.extract_strided_slice %232 {offsets = [0, 256], sizes = [8, 128], strides = [1, 1]} : vector<8x384xf32> to vector<8x128xf32>
    %255 = arith.mulf %253, %229 : vector<8x128xf32>
    %cst_85 = arith.constant dense<0.000000e+00> : vector<8x128xf32>
    %256 = tpu.matmul %255, %4, %cst_85 {dimension_numbers = #tpu.dot_dimension_numbers<[1], [0], [0], [1], [0, 0, 1, 1], [], []>} : vector<8x128xf32>, vector<128x128xf32>, vector<8x128xf32> -> vector<8x128xf32>
    %257 = arith.addf %254, %256 : vector<8x128xf32>
    %258 = math.tanh %257 : vector<8x128xf32>
    %259 = arith.subf %258, %229 : vector<8x128xf32>
    %260 = arith.mulf %243, %259 : vector<8x128xf32>
    %261 = arith.addf %229, %260 : vector<8x128xf32>
    %c8_i32 = arith.constant 8 : i32
    %262 = arith.index_cast %c8_i32 : i32 to index
    %c0_86 = arith.constant 0 : index
    %c0_87 = arith.constant 0 : index
    %263 = vector.load %arg2[%262, %c0_86, %c0_87] : memref<16x8x384xf32, #tpu.memory_space<vmem>>, vector<1x8x384xf32>
    %264 = vector.shape_cast %263 : vector<1x8x384xf32> to vector<8x384xf32>
    %cst_88 = arith.constant dense<0.000000e+00> : vector<8x256xf32>
    %265 = tpu.matmul %261, %3, %cst_88 {dimension_numbers = #tpu.dot_dimension_numbers<[1], [0], [0], [1], [0, 0, 1, 1], [], []>} : vector<8x128xf32>, vector<128x256xf32>, vector<8x256xf32> -> vector<8x256xf32>
    %266 = vector.extract_strided_slice %264 {offsets = [0, 0], sizes = [8, 128], strides = [1, 1]} : vector<8x384xf32> to vector<8x128xf32>
    %267 = vector.extract_strided_slice %265 {offsets = [0, 0], sizes = [8, 128], strides = [1, 1]} : vector<8x256xf32> to vector<8x128xf32>
    %268 = arith.addf %266, %267 : vector<8x128xf32>
    %cst_89 = arith.constant 5.000000e-01 : f32
    %269 = vector.broadcast %cst_89 : f32 to vector<8x128xf32>
    %270 = arith.mulf %269, %268 : vector<8x128xf32>
    %271 = math.tanh %270 : vector<8x128xf32>
    %cst_90 = arith.constant 5.000000e-01 : f32
    %272 = vector.broadcast %cst_90 : f32 to vector<8x128xf32>
    %273 = arith.mulf %272, %271 : vector<8x128xf32>
    %cst_91 = arith.constant 5.000000e-01 : f32
    %274 = vector.broadcast %cst_91 : f32 to vector<8x128xf32>
    %275 = arith.addf %273, %274 : vector<8x128xf32>
    %276 = vector.extract_strided_slice %264 {offsets = [0, 128], sizes = [8, 128], strides = [1, 1]} : vector<8x384xf32> to vector<8x128xf32>
    %277 = vector.extract_strided_slice %265 {offsets = [0, 128], sizes = [8, 128], strides = [1, 1]} : vector<8x256xf32> to vector<8x128xf32>
    %278 = arith.addf %276, %277 : vector<8x128xf32>
    %cst_92 = arith.constant 5.000000e-01 : f32
    %279 = vector.broadcast %cst_92 : f32 to vector<8x128xf32>
    %280 = arith.mulf %279, %278 : vector<8x128xf32>
    %281 = math.tanh %280 : vector<8x128xf32>
    %cst_93 = arith.constant 5.000000e-01 : f32
    %282 = vector.broadcast %cst_93 : f32 to vector<8x128xf32>
    %283 = arith.mulf %282, %281 : vector<8x128xf32>
    %cst_94 = arith.constant 5.000000e-01 : f32
    %284 = vector.broadcast %cst_94 : f32 to vector<8x128xf32>
    %285 = arith.addf %283, %284 : vector<8x128xf32>
    %286 = vector.extract_strided_slice %264 {offsets = [0, 256], sizes = [8, 128], strides = [1, 1]} : vector<8x384xf32> to vector<8x128xf32>
    %287 = arith.mulf %285, %261 : vector<8x128xf32>
    %cst_95 = arith.constant dense<0.000000e+00> : vector<8x128xf32>
    %288 = tpu.matmul %287, %4, %cst_95 {dimension_numbers = #tpu.dot_dimension_numbers<[1], [0], [0], [1], [0, 0, 1, 1], [], []>} : vector<8x128xf32>, vector<128x128xf32>, vector<8x128xf32> -> vector<8x128xf32>
    %289 = arith.addf %286, %288 : vector<8x128xf32>
    %290 = math.tanh %289 : vector<8x128xf32>
    %291 = arith.subf %290, %261 : vector<8x128xf32>
    %292 = arith.mulf %275, %291 : vector<8x128xf32>
    %293 = arith.addf %261, %292 : vector<8x128xf32>
    %c9_i32 = arith.constant 9 : i32
    %294 = arith.index_cast %c9_i32 : i32 to index
    %c0_96 = arith.constant 0 : index
    %c0_97 = arith.constant 0 : index
    %295 = vector.load %arg2[%294, %c0_96, %c0_97] : memref<16x8x384xf32, #tpu.memory_space<vmem>>, vector<1x8x384xf32>
    %296 = vector.shape_cast %295 : vector<1x8x384xf32> to vector<8x384xf32>
    %cst_98 = arith.constant dense<0.000000e+00> : vector<8x256xf32>
    %297 = tpu.matmul %293, %3, %cst_98 {dimension_numbers = #tpu.dot_dimension_numbers<[1], [0], [0], [1], [0, 0, 1, 1], [], []>} : vector<8x128xf32>, vector<128x256xf32>, vector<8x256xf32> -> vector<8x256xf32>
    %298 = vector.extract_strided_slice %296 {offsets = [0, 0], sizes = [8, 128], strides = [1, 1]} : vector<8x384xf32> to vector<8x128xf32>
    %299 = vector.extract_strided_slice %297 {offsets = [0, 0], sizes = [8, 128], strides = [1, 1]} : vector<8x256xf32> to vector<8x128xf32>
    %300 = arith.addf %298, %299 : vector<8x128xf32>
    %cst_99 = arith.constant 5.000000e-01 : f32
    %301 = vector.broadcast %cst_99 : f32 to vector<8x128xf32>
    %302 = arith.mulf %301, %300 : vector<8x128xf32>
    %303 = math.tanh %302 : vector<8x128xf32>
    %cst_100 = arith.constant 5.000000e-01 : f32
    %304 = vector.broadcast %cst_100 : f32 to vector<8x128xf32>
    %305 = arith.mulf %304, %303 : vector<8x128xf32>
    %cst_101 = arith.constant 5.000000e-01 : f32
    %306 = vector.broadcast %cst_101 : f32 to vector<8x128xf32>
    %307 = arith.addf %305, %306 : vector<8x128xf32>
    %308 = vector.extract_strided_slice %296 {offsets = [0, 128], sizes = [8, 128], strides = [1, 1]} : vector<8x384xf32> to vector<8x128xf32>
    %309 = vector.extract_strided_slice %297 {offsets = [0, 128], sizes = [8, 128], strides = [1, 1]} : vector<8x256xf32> to vector<8x128xf32>
    %310 = arith.addf %308, %309 : vector<8x128xf32>
    %cst_102 = arith.constant 5.000000e-01 : f32
    %311 = vector.broadcast %cst_102 : f32 to vector<8x128xf32>
    %312 = arith.mulf %311, %310 : vector<8x128xf32>
    %313 = math.tanh %312 : vector<8x128xf32>
    %cst_103 = arith.constant 5.000000e-01 : f32
    %314 = vector.broadcast %cst_103 : f32 to vector<8x128xf32>
    %315 = arith.mulf %314, %313 : vector<8x128xf32>
    %cst_104 = arith.constant 5.000000e-01 : f32
    %316 = vector.broadcast %cst_104 : f32 to vector<8x128xf32>
    %317 = arith.addf %315, %316 : vector<8x128xf32>
    %318 = vector.extract_strided_slice %296 {offsets = [0, 256], sizes = [8, 128], strides = [1, 1]} : vector<8x384xf32> to vector<8x128xf32>
    %319 = arith.mulf %317, %293 : vector<8x128xf32>
    %cst_105 = arith.constant dense<0.000000e+00> : vector<8x128xf32>
    %320 = tpu.matmul %319, %4, %cst_105 {dimension_numbers = #tpu.dot_dimension_numbers<[1], [0], [0], [1], [0, 0, 1, 1], [], []>} : vector<8x128xf32>, vector<128x128xf32>, vector<8x128xf32> -> vector<8x128xf32>
    %321 = arith.addf %318, %320 : vector<8x128xf32>
    %322 = math.tanh %321 : vector<8x128xf32>
    %323 = arith.subf %322, %293 : vector<8x128xf32>
    %324 = arith.mulf %307, %323 : vector<8x128xf32>
    %325 = arith.addf %293, %324 : vector<8x128xf32>
    %c10_i32 = arith.constant 10 : i32
    %326 = arith.index_cast %c10_i32 : i32 to index
    %c0_106 = arith.constant 0 : index
    %c0_107 = arith.constant 0 : index
    %327 = vector.load %arg2[%326, %c0_106, %c0_107] : memref<16x8x384xf32, #tpu.memory_space<vmem>>, vector<1x8x384xf32>
    %328 = vector.shape_cast %327 : vector<1x8x384xf32> to vector<8x384xf32>
    %cst_108 = arith.constant dense<0.000000e+00> : vector<8x256xf32>
    %329 = tpu.matmul %325, %3, %cst_108 {dimension_numbers = #tpu.dot_dimension_numbers<[1], [0], [0], [1], [0, 0, 1, 1], [], []>} : vector<8x128xf32>, vector<128x256xf32>, vector<8x256xf32> -> vector<8x256xf32>
    %330 = vector.extract_strided_slice %328 {offsets = [0, 0], sizes = [8, 128], strides = [1, 1]} : vector<8x384xf32> to vector<8x128xf32>
    %331 = vector.extract_strided_slice %329 {offsets = [0, 0], sizes = [8, 128], strides = [1, 1]} : vector<8x256xf32> to vector<8x128xf32>
    %332 = arith.addf %330, %331 : vector<8x128xf32>
    %cst_109 = arith.constant 5.000000e-01 : f32
    %333 = vector.broadcast %cst_109 : f32 to vector<8x128xf32>
    %334 = arith.mulf %333, %332 : vector<8x128xf32>
    %335 = math.tanh %334 : vector<8x128xf32>
    %cst_110 = arith.constant 5.000000e-01 : f32
    %336 = vector.broadcast %cst_110 : f32 to vector<8x128xf32>
    %337 = arith.mulf %336, %335 : vector<8x128xf32>
    %cst_111 = arith.constant 5.000000e-01 : f32
    %338 = vector.broadcast %cst_111 : f32 to vector<8x128xf32>
    %339 = arith.addf %337, %338 : vector<8x128xf32>
    %340 = vector.extract_strided_slice %328 {offsets = [0, 128], sizes = [8, 128], strides = [1, 1]} : vector<8x384xf32> to vector<8x128xf32>
    %341 = vector.extract_strided_slice %329 {offsets = [0, 128], sizes = [8, 128], strides = [1, 1]} : vector<8x256xf32> to vector<8x128xf32>
    %342 = arith.addf %340, %341 : vector<8x128xf32>
    %cst_112 = arith.constant 5.000000e-01 : f32
    %343 = vector.broadcast %cst_112 : f32 to vector<8x128xf32>
    %344 = arith.mulf %343, %342 : vector<8x128xf32>
    %345 = math.tanh %344 : vector<8x128xf32>
    %cst_113 = arith.constant 5.000000e-01 : f32
    %346 = vector.broadcast %cst_113 : f32 to vector<8x128xf32>
    %347 = arith.mulf %346, %345 : vector<8x128xf32>
    %cst_114 = arith.constant 5.000000e-01 : f32
    %348 = vector.broadcast %cst_114 : f32 to vector<8x128xf32>
    %349 = arith.addf %347, %348 : vector<8x128xf32>
    %350 = vector.extract_strided_slice %328 {offsets = [0, 256], sizes = [8, 128], strides = [1, 1]} : vector<8x384xf32> to vector<8x128xf32>
    %351 = arith.mulf %349, %325 : vector<8x128xf32>
    %cst_115 = arith.constant dense<0.000000e+00> : vector<8x128xf32>
    %352 = tpu.matmul %351, %4, %cst_115 {dimension_numbers = #tpu.dot_dimension_numbers<[1], [0], [0], [1], [0, 0, 1, 1], [], []>} : vector<8x128xf32>, vector<128x128xf32>, vector<8x128xf32> -> vector<8x128xf32>
    %353 = arith.addf %350, %352 : vector<8x128xf32>
    %354 = math.tanh %353 : vector<8x128xf32>
    %355 = arith.subf %354, %325 : vector<8x128xf32>
    %356 = arith.mulf %339, %355 : vector<8x128xf32>
    %357 = arith.addf %325, %356 : vector<8x128xf32>
    %c11_i32 = arith.constant 11 : i32
    %358 = arith.index_cast %c11_i32 : i32 to index
    %c0_116 = arith.constant 0 : index
    %c0_117 = arith.constant 0 : index
    %359 = vector.load %arg2[%358, %c0_116, %c0_117] : memref<16x8x384xf32, #tpu.memory_space<vmem>>, vector<1x8x384xf32>
    %360 = vector.shape_cast %359 : vector<1x8x384xf32> to vector<8x384xf32>
    %cst_118 = arith.constant dense<0.000000e+00> : vector<8x256xf32>
    %361 = tpu.matmul %357, %3, %cst_118 {dimension_numbers = #tpu.dot_dimension_numbers<[1], [0], [0], [1], [0, 0, 1, 1], [], []>} : vector<8x128xf32>, vector<128x256xf32>, vector<8x256xf32> -> vector<8x256xf32>
    %362 = vector.extract_strided_slice %360 {offsets = [0, 0], sizes = [8, 128], strides = [1, 1]} : vector<8x384xf32> to vector<8x128xf32>
    %363 = vector.extract_strided_slice %361 {offsets = [0, 0], sizes = [8, 128], strides = [1, 1]} : vector<8x256xf32> to vector<8x128xf32>
    %364 = arith.addf %362, %363 : vector<8x128xf32>
    %cst_119 = arith.constant 5.000000e-01 : f32
    %365 = vector.broadcast %cst_119 : f32 to vector<8x128xf32>
    %366 = arith.mulf %365, %364 : vector<8x128xf32>
    %367 = math.tanh %366 : vector<8x128xf32>
    %cst_120 = arith.constant 5.000000e-01 : f32
    %368 = vector.broadcast %cst_120 : f32 to vector<8x128xf32>
    %369 = arith.mulf %368, %367 : vector<8x128xf32>
    %cst_121 = arith.constant 5.000000e-01 : f32
    %370 = vector.broadcast %cst_121 : f32 to vector<8x128xf32>
    %371 = arith.addf %369, %370 : vector<8x128xf32>
    %372 = vector.extract_strided_slice %360 {offsets = [0, 128], sizes = [8, 128], strides = [1, 1]} : vector<8x384xf32> to vector<8x128xf32>
    %373 = vector.extract_strided_slice %361 {offsets = [0, 128], sizes = [8, 128], strides = [1, 1]} : vector<8x256xf32> to vector<8x128xf32>
    %374 = arith.addf %372, %373 : vector<8x128xf32>
    %cst_122 = arith.constant 5.000000e-01 : f32
    %375 = vector.broadcast %cst_122 : f32 to vector<8x128xf32>
    %376 = arith.mulf %375, %374 : vector<8x128xf32>
    %377 = math.tanh %376 : vector<8x128xf32>
    %cst_123 = arith.constant 5.000000e-01 : f32
    %378 = vector.broadcast %cst_123 : f32 to vector<8x128xf32>
    %379 = arith.mulf %378, %377 : vector<8x128xf32>
    %cst_124 = arith.constant 5.000000e-01 : f32
    %380 = vector.broadcast %cst_124 : f32 to vector<8x128xf32>
    %381 = arith.addf %379, %380 : vector<8x128xf32>
    %382 = vector.extract_strided_slice %360 {offsets = [0, 256], sizes = [8, 128], strides = [1, 1]} : vector<8x384xf32> to vector<8x128xf32>
    %383 = arith.mulf %381, %357 : vector<8x128xf32>
    %cst_125 = arith.constant dense<0.000000e+00> : vector<8x128xf32>
    %384 = tpu.matmul %383, %4, %cst_125 {dimension_numbers = #tpu.dot_dimension_numbers<[1], [0], [0], [1], [0, 0, 1, 1], [], []>} : vector<8x128xf32>, vector<128x128xf32>, vector<8x128xf32> -> vector<8x128xf32>
    %385 = arith.addf %382, %384 : vector<8x128xf32>
    %386 = math.tanh %385 : vector<8x128xf32>
    %387 = arith.subf %386, %357 : vector<8x128xf32>
    %388 = arith.mulf %371, %387 : vector<8x128xf32>
    %389 = arith.addf %357, %388 : vector<8x128xf32>
    %c12_i32 = arith.constant 12 : i32
    %390 = arith.index_cast %c12_i32 : i32 to index
    %c0_126 = arith.constant 0 : index
    %c0_127 = arith.constant 0 : index
    %391 = vector.load %arg2[%390, %c0_126, %c0_127] : memref<16x8x384xf32, #tpu.memory_space<vmem>>, vector<1x8x384xf32>
    %392 = vector.shape_cast %391 : vector<1x8x384xf32> to vector<8x384xf32>
    %cst_128 = arith.constant dense<0.000000e+00> : vector<8x256xf32>
    %393 = tpu.matmul %389, %3, %cst_128 {dimension_numbers = #tpu.dot_dimension_numbers<[1], [0], [0], [1], [0, 0, 1, 1], [], []>} : vector<8x128xf32>, vector<128x256xf32>, vector<8x256xf32> -> vector<8x256xf32>
    %394 = vector.extract_strided_slice %392 {offsets = [0, 0], sizes = [8, 128], strides = [1, 1]} : vector<8x384xf32> to vector<8x128xf32>
    %395 = vector.extract_strided_slice %393 {offsets = [0, 0], sizes = [8, 128], strides = [1, 1]} : vector<8x256xf32> to vector<8x128xf32>
    %396 = arith.addf %394, %395 : vector<8x128xf32>
    %cst_129 = arith.constant 5.000000e-01 : f32
    %397 = vector.broadcast %cst_129 : f32 to vector<8x128xf32>
    %398 = arith.mulf %397, %396 : vector<8x128xf32>
    %399 = math.tanh %398 : vector<8x128xf32>
    %cst_130 = arith.constant 5.000000e-01 : f32
    %400 = vector.broadcast %cst_130 : f32 to vector<8x128xf32>
    %401 = arith.mulf %400, %399 : vector<8x128xf32>
    %cst_131 = arith.constant 5.000000e-01 : f32
    %402 = vector.broadcast %cst_131 : f32 to vector<8x128xf32>
    %403 = arith.addf %401, %402 : vector<8x128xf32>
    %404 = vector.extract_strided_slice %392 {offsets = [0, 128], sizes = [8, 128], strides = [1, 1]} : vector<8x384xf32> to vector<8x128xf32>
    %405 = vector.extract_strided_slice %393 {offsets = [0, 128], sizes = [8, 128], strides = [1, 1]} : vector<8x256xf32> to vector<8x128xf32>
    %406 = arith.addf %404, %405 : vector<8x128xf32>
    %cst_132 = arith.constant 5.000000e-01 : f32
    %407 = vector.broadcast %cst_132 : f32 to vector<8x128xf32>
    %408 = arith.mulf %407, %406 : vector<8x128xf32>
    %409 = math.tanh %408 : vector<8x128xf32>
    %cst_133 = arith.constant 5.000000e-01 : f32
    %410 = vector.broadcast %cst_133 : f32 to vector<8x128xf32>
    %411 = arith.mulf %410, %409 : vector<8x128xf32>
    %cst_134 = arith.constant 5.000000e-01 : f32
    %412 = vector.broadcast %cst_134 : f32 to vector<8x128xf32>
    %413 = arith.addf %411, %412 : vector<8x128xf32>
    %414 = vector.extract_strided_slice %392 {offsets = [0, 256], sizes = [8, 128], strides = [1, 1]} : vector<8x384xf32> to vector<8x128xf32>
    %415 = arith.mulf %413, %389 : vector<8x128xf32>
    %cst_135 = arith.constant dense<0.000000e+00> : vector<8x128xf32>
    %416 = tpu.matmul %415, %4, %cst_135 {dimension_numbers = #tpu.dot_dimension_numbers<[1], [0], [0], [1], [0, 0, 1, 1], [], []>} : vector<8x128xf32>, vector<128x128xf32>, vector<8x128xf32> -> vector<8x128xf32>
    %417 = arith.addf %414, %416 : vector<8x128xf32>
    %418 = math.tanh %417 : vector<8x128xf32>
    %419 = arith.subf %418, %389 : vector<8x128xf32>
    %420 = arith.mulf %403, %419 : vector<8x128xf32>
    %421 = arith.addf %389, %420 : vector<8x128xf32>
    %c13_i32 = arith.constant 13 : i32
    %422 = arith.index_cast %c13_i32 : i32 to index
    %c0_136 = arith.constant 0 : index
    %c0_137 = arith.constant 0 : index
    %423 = vector.load %arg2[%422, %c0_136, %c0_137] : memref<16x8x384xf32, #tpu.memory_space<vmem>>, vector<1x8x384xf32>
    %424 = vector.shape_cast %423 : vector<1x8x384xf32> to vector<8x384xf32>
    %cst_138 = arith.constant dense<0.000000e+00> : vector<8x256xf32>
    %425 = tpu.matmul %421, %3, %cst_138 {dimension_numbers = #tpu.dot_dimension_numbers<[1], [0], [0], [1], [0, 0, 1, 1], [], []>} : vector<8x128xf32>, vector<128x256xf32>, vector<8x256xf32> -> vector<8x256xf32>
    %426 = vector.extract_strided_slice %424 {offsets = [0, 0], sizes = [8, 128], strides = [1, 1]} : vector<8x384xf32> to vector<8x128xf32>
    %427 = vector.extract_strided_slice %425 {offsets = [0, 0], sizes = [8, 128], strides = [1, 1]} : vector<8x256xf32> to vector<8x128xf32>
    %428 = arith.addf %426, %427 : vector<8x128xf32>
    %cst_139 = arith.constant 5.000000e-01 : f32
    %429 = vector.broadcast %cst_139 : f32 to vector<8x128xf32>
    %430 = arith.mulf %429, %428 : vector<8x128xf32>
    %431 = math.tanh %430 : vector<8x128xf32>
    %cst_140 = arith.constant 5.000000e-01 : f32
    %432 = vector.broadcast %cst_140 : f32 to vector<8x128xf32>
    %433 = arith.mulf %432, %431 : vector<8x128xf32>
    %cst_141 = arith.constant 5.000000e-01 : f32
    %434 = vector.broadcast %cst_141 : f32 to vector<8x128xf32>
    %435 = arith.addf %433, %434 : vector<8x128xf32>
    %436 = vector.extract_strided_slice %424 {offsets = [0, 128], sizes = [8, 128], strides = [1, 1]} : vector<8x384xf32> to vector<8x128xf32>
    %437 = vector.extract_strided_slice %425 {offsets = [0, 128], sizes = [8, 128], strides = [1, 1]} : vector<8x256xf32> to vector<8x128xf32>
    %438 = arith.addf %436, %437 : vector<8x128xf32>
    %cst_142 = arith.constant 5.000000e-01 : f32
    %439 = vector.broadcast %cst_142 : f32 to vector<8x128xf32>
    %440 = arith.mulf %439, %438 : vector<8x128xf32>
    %441 = math.tanh %440 : vector<8x128xf32>
    %cst_143 = arith.constant 5.000000e-01 : f32
    %442 = vector.broadcast %cst_143 : f32 to vector<8x128xf32>
    %443 = arith.mulf %442, %441 : vector<8x128xf32>
    %cst_144 = arith.constant 5.000000e-01 : f32
    %444 = vector.broadcast %cst_144 : f32 to vector<8x128xf32>
    %445 = arith.addf %443, %444 : vector<8x128xf32>
    %446 = vector.extract_strided_slice %424 {offsets = [0, 256], sizes = [8, 128], strides = [1, 1]} : vector<8x384xf32> to vector<8x128xf32>
    %447 = arith.mulf %445, %421 : vector<8x128xf32>
    %cst_145 = arith.constant dense<0.000000e+00> : vector<8x128xf32>
    %448 = tpu.matmul %447, %4, %cst_145 {dimension_numbers = #tpu.dot_dimension_numbers<[1], [0], [0], [1], [0, 0, 1, 1], [], []>} : vector<8x128xf32>, vector<128x128xf32>, vector<8x128xf32> -> vector<8x128xf32>
    %449 = arith.addf %446, %448 : vector<8x128xf32>
    %450 = math.tanh %449 : vector<8x128xf32>
    %451 = arith.subf %450, %421 : vector<8x128xf32>
    %452 = arith.mulf %435, %451 : vector<8x128xf32>
    %453 = arith.addf %421, %452 : vector<8x128xf32>
    %c14_i32 = arith.constant 14 : i32
    %454 = arith.index_cast %c14_i32 : i32 to index
    %c0_146 = arith.constant 0 : index
    %c0_147 = arith.constant 0 : index
    %455 = vector.load %arg2[%454, %c0_146, %c0_147] : memref<16x8x384xf32, #tpu.memory_space<vmem>>, vector<1x8x384xf32>
    %456 = vector.shape_cast %455 : vector<1x8x384xf32> to vector<8x384xf32>
    %cst_148 = arith.constant dense<0.000000e+00> : vector<8x256xf32>
    %457 = tpu.matmul %453, %3, %cst_148 {dimension_numbers = #tpu.dot_dimension_numbers<[1], [0], [0], [1], [0, 0, 1, 1], [], []>} : vector<8x128xf32>, vector<128x256xf32>, vector<8x256xf32> -> vector<8x256xf32>
    %458 = vector.extract_strided_slice %456 {offsets = [0, 0], sizes = [8, 128], strides = [1, 1]} : vector<8x384xf32> to vector<8x128xf32>
    %459 = vector.extract_strided_slice %457 {offsets = [0, 0], sizes = [8, 128], strides = [1, 1]} : vector<8x256xf32> to vector<8x128xf32>
    %460 = arith.addf %458, %459 : vector<8x128xf32>
    %cst_149 = arith.constant 5.000000e-01 : f32
    %461 = vector.broadcast %cst_149 : f32 to vector<8x128xf32>
    %462 = arith.mulf %461, %460 : vector<8x128xf32>
    %463 = math.tanh %462 : vector<8x128xf32>
    %cst_150 = arith.constant 5.000000e-01 : f32
    %464 = vector.broadcast %cst_150 : f32 to vector<8x128xf32>
    %465 = arith.mulf %464, %463 : vector<8x128xf32>
    %cst_151 = arith.constant 5.000000e-01 : f32
    %466 = vector.broadcast %cst_151 : f32 to vector<8x128xf32>
    %467 = arith.addf %465, %466 : vector<8x128xf32>
    %468 = vector.extract_strided_slice %456 {offsets = [0, 128], sizes = [8, 128], strides = [1, 1]} : vector<8x384xf32> to vector<8x128xf32>
    %469 = vector.extract_strided_slice %457 {offsets = [0, 128], sizes = [8, 128], strides = [1, 1]} : vector<8x256xf32> to vector<8x128xf32>
    %470 = arith.addf %468, %469 : vector<8x128xf32>
    %cst_152 = arith.constant 5.000000e-01 : f32
    %471 = vector.broadcast %cst_152 : f32 to vector<8x128xf32>
    %472 = arith.mulf %471, %470 : vector<8x128xf32>
    %473 = math.tanh %472 : vector<8x128xf32>
    %cst_153 = arith.constant 5.000000e-01 : f32
    %474 = vector.broadcast %cst_153 : f32 to vector<8x128xf32>
    %475 = arith.mulf %474, %473 : vector<8x128xf32>
    %cst_154 = arith.constant 5.000000e-01 : f32
    %476 = vector.broadcast %cst_154 : f32 to vector<8x128xf32>
    %477 = arith.addf %475, %476 : vector<8x128xf32>
    %478 = vector.extract_strided_slice %456 {offsets = [0, 256], sizes = [8, 128], strides = [1, 1]} : vector<8x384xf32> to vector<8x128xf32>
    %479 = arith.mulf %477, %453 : vector<8x128xf32>
    %cst_155 = arith.constant dense<0.000000e+00> : vector<8x128xf32>
    %480 = tpu.matmul %479, %4, %cst_155 {dimension_numbers = #tpu.dot_dimension_numbers<[1], [0], [0], [1], [0, 0, 1, 1], [], []>} : vector<8x128xf32>, vector<128x128xf32>, vector<8x128xf32> -> vector<8x128xf32>
    %481 = arith.addf %478, %480 : vector<8x128xf32>
    %482 = math.tanh %481 : vector<8x128xf32>
    %483 = arith.subf %482, %453 : vector<8x128xf32>
    %484 = arith.mulf %467, %483 : vector<8x128xf32>
    %485 = arith.addf %453, %484 : vector<8x128xf32>
    %c15_i32 = arith.constant 15 : i32
    %486 = arith.index_cast %c15_i32 : i32 to index
    %c0_156 = arith.constant 0 : index
    %c0_157 = arith.constant 0 : index
    %487 = vector.load %arg2[%486, %c0_156, %c0_157] : memref<16x8x384xf32, #tpu.memory_space<vmem>>, vector<1x8x384xf32>
    %488 = vector.shape_cast %487 : vector<1x8x384xf32> to vector<8x384xf32>
    %cst_158 = arith.constant dense<0.000000e+00> : vector<8x256xf32>
    %489 = tpu.matmul %485, %3, %cst_158 {dimension_numbers = #tpu.dot_dimension_numbers<[1], [0], [0], [1], [0, 0, 1, 1], [], []>} : vector<8x128xf32>, vector<128x256xf32>, vector<8x256xf32> -> vector<8x256xf32>
    %490 = vector.extract_strided_slice %488 {offsets = [0, 0], sizes = [8, 128], strides = [1, 1]} : vector<8x384xf32> to vector<8x128xf32>
    %491 = vector.extract_strided_slice %489 {offsets = [0, 0], sizes = [8, 128], strides = [1, 1]} : vector<8x256xf32> to vector<8x128xf32>
    %492 = arith.addf %490, %491 : vector<8x128xf32>
    %cst_159 = arith.constant 5.000000e-01 : f32
    %493 = vector.broadcast %cst_159 : f32 to vector<8x128xf32>
    %494 = arith.mulf %493, %492 : vector<8x128xf32>
    %495 = math.tanh %494 : vector<8x128xf32>
    %cst_160 = arith.constant 5.000000e-01 : f32
    %496 = vector.broadcast %cst_160 : f32 to vector<8x128xf32>
    %497 = arith.mulf %496, %495 : vector<8x128xf32>
    %cst_161 = arith.constant 5.000000e-01 : f32
    %498 = vector.broadcast %cst_161 : f32 to vector<8x128xf32>
    %499 = arith.addf %497, %498 : vector<8x128xf32>
    %500 = vector.extract_strided_slice %488 {offsets = [0, 128], sizes = [8, 128], strides = [1, 1]} : vector<8x384xf32> to vector<8x128xf32>
    %501 = vector.extract_strided_slice %489 {offsets = [0, 128], sizes = [8, 128], strides = [1, 1]} : vector<8x256xf32> to vector<8x128xf32>
    %502 = arith.addf %500, %501 : vector<8x128xf32>
    %cst_162 = arith.constant 5.000000e-01 : f32
    %503 = vector.broadcast %cst_162 : f32 to vector<8x128xf32>
    %504 = arith.mulf %503, %502 : vector<8x128xf32>
    %505 = math.tanh %504 : vector<8x128xf32>
    %cst_163 = arith.constant 5.000000e-01 : f32
    %506 = vector.broadcast %cst_163 : f32 to vector<8x128xf32>
    %507 = arith.mulf %506, %505 : vector<8x128xf32>
    %cst_164 = arith.constant 5.000000e-01 : f32
    %508 = vector.broadcast %cst_164 : f32 to vector<8x128xf32>
    %509 = arith.addf %507, %508 : vector<8x128xf32>
    %510 = vector.extract_strided_slice %488 {offsets = [0, 256], sizes = [8, 128], strides = [1, 1]} : vector<8x384xf32> to vector<8x128xf32>
    %511 = arith.mulf %509, %485 : vector<8x128xf32>
    %cst_165 = arith.constant dense<0.000000e+00> : vector<8x128xf32>
    %512 = tpu.matmul %511, %4, %cst_165 {dimension_numbers = #tpu.dot_dimension_numbers<[1], [0], [0], [1], [0, 0, 1, 1], [], []>} : vector<8x128xf32>, vector<128x128xf32>, vector<8x128xf32> -> vector<8x128xf32>
    %513 = arith.addf %510, %512 : vector<8x128xf32>
    %514 = math.tanh %513 : vector<8x128xf32>
    %515 = arith.subf %514, %485 : vector<8x128xf32>
    %516 = arith.mulf %499, %515 : vector<8x128xf32>
    %517 = arith.addf %485, %516 : vector<8x128xf32>
    %c16_i32 = arith.constant 16 : i32
    %c0_166 = arith.constant 0 : index
    %c0_167 = arith.constant 0 : index
    %518 = vector.load %arg6[%c0_166, %c0_167] : memref<8x128xf32, #tpu.memory_space<vmem>>, vector<8x128xf32>
    tpu.vector_store %arg6[%c0_166, %c0_167], %517 {strides = array<i32>} : memref<8x128xf32, #tpu.memory_space<vmem>>, vector<8x128xf32>,
    return
  }
  func.func @transform_0(%arg0: i32, %arg1: i32) -> (i32, i32, i32) {
    %c0_i32 = arith.constant 0 : i32
    %c0_i32_0 = arith.constant 0 : i32
    return %arg1, %arg0, %c0_i32 : i32, i32, i32
  }
  func.func @transform_1(%arg0: i32, %arg1: i32) -> (i32, i32) {
    %c0_i32 = arith.constant 0 : i32
    %c0_i32_0 = arith.constant 0 : i32
    return %arg0, %c0_i32 : i32, i32
  }
  func.func @transform_2(%arg0: i32, %arg1: i32) -> (i32, i32) {
    %c0_i32 = arith.constant 0 : i32
    %c0_i32_0 = arith.constant 0 : i32
    %c0_i32_1 = arith.constant 0 : i32
    return %c0_i32, %c0_i32_0 : i32, i32
  }
  func.func @transform_3(%arg0: i32, %arg1: i32) -> (i32, i32) {
    %c0_i32 = arith.constant 0 : i32
    %c0_i32_0 = arith.constant 0 : i32
    %c0_i32_1 = arith.constant 0 : i32
    return %c0_i32, %c0_i32_0 : i32, i32
  }
  func.func @transform_4(%arg0: i32, %arg1: i32) -> (i32, i32) {
    %c0_i32 = arith.constant 0 : i32
    %c0_i32_0 = arith.constant 0 : i32
    return %arg0, %c0_i32 : i32, i32
  }
}

module attributes {stable_mosaic.version = 11 : i64} {
  func.func @_gru_recurrent_kernel(%arg0: i32, %arg1: i32, %arg2: memref<16x8x384xf32, #tpu.memory_space<vmem>>, %arg3: memref<8x128xf32, #tpu.memory_space<vmem>>, %arg4: memref<128x256xf32, #tpu.memory_space<vmem>>, %arg5: memref<128x128xf32, #tpu.memory_space<vmem>>, %arg6: memref<8x128xf32, #tpu.memory_space<vmem>>) attributes {dimension_semantics = [#tpu.dimension_semantics<parallel>, #tpu.dimension_semantics<arbitrary>], iteration_bounds = array<i64: 1, 1>, scalar_prefetch = 0 : i64, scratch_operands = 0 : i64, tpu.core_type = #tpu.core_type<tc>, window_params = [{transform_indices = @transform_0, window_bounds = array<i64: 16, 8, 384>}, {transform_indices = @transform_1, window_bounds = array<i64: 8, 128>}, {pipeline_mode = #tpu.pipeline_mode<synchronous>, transform_indices = @transform_2, window_bounds = array<i64: 128, 256>}, {pipeline_mode = #tpu.pipeline_mode<synchronous>, transform_indices = @transform_3, window_bounds = array<i64: 128, 128>}, {transform_indices = @transform_4, window_bounds = array<i64: 8, 128>}]} {
    %c0_i32 = arith.constant 0 : i32
    %0 = arith.cmpi eq, %arg1, %c0_i32 : i32
    %1 = arith.extui %0 : i1 to i32
    %c0_i32_0 = arith.constant 0 : i32
    %2 = arith.cmpi ne, %1, %c0_i32_0 : i32
    scf.if %2 {
      %c0_168 = arith.constant 0 : index
      %c0_169 = arith.constant 0 : index
      %519 = vector.load %arg3[%c0_168, %c0_169] : memref<8x128xf32, #tpu.memory_space<vmem>>, vector<8x128xf32>
      %c0_170 = arith.constant 0 : index
      %c0_171 = arith.constant 0 : index
      %520 = vector.load %arg6[%c0_170, %c0_171] : memref<8x128xf32, #tpu.memory_space<vmem>>, vector<8x128xf32>
      tpu.vector_store %arg6[%c0_170, %c0_171], %519 {strides = array<i32>} : memref<8x128xf32, #tpu.memory_space<vmem>>, vector<8x128xf32>,
    } else {
    }
    %c0 = arith.constant 0 : index
    %c0_1 = arith.constant 0 : index
    %3 = vector.load %arg4[%c0, %c0_1] : memref<128x256xf32, #tpu.memory_space<vmem>>, vector<128x256xf32>
    %c0_2 = arith.constant 0 : index
    %c0_3 = arith.constant 0 : index
    %4 = vector.load %arg5[%c0_2, %c0_3] : memref<128x128xf32, #tpu.memory_space<vmem>>, vector<128x128xf32>
    %c0_4 = arith.constant 0 : index
    %c0_5 = arith.constant 0 : index
    %5 = vector.load %arg6[%c0_4, %c0_5] : memref<8x128xf32, #tpu.memory_space<vmem>>, vector<8x128xf32>
    %c0_i32_6 = arith.constant 0 : i32
    %6 = arith.index_cast %c0_i32_6 : i32 to index
    %c0_7 = arith.constant 0 : index
    %c0_8 = arith.constant 0 : index
    %7 = vector.load %arg2[%6, %c0_7, %c0_8] : memref<16x8x384xf32, #tpu.memory_space<vmem>>, vector<1x8x384xf32>
    %8 = vector.shape_cast %7 : vector<1x8x384xf32> to vector<8x384xf32>
    %cst = arith.constant dense<0.000000e+00> : vector<8x256xf32>
    %9 = tpu.matmul %5, %3, %cst {dimension_numbers = #tpu.dot_dimension_numbers<[1], [0], [0], [1], [0, 0, 1, 1], [], []>} : vector<8x128xf32>, vector<128x256xf32>, vector<8x256xf32> -> vector<8x256xf32>
    %10 = vector.extract_strided_slice %8 {offsets = [0, 0], sizes = [8, 128], strides = [1, 1]} : vector<8x384xf32> to vector<8x128xf32>
    %11 = vector.extract_strided_slice %9 {offsets = [0, 0], sizes = [8, 128], strides = [1, 1]} : vector<8x256xf32> to vector<8x128xf32>
    %12 = arith.addf %10, %11 : vector<8x128xf32>
    %cst_9 = arith.constant 5.000000e-01 : f32
    %13 = vector.broadcast %cst_9 : f32 to vector<8x128xf32>
    %14 = arith.mulf %13, %12 : vector<8x128xf32>
    %15 = math.tanh %14 : vector<8x128xf32>
    %cst_10 = arith.constant 5.000000e-01 : f32
    %16 = vector.broadcast %cst_10 : f32 to vector<8x128xf32>
    %17 = arith.mulf %16, %15 : vector<8x128xf32>
    %cst_11 = arith.constant 5.000000e-01 : f32
    %18 = vector.broadcast %cst_11 : f32 to vector<8x128xf32>
    %19 = arith.addf %17, %18 : vector<8x128xf32>
    %20 = vector.extract_strided_slice %8 {offsets = [0, 128], sizes = [8, 128], strides = [1, 1]} : vector<8x384xf32> to vector<8x128xf32>
    %21 = vector.extract_strided_slice %9 {offsets = [0, 128], sizes = [8, 128], strides = [1, 1]} : vector<8x256xf32> to vector<8x128xf32>
    %22 = arith.addf %20, %21 : vector<8x128xf32>
    %cst_12 = arith.constant 5.000000e-01 : f32
    %23 = vector.broadcast %cst_12 : f32 to vector<8x128xf32>
    %24 = arith.mulf %23, %22 : vector<8x128xf32>
    %25 = math.tanh %24 : vector<8x128xf32>
    %cst_13 = arith.constant 5.000000e-01 : f32
    %26 = vector.broadcast %cst_13 : f32 to vector<8x128xf32>
    %27 = arith.mulf %26, %25 : vector<8x128xf32>
    %cst_14 = arith.constant 5.000000e-01 : f32
    %28 = vector.broadcast %cst_14 : f32 to vector<8x128xf32>
    %29 = arith.addf %27, %28 : vector<8x128xf32>
    %30 = vector.extract_strided_slice %8 {offsets = [0, 256], sizes = [8, 128], strides = [1, 1]} : vector<8x384xf32> to vector<8x128xf32>
    %31 = arith.mulf %29, %5 : vector<8x128xf32>
    %cst_15 = arith.constant dense<0.000000e+00> : vector<8x128xf32>
    %32 = tpu.matmul %31, %4, %cst_15 {dimension_numbers = #tpu.dot_dimension_numbers<[1], [0], [0], [1], [0, 0, 1, 1], [], []>} : vector<8x128xf32>, vector<128x128xf32>, vector<8x128xf32> -> vector<8x128xf32>
    %33 = arith.addf %30, %32 : vector<8x128xf32>
    %34 = math.tanh %33 : vector<8x128xf32>
    %35 = arith.subf %34, %5 : vector<8x128xf32>
    %36 = arith.mulf %19, %35 : vector<8x128xf32>
    %37 = arith.addf %5, %36 : vector<8x128xf32>
    %c1_i32 = arith.constant 1 : i32
    %38 = arith.index_cast %c1_i32 : i32 to index
    %c0_16 = arith.constant 0 : index
    %c0_17 = arith.constant 0 : index
    %39 = vector.load %arg2[%38, %c0_16, %c0_17] : memref<16x8x384xf32, #tpu.memory_space<vmem>>, vector<1x8x384xf32>
    %40 = vector.shape_cast %39 : vector<1x8x384xf32> to vector<8x384xf32>
    %cst_18 = arith.constant dense<0.000000e+00> : vector<8x256xf32>
    %41 = tpu.matmul %37, %3, %cst_18 {dimension_numbers = #tpu.dot_dimension_numbers<[1], [0], [0], [1], [0, 0, 1, 1], [], []>} : vector<8x128xf32>, vector<128x256xf32>, vector<8x256xf32> -> vector<8x256xf32>
    %42 = vector.extract_strided_slice %40 {offsets = [0, 0], sizes = [8, 128], strides = [1, 1]} : vector<8x384xf32> to vector<8x128xf32>
    %43 = vector.extract_strided_slice %41 {offsets = [0, 0], sizes = [8, 128], strides = [1, 1]} : vector<8x256xf32> to vector<8x128xf32>
    %44 = arith.addf %42, %43 : vector<8x128xf32>
    %cst_19 = arith.constant 5.000000e-01 : f32
    %45 = vector.broadcast %cst_19 : f32 to vector<8x128xf32>
    %46 = arith.mulf %45, %44 : vector<8x128xf32>
    %47 = math.tanh %46 : vector<8x128xf32>
    %cst_20 = arith.constant 5.000000e-01 : f32
    %48 = vector.broadcast %cst_20 : f32 to vector<8x128xf32>
    %49 = arith.mulf %48, %47 : vector<8x128xf32>
    %cst_21 = arith.constant 5.000000e-01 : f32
    %50 = vector.broadcast %cst_21 : f32 to vector<8x128xf32>
    %51 = arith.addf %49, %50 : vector<8x128xf32>
    %52 = vector.extract_strided_slice %40 {offsets = [0, 128], sizes = [8, 128], strides = [1, 1]} : vector<8x384xf32> to vector<8x128xf32>
    %53 = vector.extract_strided_slice %41 {offsets = [0, 128], sizes = [8, 128], strides = [1, 1]} : vector<8x256xf32> to vector<8x128xf32>
    %54 = arith.addf %52, %53 : vector<8x128xf32>
    %cst_22 = arith.constant 5.000000e-01 : f32
    %55 = vector.broadcast %cst_22 : f32 to vector<8x128xf32>
    %56 = arith.mulf %55, %54 : vector<8x128xf32>
    %57 = math.tanh %56 : vector<8x128xf32>
    %cst_23 = arith.constant 5.000000e-01 : f32
    %58 = vector.broadcast %cst_23 : f32 to vector<8x128xf32>
    %59 = arith.mulf %58, %57 : vector<8x128xf32>
    %cst_24 = arith.constant 5.000000e-01 : f32
    %60 = vector.broadcast %cst_24 : f32 to vector<8x128xf32>
    %61 = arith.addf %59, %60 : vector<8x128xf32>
    %62 = vector.extract_strided_slice %40 {offsets = [0, 256], sizes = [8, 128], strides = [1, 1]} : vector<8x384xf32> to vector<8x128xf32>
    %63 = arith.mulf %61, %37 : vector<8x128xf32>
    %cst_25 = arith.constant dense<0.000000e+00> : vector<8x128xf32>
    %64 = tpu.matmul %63, %4, %cst_25 {dimension_numbers = #tpu.dot_dimension_numbers<[1], [0], [0], [1], [0, 0, 1, 1], [], []>} : vector<8x128xf32>, vector<128x128xf32>, vector<8x128xf32> -> vector<8x128xf32>
    %65 = arith.addf %62, %64 : vector<8x128xf32>
    %66 = math.tanh %65 : vector<8x128xf32>
    %67 = arith.subf %66, %37 : vector<8x128xf32>
    %68 = arith.mulf %51, %67 : vector<8x128xf32>
    %69 = arith.addf %37, %68 : vector<8x128xf32>
    %c2_i32 = arith.constant 2 : i32
    %70 = arith.index_cast %c2_i32 : i32 to index
    %c0_26 = arith.constant 0 : index
    %c0_27 = arith.constant 0 : index
    %71 = vector.load %arg2[%70, %c0_26, %c0_27] : memref<16x8x384xf32, #tpu.memory_space<vmem>>, vector<1x8x384xf32>
    %72 = vector.shape_cast %71 : vector<1x8x384xf32> to vector<8x384xf32>
    %cst_28 = arith.constant dense<0.000000e+00> : vector<8x256xf32>
    %73 = tpu.matmul %69, %3, %cst_28 {dimension_numbers = #tpu.dot_dimension_numbers<[1], [0], [0], [1], [0, 0, 1, 1], [], []>} : vector<8x128xf32>, vector<128x256xf32>, vector<8x256xf32> -> vector<8x256xf32>
    %74 = vector.extract_strided_slice %72 {offsets = [0, 0], sizes = [8, 128], strides = [1, 1]} : vector<8x384xf32> to vector<8x128xf32>
    %75 = vector.extract_strided_slice %73 {offsets = [0, 0], sizes = [8, 128], strides = [1, 1]} : vector<8x256xf32> to vector<8x128xf32>
    %76 = arith.addf %74, %75 : vector<8x128xf32>
    %cst_29 = arith.constant 5.000000e-01 : f32
    %77 = vector.broadcast %cst_29 : f32 to vector<8x128xf32>
    %78 = arith.mulf %77, %76 : vector<8x128xf32>
    %79 = math.tanh %78 : vector<8x128xf32>
    %cst_30 = arith.constant 5.000000e-01 : f32
    %80 = vector.broadcast %cst_30 : f32 to vector<8x128xf32>
    %81 = arith.mulf %80, %79 : vector<8x128xf32>
    %cst_31 = arith.constant 5.000000e-01 : f32
    %82 = vector.broadcast %cst_31 : f32 to vector<8x128xf32>
    %83 = arith.addf %81, %82 : vector<8x128xf32>
    %84 = vector.extract_strided_slice %72 {offsets = [0, 128], sizes = [8, 128], strides = [1, 1]} : vector<8x384xf32> to vector<8x128xf32>
    %85 = vector.extract_strided_slice %73 {offsets = [0, 128], sizes = [8, 128], strides = [1, 1]} : vector<8x256xf32> to vector<8x128xf32>
    %86 = arith.addf %84, %85 : vector<8x128xf32>
    %cst_32 = arith.constant 5.000000e-01 : f32
    %87 = vector.broadcast %cst_32 : f32 to vector<8x128xf32>
    %88 = arith.mulf %87, %86 : vector<8x128xf32>
    %89 = math.tanh %88 : vector<8x128xf32>
    %cst_33 = arith.constant 5.000000e-01 : f32
    %90 = vector.broadcast %cst_33 : f32 to vector<8x128xf32>
    %91 = arith.mulf %90, %89 : vector<8x128xf32>
    %cst_34 = arith.constant 5.000000e-01 : f32
    %92 = vector.broadcast %cst_34 : f32 to vector<8x128xf32>
    %93 = arith.addf %91, %92 : vector<8x128xf32>
    %94 = vector.extract_strided_slice %72 {offsets = [0, 256], sizes = [8, 128], strides = [1, 1]} : vector<8x384xf32> to vector<8x128xf32>
    %95 = arith.mulf %93, %69 : vector<8x128xf32>
    %cst_35 = arith.constant dense<0.000000e+00> : vector<8x128xf32>
    %96 = tpu.matmul %95, %4, %cst_35 {dimension_numbers = #tpu.dot_dimension_numbers<[1], [0], [0], [1], [0, 0, 1, 1], [], []>} : vector<8x128xf32>, vector<128x128xf32>, vector<8x128xf32> -> vector<8x128xf32>
    %97 = arith.addf %94, %96 : vector<8x128xf32>
    %98 = math.tanh %97 : vector<8x128xf32>
    %99 = arith.subf %98, %69 : vector<8x128xf32>
    %100 = arith.mulf %83, %99 : vector<8x128xf32>
    %101 = arith.addf %69, %100 : vector<8x128xf32>
    %c3_i32 = arith.constant 3 : i32
    %102 = arith.index_cast %c3_i32 : i32 to index
    %c0_36 = arith.constant 0 : index
    %c0_37 = arith.constant 0 : index
    %103 = vector.load %arg2[%102, %c0_36, %c0_37] : memref<16x8x384xf32, #tpu.memory_space<vmem>>, vector<1x8x384xf32>
    %104 = vector.shape_cast %103 : vector<1x8x384xf32> to vector<8x384xf32>
    %cst_38 = arith.constant dense<0.000000e+00> : vector<8x256xf32>
    %105 = tpu.matmul %101, %3, %cst_38 {dimension_numbers = #tpu.dot_dimension_numbers<[1], [0], [0], [1], [0, 0, 1, 1], [], []>} : vector<8x128xf32>, vector<128x256xf32>, vector<8x256xf32> -> vector<8x256xf32>
    %106 = vector.extract_strided_slice %104 {offsets = [0, 0], sizes = [8, 128], strides = [1, 1]} : vector<8x384xf32> to vector<8x128xf32>
    %107 = vector.extract_strided_slice %105 {offsets = [0, 0], sizes = [8, 128], strides = [1, 1]} : vector<8x256xf32> to vector<8x128xf32>
    %108 = arith.addf %106, %107 : vector<8x128xf32>
    %cst_39 = arith.constant 5.000000e-01 : f32
    %109 = vector.broadcast %cst_39 : f32 to vector<8x128xf32>
    %110 = arith.mulf %109, %108 : vector<8x128xf32>
    %111 = math.tanh %110 : vector<8x128xf32>
    %cst_40 = arith.constant 5.000000e-01 : f32
    %112 = vector.broadcast %cst_40 : f32 to vector<8x128xf32>
    %113 = arith.mulf %112, %111 : vector<8x128xf32>
    %cst_41 = arith.constant 5.000000e-01 : f32
    %114 = vector.broadcast %cst_41 : f32 to vector<8x128xf32>
    %115 = arith.addf %113, %114 : vector<8x128xf32>
    %116 = vector.extract_strided_slice %104 {offsets = [0, 128], sizes = [8, 128], strides = [1, 1]} : vector<8x384xf32> to vector<8x128xf32>
    %117 = vector.extract_strided_slice %105 {offsets = [0, 128], sizes = [8, 128], strides = [1, 1]} : vector<8x256xf32> to vector<8x128xf32>
    %118 = arith.addf %116, %117 : vector<8x128xf32>
    %cst_42 = arith.constant 5.000000e-01 : f32
    %119 = vector.broadcast %cst_42 : f32 to vector<8x128xf32>
    %120 = arith.mulf %119, %118 : vector<8x128xf32>
    %121 = math.tanh %120 : vector<8x128xf32>
    %cst_43 = arith.constant 5.000000e-01 : f32
    %122 = vector.broadcast %cst_43 : f32 to vector<8x128xf32>
    %123 = arith.mulf %122, %121 : vector<8x128xf32>
    %cst_44 = arith.constant 5.000000e-01 : f32
    %124 = vector.broadcast %cst_44 : f32 to vector<8x128xf32>
    %125 = arith.addf %123, %124 : vector<8x128xf32>
    %126 = vector.extract_strided_slice %104 {offsets = [0, 256], sizes = [8, 128], strides = [1, 1]} : vector<8x384xf32> to vector<8x128xf32>
    %127 = arith.mulf %125, %101 : vector<8x128xf32>
    %cst_45 = arith.constant dense<0.000000e+00> : vector<8x128xf32>
    %128 = tpu.matmul %127, %4, %cst_45 {dimension_numbers = #tpu.dot_dimension_numbers<[1], [0], [0], [1], [0, 0, 1, 1], [], []>} : vector<8x128xf32>, vector<128x128xf32>, vector<8x128xf32> -> vector<8x128xf32>
    %129 = arith.addf %126, %128 : vector<8x128xf32>
    %130 = math.tanh %129 : vector<8x128xf32>
    %131 = arith.subf %130, %101 : vector<8x128xf32>
    %132 = arith.mulf %115, %131 : vector<8x128xf32>
    %133 = arith.addf %101, %132 : vector<8x128xf32>
    %c4_i32 = arith.constant 4 : i32
    %134 = arith.index_cast %c4_i32 : i32 to index
    %c0_46 = arith.constant 0 : index
    %c0_47 = arith.constant 0 : index
    %135 = vector.load %arg2[%134, %c0_46, %c0_47] : memref<16x8x384xf32, #tpu.memory_space<vmem>>, vector<1x8x384xf32>
    %136 = vector.shape_cast %135 : vector<1x8x384xf32> to vector<8x384xf32>
    %cst_48 = arith.constant dense<0.000000e+00> : vector<8x256xf32>
    %137 = tpu.matmul %133, %3, %cst_48 {dimension_numbers = #tpu.dot_dimension_numbers<[1], [0], [0], [1], [0, 0, 1, 1], [], []>} : vector<8x128xf32>, vector<128x256xf32>, vector<8x256xf32> -> vector<8x256xf32>
    %138 = vector.extract_strided_slice %136 {offsets = [0, 0], sizes = [8, 128], strides = [1, 1]} : vector<8x384xf32> to vector<8x128xf32>
    %139 = vector.extract_strided_slice %137 {offsets = [0, 0], sizes = [8, 128], strides = [1, 1]} : vector<8x256xf32> to vector<8x128xf32>
    %140 = arith.addf %138, %139 : vector<8x128xf32>
    %cst_49 = arith.constant 5.000000e-01 : f32
    %141 = vector.broadcast %cst_49 : f32 to vector<8x128xf32>
    %142 = arith.mulf %141, %140 : vector<8x128xf32>
    %143 = math.tanh %142 : vector<8x128xf32>
    %cst_50 = arith.constant 5.000000e-01 : f32
    %144 = vector.broadcast %cst_50 : f32 to vector<8x128xf32>
    %145 = arith.mulf %144, %143 : vector<8x128xf32>
    %cst_51 = arith.constant 5.000000e-01 : f32
    %146 = vector.broadcast %cst_51 : f32 to vector<8x128xf32>
    %147 = arith.addf %145, %146 : vector<8x128xf32>
    %148 = vector.extract_strided_slice %136 {offsets = [0, 128], sizes = [8, 128], strides = [1, 1]} : vector<8x384xf32> to vector<8x128xf32>
    %149 = vector.extract_strided_slice %137 {offsets = [0, 128], sizes = [8, 128], strides = [1, 1]} : vector<8x256xf32> to vector<8x128xf32>
    %150 = arith.addf %148, %149 : vector<8x128xf32>
    %cst_52 = arith.constant 5.000000e-01 : f32
    %151 = vector.broadcast %cst_52 : f32 to vector<8x128xf32>
    %152 = arith.mulf %151, %150 : vector<8x128xf32>
    %153 = math.tanh %152 : vector<8x128xf32>
    %cst_53 = arith.constant 5.000000e-01 : f32
    %154 = vector.broadcast %cst_53 : f32 to vector<8x128xf32>
    %155 = arith.mulf %154, %153 : vector<8x128xf32>
    %cst_54 = arith.constant 5.000000e-01 : f32
    %156 = vector.broadcast %cst_54 : f32 to vector<8x128xf32>
    %157 = arith.addf %155, %156 : vector<8x128xf32>
    %158 = vector.extract_strided_slice %136 {offsets = [0, 256], sizes = [8, 128], strides = [1, 1]} : vector<8x384xf32> to vector<8x128xf32>
    %159 = arith.mulf %157, %133 : vector<8x128xf32>
    %cst_55 = arith.constant dense<0.000000e+00> : vector<8x128xf32>
    %160 = tpu.matmul %159, %4, %cst_55 {dimension_numbers = #tpu.dot_dimension_numbers<[1], [0], [0], [1], [0, 0, 1, 1], [], []>} : vector<8x128xf32>, vector<128x128xf32>, vector<8x128xf32> -> vector<8x128xf32>
    %161 = arith.addf %158, %160 : vector<8x128xf32>
    %162 = math.tanh %161 : vector<8x128xf32>
    %163 = arith.subf %162, %133 : vector<8x128xf32>
    %164 = arith.mulf %147, %163 : vector<8x128xf32>
    %165 = arith.addf %133, %164 : vector<8x128xf32>
    %c5_i32 = arith.constant 5 : i32
    %166 = arith.index_cast %c5_i32 : i32 to index
    %c0_56 = arith.constant 0 : index
    %c0_57 = arith.constant 0 : index
    %167 = vector.load %arg2[%166, %c0_56, %c0_57] : memref<16x8x384xf32, #tpu.memory_space<vmem>>, vector<1x8x384xf32>
    %168 = vector.shape_cast %167 : vector<1x8x384xf32> to vector<8x384xf32>
    %cst_58 = arith.constant dense<0.000000e+00> : vector<8x256xf32>
    %169 = tpu.matmul %165, %3, %cst_58 {dimension_numbers = #tpu.dot_dimension_numbers<[1], [0], [0], [1], [0, 0, 1, 1], [], []>} : vector<8x128xf32>, vector<128x256xf32>, vector<8x256xf32> -> vector<8x256xf32>
    %170 = vector.extract_strided_slice %168 {offsets = [0, 0], sizes = [8, 128], strides = [1, 1]} : vector<8x384xf32> to vector<8x128xf32>
    %171 = vector.extract_strided_slice %169 {offsets = [0, 0], sizes = [8, 128], strides = [1, 1]} : vector<8x256xf32> to vector<8x128xf32>
    %172 = arith.addf %170, %171 : vector<8x128xf32>
    %cst_59 = arith.constant 5.000000e-01 : f32
    %173 = vector.broadcast %cst_59 : f32 to vector<8x128xf32>
    %174 = arith.mulf %173, %172 : vector<8x128xf32>
    %175 = math.tanh %174 : vector<8x128xf32>
    %cst_60 = arith.constant 5.000000e-01 : f32
    %176 = vector.broadcast %cst_60 : f32 to vector<8x128xf32>
    %177 = arith.mulf %176, %175 : vector<8x128xf32>
    %cst_61 = arith.constant 5.000000e-01 : f32
    %178 = vector.broadcast %cst_61 : f32 to vector<8x128xf32>
    %179 = arith.addf %177, %178 : vector<8x128xf32>
    %180 = vector.extract_strided_slice %168 {offsets = [0, 128], sizes = [8, 128], strides = [1, 1]} : vector<8x384xf32> to vector<8x128xf32>
    %181 = vector.extract_strided_slice %169 {offsets = [0, 128], sizes = [8, 128], strides = [1, 1]} : vector<8x256xf32> to vector<8x128xf32>
    %182 = arith.addf %180, %181 : vector<8x128xf32>
    %cst_62 = arith.constant 5.000000e-01 : f32
    %183 = vector.broadcast %cst_62 : f32 to vector<8x128xf32>
    %184 = arith.mulf %183, %182 : vector<8x128xf32>
    %185 = math.tanh %184 : vector<8x128xf32>
    %cst_63 = arith.constant 5.000000e-01 : f32
    %186 = vector.broadcast %cst_63 : f32 to vector<8x128xf32>
    %187 = arith.mulf %186, %185 : vector<8x128xf32>
    %cst_64 = arith.constant 5.000000e-01 : f32
    %188 = vector.broadcast %cst_64 : f32 to vector<8x128xf32>
    %189 = arith.addf %187, %188 : vector<8x128xf32>
    %190 = vector.extract_strided_slice %168 {offsets = [0, 256], sizes = [8, 128], strides = [1, 1]} : vector<8x384xf32> to vector<8x128xf32>
    %191 = arith.mulf %189, %165 : vector<8x128xf32>
    %cst_65 = arith.constant dense<0.000000e+00> : vector<8x128xf32>
    %192 = tpu.matmul %191, %4, %cst_65 {dimension_numbers = #tpu.dot_dimension_numbers<[1], [0], [0], [1], [0, 0, 1, 1], [], []>} : vector<8x128xf32>, vector<128x128xf32>, vector<8x128xf32> -> vector<8x128xf32>
    %193 = arith.addf %190, %192 : vector<8x128xf32>
    %194 = math.tanh %193 : vector<8x128xf32>
    %195 = arith.subf %194, %165 : vector<8x128xf32>
    %196 = arith.mulf %179, %195 : vector<8x128xf32>
    %197 = arith.addf %165, %196 : vector<8x128xf32>
    %c6_i32 = arith.constant 6 : i32
    %198 = arith.index_cast %c6_i32 : i32 to index
    %c0_66 = arith.constant 0 : index
    %c0_67 = arith.constant 0 : index
    %199 = vector.load %arg2[%198, %c0_66, %c0_67] : memref<16x8x384xf32, #tpu.memory_space<vmem>>, vector<1x8x384xf32>
    %200 = vector.shape_cast %199 : vector<1x8x384xf32> to vector<8x384xf32>
    %cst_68 = arith.constant dense<0.000000e+00> : vector<8x256xf32>
    %201 = tpu.matmul %197, %3, %cst_68 {dimension_numbers = #tpu.dot_dimension_numbers<[1], [0], [0], [1], [0, 0, 1, 1], [], []>} : vector<8x128xf32>, vector<128x256xf32>, vector<8x256xf32> -> vector<8x256xf32>
    %202 = vector.extract_strided_slice %200 {offsets = [0, 0], sizes = [8, 128], strides = [1, 1]} : vector<8x384xf32> to vector<8x128xf32>
    %203 = vector.extract_strided_slice %201 {offsets = [0, 0], sizes = [8, 128], strides = [1, 1]} : vector<8x256xf32> to vector<8x128xf32>
    %204 = arith.addf %202, %203 : vector<8x128xf32>
    %cst_69 = arith.constant 5.000000e-01 : f32
    %205 = vector.broadcast %cst_69 : f32 to vector<8x128xf32>
    %206 = arith.mulf %205, %204 : vector<8x128xf32>
    %207 = math.tanh %206 : vector<8x128xf32>
    %cst_70 = arith.constant 5.000000e-01 : f32
    %208 = vector.broadcast %cst_70 : f32 to vector<8x128xf32>
    %209 = arith.mulf %208, %207 : vector<8x128xf32>
    %cst_71 = arith.constant 5.000000e-01 : f32
    %210 = vector.broadcast %cst_71 : f32 to vector<8x128xf32>
    %211 = arith.addf %209, %210 : vector<8x128xf32>
    %212 = vector.extract_strided_slice %200 {offsets = [0, 128], sizes = [8, 128], strides = [1, 1]} : vector<8x384xf32> to vector<8x128xf32>
    %213 = vector.extract_strided_slice %201 {offsets = [0, 128], sizes = [8, 128], strides = [1, 1]} : vector<8x256xf32> to vector<8x128xf32>
    %214 = arith.addf %212, %213 : vector<8x128xf32>
    %cst_72 = arith.constant 5.000000e-01 : f32
    %215 = vector.broadcast %cst_72 : f32 to vector<8x128xf32>
    %216 = arith.mulf %215, %214 : vector<8x128xf32>
    %217 = math.tanh %216 : vector<8x128xf32>
    %cst_73 = arith.constant 5.000000e-01 : f32
    %218 = vector.broadcast %cst_73 : f32 to vector<8x128xf32>
    %219 = arith.mulf %218, %217 : vector<8x128xf32>
    %cst_74 = arith.constant 5.000000e-01 : f32
    %220 = vector.broadcast %cst_74 : f32 to vector<8x128xf32>
    %221 = arith.addf %219, %220 : vector<8x128xf32>
    %222 = vector.extract_strided_slice %200 {offsets = [0, 256], sizes = [8, 128], strides = [1, 1]} : vector<8x384xf32> to vector<8x128xf32>
    %223 = arith.mulf %221, %197 : vector<8x128xf32>
    %cst_75 = arith.constant dense<0.000000e+00> : vector<8x128xf32>
    %224 = tpu.matmul %223, %4, %cst_75 {dimension_numbers = #tpu.dot_dimension_numbers<[1], [0], [0], [1], [0, 0, 1, 1], [], []>} : vector<8x128xf32>, vector<128x128xf32>, vector<8x128xf32> -> vector<8x128xf32>
    %225 = arith.addf %222, %224 : vector<8x128xf32>
    %226 = math.tanh %225 : vector<8x128xf32>
    %227 = arith.subf %226, %197 : vector<8x128xf32>
    %228 = arith.mulf %211, %227 : vector<8x128xf32>
    %229 = arith.addf %197, %228 : vector<8x128xf32>
    %c7_i32 = arith.constant 7 : i32
    %230 = arith.index_cast %c7_i32 : i32 to index
    %c0_76 = arith.constant 0 : index
    %c0_77 = arith.constant 0 : index
    %231 = vector.load %arg2[%230, %c0_76, %c0_77] : memref<16x8x384xf32, #tpu.memory_space<vmem>>, vector<1x8x384xf32>
    %232 = vector.shape_cast %231 : vector<1x8x384xf32> to vector<8x384xf32>
    %cst_78 = arith.constant dense<0.000000e+00> : vector<8x256xf32>
    %233 = tpu.matmul %229, %3, %cst_78 {dimension_numbers = #tpu.dot_dimension_numbers<[1], [0], [0], [1], [0, 0, 1, 1], [], []>} : vector<8x128xf32>, vector<128x256xf32>, vector<8x256xf32> -> vector<8x256xf32>
    %234 = vector.extract_strided_slice %232 {offsets = [0, 0], sizes = [8, 128], strides = [1, 1]} : vector<8x384xf32> to vector<8x128xf32>
    %235 = vector.extract_strided_slice %233 {offsets = [0, 0], sizes = [8, 128], strides = [1, 1]} : vector<8x256xf32> to vector<8x128xf32>
    %236 = arith.addf %234, %235 : vector<8x128xf32>
    %cst_79 = arith.constant 5.000000e-01 : f32
    %237 = vector.broadcast %cst_79 : f32 to vector<8x128xf32>
    %238 = arith.mulf %237, %236 : vector<8x128xf32>
    %239 = math.tanh %238 : vector<8x128xf32>
    %cst_80 = arith.constant 5.000000e-01 : f32
    %240 = vector.broadcast %cst_80 : f32 to vector<8x128xf32>
    %241 = arith.mulf %240, %239 : vector<8x128xf32>
    %cst_81 = arith.constant 5.000000e-01 : f32
    %242 = vector.broadcast %cst_81 : f32 to vector<8x128xf32>
    %243 = arith.addf %241, %242 : vector<8x128xf32>
    %244 = vector.extract_strided_slice %232 {offsets = [0, 128], sizes = [8, 128], strides = [1, 1]} : vector<8x384xf32> to vector<8x128xf32>
    %245 = vector.extract_strided_slice %233 {offsets = [0, 128], sizes = [8, 128], strides = [1, 1]} : vector<8x256xf32> to vector<8x128xf32>
    %246 = arith.addf %244, %245 : vector<8x128xf32>
    %cst_82 = arith.constant 5.000000e-01 : f32
    %247 = vector.broadcast %cst_82 : f32 to vector<8x128xf32>
    %248 = arith.mulf %247, %246 : vector<8x128xf32>
    %249 = math.tanh %248 : vector<8x128xf32>
    %cst_83 = arith.constant 5.000000e-01 : f32
    %250 = vector.broadcast %cst_83 : f32 to vector<8x128xf32>
    %251 = arith.mulf %250, %249 : vector<8x128xf32>
    %cst_84 = arith.constant 5.000000e-01 : f32
    %252 = vector.broadcast %cst_84 : f32 to vector<8x128xf32>
    %253 = arith.addf %251, %252 : vector<8x128xf32>
    %254 = vector.extract_strided_slice %232 {offsets = [0, 256], sizes = [8, 128], strides = [1, 1]} : vector<8x384xf32> to vector<8x128xf32>
    %255 = arith.mulf %253, %229 : vector<8x128xf32>
    %cst_85 = arith.constant dense<0.000000e+00> : vector<8x128xf32>
    %256 = tpu.matmul %255, %4, %cst_85 {dimension_numbers = #tpu.dot_dimension_numbers<[1], [0], [0], [1], [0, 0, 1, 1], [], []>} : vector<8x128xf32>, vector<128x128xf32>, vector<8x128xf32> -> vector<8x128xf32>
    %257 = arith.addf %254, %256 : vector<8x128xf32>
    %258 = math.tanh %257 : vector<8x128xf32>
    %259 = arith.subf %258, %229 : vector<8x128xf32>
    %260 = arith.mulf %243, %259 : vector<8x128xf32>
    %261 = arith.addf %229, %260 : vector<8x128xf32>
    %c8_i32 = arith.constant 8 : i32
    %262 = arith.index_cast %c8_i32 : i32 to index
    %c0_86 = arith.constant 0 : index
    %c0_87 = arith.constant 0 : index
    %263 = vector.load %arg2[%262, %c0_86, %c0_87] : memref<16x8x384xf32, #tpu.memory_space<vmem>>, vector<1x8x384xf32>
    %264 = vector.shape_cast %263 : vector<1x8x384xf32> to vector<8x384xf32>
    %cst_88 = arith.constant dense<0.000000e+00> : vector<8x256xf32>
    %265 = tpu.matmul %261, %3, %cst_88 {dimension_numbers = #tpu.dot_dimension_numbers<[1], [0], [0], [1], [0, 0, 1, 1], [], []>} : vector<8x128xf32>, vector<128x256xf32>, vector<8x256xf32> -> vector<8x256xf32>
    %266 = vector.extract_strided_slice %264 {offsets = [0, 0], sizes = [8, 128], strides = [1, 1]} : vector<8x384xf32> to vector<8x128xf32>
    %267 = vector.extract_strided_slice %265 {offsets = [0, 0], sizes = [8, 128], strides = [1, 1]} : vector<8x256xf32> to vector<8x128xf32>
    %268 = arith.addf %266, %267 : vector<8x128xf32>
    %cst_89 = arith.constant 5.000000e-01 : f32
    %269 = vector.broadcast %cst_89 : f32 to vector<8x128xf32>
    %270 = arith.mulf %269, %268 : vector<8x128xf32>
    %271 = math.tanh %270 : vector<8x128xf32>
    %cst_90 = arith.constant 5.000000e-01 : f32
    %272 = vector.broadcast %cst_90 : f32 to vector<8x128xf32>
    %273 = arith.mulf %272, %271 : vector<8x128xf32>
    %cst_91 = arith.constant 5.000000e-01 : f32
    %274 = vector.broadcast %cst_91 : f32 to vector<8x128xf32>
    %275 = arith.addf %273, %274 : vector<8x128xf32>
    %276 = vector.extract_strided_slice %264 {offsets = [0, 128], sizes = [8, 128], strides = [1, 1]} : vector<8x384xf32> to vector<8x128xf32>
    %277 = vector.extract_strided_slice %265 {offsets = [0, 128], sizes = [8, 128], strides = [1, 1]} : vector<8x256xf32> to vector<8x128xf32>
    %278 = arith.addf %276, %277 : vector<8x128xf32>
    %cst_92 = arith.constant 5.000000e-01 : f32
    %279 = vector.broadcast %cst_92 : f32 to vector<8x128xf32>
    %280 = arith.mulf %279, %278 : vector<8x128xf32>
    %281 = math.tanh %280 : vector<8x128xf32>
    %cst_93 = arith.constant 5.000000e-01 : f32
    %282 = vector.broadcast %cst_93 : f32 to vector<8x128xf32>
    %283 = arith.mulf %282, %281 : vector<8x128xf32>
    %cst_94 = arith.constant 5.000000e-01 : f32
    %284 = vector.broadcast %cst_94 : f32 to vector<8x128xf32>
    %285 = arith.addf %283, %284 : vector<8x128xf32>
    %286 = vector.extract_strided_slice %264 {offsets = [0, 256], sizes = [8, 128], strides = [1, 1]} : vector<8x384xf32> to vector<8x128xf32>
    %287 = arith.mulf %285, %261 : vector<8x128xf32>
    %cst_95 = arith.constant dense<0.000000e+00> : vector<8x128xf32>
    %288 = tpu.matmul %287, %4, %cst_95 {dimension_numbers = #tpu.dot_dimension_numbers<[1], [0], [0], [1], [0, 0, 1, 1], [], []>} : vector<8x128xf32>, vector<128x128xf32>, vector<8x128xf32> -> vector<8x128xf32>
    %289 = arith.addf %286, %288 : vector<8x128xf32>
    %290 = math.tanh %289 : vector<8x128xf32>
    %291 = arith.subf %290, %261 : vector<8x128xf32>
    %292 = arith.mulf %275, %291 : vector<8x128xf32>
    %293 = arith.addf %261, %292 : vector<8x128xf32>
    %c9_i32 = arith.constant 9 : i32
    %294 = arith.index_cast %c9_i32 : i32 to index
    %c0_96 = arith.constant 0 : index
    %c0_97 = arith.constant 0 : index
    %295 = vector.load %arg2[%294, %c0_96, %c0_97] : memref<16x8x384xf32, #tpu.memory_space<vmem>>, vector<1x8x384xf32>
    %296 = vector.shape_cast %295 : vector<1x8x384xf32> to vector<8x384xf32>
    %cst_98 = arith.constant dense<0.000000e+00> : vector<8x256xf32>
    %297 = tpu.matmul %293, %3, %cst_98 {dimension_numbers = #tpu.dot_dimension_numbers<[1], [0], [0], [1], [0, 0, 1, 1], [], []>} : vector<8x128xf32>, vector<128x256xf32>, vector<8x256xf32> -> vector<8x256xf32>
    %298 = vector.extract_strided_slice %296 {offsets = [0, 0], sizes = [8, 128], strides = [1, 1]} : vector<8x384xf32> to vector<8x128xf32>
    %299 = vector.extract_strided_slice %297 {offsets = [0, 0], sizes = [8, 128], strides = [1, 1]} : vector<8x256xf32> to vector<8x128xf32>
    %300 = arith.addf %298, %299 : vector<8x128xf32>
    %cst_99 = arith.constant 5.000000e-01 : f32
    %301 = vector.broadcast %cst_99 : f32 to vector<8x128xf32>
    %302 = arith.mulf %301, %300 : vector<8x128xf32>
    %303 = math.tanh %302 : vector<8x128xf32>
    %cst_100 = arith.constant 5.000000e-01 : f32
    %304 = vector.broadcast %cst_100 : f32 to vector<8x128xf32>
    %305 = arith.mulf %304, %303 : vector<8x128xf32>
    %cst_101 = arith.constant 5.000000e-01 : f32
    %306 = vector.broadcast %cst_101 : f32 to vector<8x128xf32>
    %307 = arith.addf %305, %306 : vector<8x128xf32>
    %308 = vector.extract_strided_slice %296 {offsets = [0, 128], sizes = [8, 128], strides = [1, 1]} : vector<8x384xf32> to vector<8x128xf32>
    %309 = vector.extract_strided_slice %297 {offsets = [0, 128], sizes = [8, 128], strides = [1, 1]} : vector<8x256xf32> to vector<8x128xf32>
    %310 = arith.addf %308, %309 : vector<8x128xf32>
    %cst_102 = arith.constant 5.000000e-01 : f32
    %311 = vector.broadcast %cst_102 : f32 to vector<8x128xf32>
    %312 = arith.mulf %311, %310 : vector<8x128xf32>
    %313 = math.tanh %312 : vector<8x128xf32>
    %cst_103 = arith.constant 5.000000e-01 : f32
    %314 = vector.broadcast %cst_103 : f32 to vector<8x128xf32>
    %315 = arith.mulf %314, %313 : vector<8x128xf32>
    %cst_104 = arith.constant 5.000000e-01 : f32
    %316 = vector.broadcast %cst_104 : f32 to vector<8x128xf32>
    %317 = arith.addf %315, %316 : vector<8x128xf32>
    %318 = vector.extract_strided_slice %296 {offsets = [0, 256], sizes = [8, 128], strides = [1, 1]} : vector<8x384xf32> to vector<8x128xf32>
    %319 = arith.mulf %317, %293 : vector<8x128xf32>
    %cst_105 = arith.constant dense<0.000000e+00> : vector<8x128xf32>
    %320 = tpu.matmul %319, %4, %cst_105 {dimension_numbers = #tpu.dot_dimension_numbers<[1], [0], [0], [1], [0, 0, 1, 1], [], []>} : vector<8x128xf32>, vector<128x128xf32>, vector<8x128xf32> -> vector<8x128xf32>
    %321 = arith.addf %318, %320 : vector<8x128xf32>
    %322 = math.tanh %321 : vector<8x128xf32>
    %323 = arith.subf %322, %293 : vector<8x128xf32>
    %324 = arith.mulf %307, %323 : vector<8x128xf32>
    %325 = arith.addf %293, %324 : vector<8x128xf32>
    %c10_i32 = arith.constant 10 : i32
    %326 = arith.index_cast %c10_i32 : i32 to index
    %c0_106 = arith.constant 0 : index
    %c0_107 = arith.constant 0 : index
    %327 = vector.load %arg2[%326, %c0_106, %c0_107] : memref<16x8x384xf32, #tpu.memory_space<vmem>>, vector<1x8x384xf32>
    %328 = vector.shape_cast %327 : vector<1x8x384xf32> to vector<8x384xf32>
    %cst_108 = arith.constant dense<0.000000e+00> : vector<8x256xf32>
    %329 = tpu.matmul %325, %3, %cst_108 {dimension_numbers = #tpu.dot_dimension_numbers<[1], [0], [0], [1], [0, 0, 1, 1], [], []>} : vector<8x128xf32>, vector<128x256xf32>, vector<8x256xf32> -> vector<8x256xf32>
    %330 = vector.extract_strided_slice %328 {offsets = [0, 0], sizes = [8, 128], strides = [1, 1]} : vector<8x384xf32> to vector<8x128xf32>
    %331 = vector.extract_strided_slice %329 {offsets = [0, 0], sizes = [8, 128], strides = [1, 1]} : vector<8x256xf32> to vector<8x128xf32>
    %332 = arith.addf %330, %331 : vector<8x128xf32>
    %cst_109 = arith.constant 5.000000e-01 : f32
    %333 = vector.broadcast %cst_109 : f32 to vector<8x128xf32>
    %334 = arith.mulf %333, %332 : vector<8x128xf32>
    %335 = math.tanh %334 : vector<8x128xf32>
    %cst_110 = arith.constant 5.000000e-01 : f32
    %336 = vector.broadcast %cst_110 : f32 to vector<8x128xf32>
    %337 = arith.mulf %336, %335 : vector<8x128xf32>
    %cst_111 = arith.constant 5.000000e-01 : f32
    %338 = vector.broadcast %cst_111 : f32 to vector<8x128xf32>
    %339 = arith.addf %337, %338 : vector<8x128xf32>
    %340 = vector.extract_strided_slice %328 {offsets = [0, 128], sizes = [8, 128], strides = [1, 1]} : vector<8x384xf32> to vector<8x128xf32>
    %341 = vector.extract_strided_slice %329 {offsets = [0, 128], sizes = [8, 128], strides = [1, 1]} : vector<8x256xf32> to vector<8x128xf32>
    %342 = arith.addf %340, %341 : vector<8x128xf32>
    %cst_112 = arith.constant 5.000000e-01 : f32
    %343 = vector.broadcast %cst_112 : f32 to vector<8x128xf32>
    %344 = arith.mulf %343, %342 : vector<8x128xf32>
    %345 = math.tanh %344 : vector<8x128xf32>
    %cst_113 = arith.constant 5.000000e-01 : f32
    %346 = vector.broadcast %cst_113 : f32 to vector<8x128xf32>
    %347 = arith.mulf %346, %345 : vector<8x128xf32>
    %cst_114 = arith.constant 5.000000e-01 : f32
    %348 = vector.broadcast %cst_114 : f32 to vector<8x128xf32>
    %349 = arith.addf %347, %348 : vector<8x128xf32>
    %350 = vector.extract_strided_slice %328 {offsets = [0, 256], sizes = [8, 128], strides = [1, 1]} : vector<8x384xf32> to vector<8x128xf32>
    %351 = arith.mulf %349, %325 : vector<8x128xf32>
    %cst_115 = arith.constant dense<0.000000e+00> : vector<8x128xf32>
    %352 = tpu.matmul %351, %4, %cst_115 {dimension_numbers = #tpu.dot_dimension_numbers<[1], [0], [0], [1], [0, 0, 1, 1], [], []>} : vector<8x128xf32>, vector<128x128xf32>, vector<8x128xf32> -> vector<8x128xf32>
    %353 = arith.addf %350, %352 : vector<8x128xf32>
    %354 = math.tanh %353 : vector<8x128xf32>
    %355 = arith.subf %354, %325 : vector<8x128xf32>
    %356 = arith.mulf %339, %355 : vector<8x128xf32>
    %357 = arith.addf %325, %356 : vector<8x128xf32>
    %c11_i32 = arith.constant 11 : i32
    %358 = arith.index_cast %c11_i32 : i32 to index
    %c0_116 = arith.constant 0 : index
    %c0_117 = arith.constant 0 : index
    %359 = vector.load %arg2[%358, %c0_116, %c0_117] : memref<16x8x384xf32, #tpu.memory_space<vmem>>, vector<1x8x384xf32>
    %360 = vector.shape_cast %359 : vector<1x8x384xf32> to vector<8x384xf32>
    %cst_118 = arith.constant dense<0.000000e+00> : vector<8x256xf32>
    %361 = tpu.matmul %357, %3, %cst_118 {dimension_numbers = #tpu.dot_dimension_numbers<[1], [0], [0], [1], [0, 0, 1, 1], [], []>} : vector<8x128xf32>, vector<128x256xf32>, vector<8x256xf32> -> vector<8x256xf32>
    %362 = vector.extract_strided_slice %360 {offsets = [0, 0], sizes = [8, 128], strides = [1, 1]} : vector<8x384xf32> to vector<8x128xf32>
    %363 = vector.extract_strided_slice %361 {offsets = [0, 0], sizes = [8, 128], strides = [1, 1]} : vector<8x256xf32> to vector<8x128xf32>
    %364 = arith.addf %362, %363 : vector<8x128xf32>
    %cst_119 = arith.constant 5.000000e-01 : f32
    %365 = vector.broadcast %cst_119 : f32 to vector<8x128xf32>
    %366 = arith.mulf %365, %364 : vector<8x128xf32>
    %367 = math.tanh %366 : vector<8x128xf32>
    %cst_120 = arith.constant 5.000000e-01 : f32
    %368 = vector.broadcast %cst_120 : f32 to vector<8x128xf32>
    %369 = arith.mulf %368, %367 : vector<8x128xf32>
    %cst_121 = arith.constant 5.000000e-01 : f32
    %370 = vector.broadcast %cst_121 : f32 to vector<8x128xf32>
    %371 = arith.addf %369, %370 : vector<8x128xf32>
    %372 = vector.extract_strided_slice %360 {offsets = [0, 128], sizes = [8, 128], strides = [1, 1]} : vector<8x384xf32> to vector<8x128xf32>
    %373 = vector.extract_strided_slice %361 {offsets = [0, 128], sizes = [8, 128], strides = [1, 1]} : vector<8x256xf32> to vector<8x128xf32>
    %374 = arith.addf %372, %373 : vector<8x128xf32>
    %cst_122 = arith.constant 5.000000e-01 : f32
    %375 = vector.broadcast %cst_122 : f32 to vector<8x128xf32>
    %376 = arith.mulf %375, %374 : vector<8x128xf32>
    %377 = math.tanh %376 : vector<8x128xf32>
    %cst_123 = arith.constant 5.000000e-01 : f32
    %378 = vector.broadcast %cst_123 : f32 to vector<8x128xf32>
    %379 = arith.mulf %378, %377 : vector<8x128xf32>
    %cst_124 = arith.constant 5.000000e-01 : f32
    %380 = vector.broadcast %cst_124 : f32 to vector<8x128xf32>
    %381 = arith.addf %379, %380 : vector<8x128xf32>
    %382 = vector.extract_strided_slice %360 {offsets = [0, 256], sizes = [8, 128], strides = [1, 1]} : vector<8x384xf32> to vector<8x128xf32>
    %383 = arith.mulf %381, %357 : vector<8x128xf32>
    %cst_125 = arith.constant dense<0.000000e+00> : vector<8x128xf32>
    %384 = tpu.matmul %383, %4, %cst_125 {dimension_numbers = #tpu.dot_dimension_numbers<[1], [0], [0], [1], [0, 0, 1, 1], [], []>} : vector<8x128xf32>, vector<128x128xf32>, vector<8x128xf32> -> vector<8x128xf32>
    %385 = arith.addf %382, %384 : vector<8x128xf32>
    %386 = math.tanh %385 : vector<8x128xf32>
    %387 = arith.subf %386, %357 : vector<8x128xf32>
    %388 = arith.mulf %371, %387 : vector<8x128xf32>
    %389 = arith.addf %357, %388 : vector<8x128xf32>
    %c12_i32 = arith.constant 12 : i32
    %390 = arith.index_cast %c12_i32 : i32 to index
    %c0_126 = arith.constant 0 : index
    %c0_127 = arith.constant 0 : index
    %391 = vector.load %arg2[%390, %c0_126, %c0_127] : memref<16x8x384xf32, #tpu.memory_space<vmem>>, vector<1x8x384xf32>
    %392 = vector.shape_cast %391 : vector<1x8x384xf32> to vector<8x384xf32>
    %cst_128 = arith.constant dense<0.000000e+00> : vector<8x256xf32>
    %393 = tpu.matmul %389, %3, %cst_128 {dimension_numbers = #tpu.dot_dimension_numbers<[1], [0], [0], [1], [0, 0, 1, 1], [], []>} : vector<8x128xf32>, vector<128x256xf32>, vector<8x256xf32> -> vector<8x256xf32>
    %394 = vector.extract_strided_slice %392 {offsets = [0, 0], sizes = [8, 128], strides = [1, 1]} : vector<8x384xf32> to vector<8x128xf32>
    %395 = vector.extract_strided_slice %393 {offsets = [0, 0], sizes = [8, 128], strides = [1, 1]} : vector<8x256xf32> to vector<8x128xf32>
    %396 = arith.addf %394, %395 : vector<8x128xf32>
    %cst_129 = arith.constant 5.000000e-01 : f32
    %397 = vector.broadcast %cst_129 : f32 to vector<8x128xf32>
    %398 = arith.mulf %397, %396 : vector<8x128xf32>
    %399 = math.tanh %398 : vector<8x128xf32>
    %cst_130 = arith.constant 5.000000e-01 : f32
    %400 = vector.broadcast %cst_130 : f32 to vector<8x128xf32>
    %401 = arith.mulf %400, %399 : vector<8x128xf32>
    %cst_131 = arith.constant 5.000000e-01 : f32
    %402 = vector.broadcast %cst_131 : f32 to vector<8x128xf32>
    %403 = arith.addf %401, %402 : vector<8x128xf32>
    %404 = vector.extract_strided_slice %392 {offsets = [0, 128], sizes = [8, 128], strides = [1, 1]} : vector<8x384xf32> to vector<8x128xf32>
    %405 = vector.extract_strided_slice %393 {offsets = [0, 128], sizes = [8, 128], strides = [1, 1]} : vector<8x256xf32> to vector<8x128xf32>
    %406 = arith.addf %404, %405 : vector<8x128xf32>
    %cst_132 = arith.constant 5.000000e-01 : f32
    %407 = vector.broadcast %cst_132 : f32 to vector<8x128xf32>
    %408 = arith.mulf %407, %406 : vector<8x128xf32>
    %409 = math.tanh %408 : vector<8x128xf32>
    %cst_133 = arith.constant 5.000000e-01 : f32
    %410 = vector.broadcast %cst_133 : f32 to vector<8x128xf32>
    %411 = arith.mulf %410, %409 : vector<8x128xf32>
    %cst_134 = arith.constant 5.000000e-01 : f32
    %412 = vector.broadcast %cst_134 : f32 to vector<8x128xf32>
    %413 = arith.addf %411, %412 : vector<8x128xf32>
    %414 = vector.extract_strided_slice %392 {offsets = [0, 256], sizes = [8, 128], strides = [1, 1]} : vector<8x384xf32> to vector<8x128xf32>
    %415 = arith.mulf %413, %389 : vector<8x128xf32>
    %cst_135 = arith.constant dense<0.000000e+00> : vector<8x128xf32>
    %416 = tpu.matmul %415, %4, %cst_135 {dimension_numbers = #tpu.dot_dimension_numbers<[1], [0], [0], [1], [0, 0, 1, 1], [], []>} : vector<8x128xf32>, vector<128x128xf32>, vector<8x128xf32> -> vector<8x128xf32>
    %417 = arith.addf %414, %416 : vector<8x128xf32>
    %418 = math.tanh %417 : vector<8x128xf32>
    %419 = arith.subf %418, %389 : vector<8x128xf32>
    %420 = arith.mulf %403, %419 : vector<8x128xf32>
    %421 = arith.addf %389, %420 : vector<8x128xf32>
    %c13_i32 = arith.constant 13 : i32
    %422 = arith.index_cast %c13_i32 : i32 to index
    %c0_136 = arith.constant 0 : index
    %c0_137 = arith.constant 0 : index
    %423 = vector.load %arg2[%422, %c0_136, %c0_137] : memref<16x8x384xf32, #tpu.memory_space<vmem>>, vector<1x8x384xf32>
    %424 = vector.shape_cast %423 : vector<1x8x384xf32> to vector<8x384xf32>
    %cst_138 = arith.constant dense<0.000000e+00> : vector<8x256xf32>
    %425 = tpu.matmul %421, %3, %cst_138 {dimension_numbers = #tpu.dot_dimension_numbers<[1], [0], [0], [1], [0, 0, 1, 1], [], []>} : vector<8x128xf32>, vector<128x256xf32>, vector<8x256xf32> -> vector<8x256xf32>
    %426 = vector.extract_strided_slice %424 {offsets = [0, 0], sizes = [8, 128], strides = [1, 1]} : vector<8x384xf32> to vector<8x128xf32>
    %427 = vector.extract_strided_slice %425 {offsets = [0, 0], sizes = [8, 128], strides = [1, 1]} : vector<8x256xf32> to vector<8x128xf32>
    %428 = arith.addf %426, %427 : vector<8x128xf32>
    %cst_139 = arith.constant 5.000000e-01 : f32
    %429 = vector.broadcast %cst_139 : f32 to vector<8x128xf32>
    %430 = arith.mulf %429, %428 : vector<8x128xf32>
    %431 = math.tanh %430 : vector<8x128xf32>
    %cst_140 = arith.constant 5.000000e-01 : f32
    %432 = vector.broadcast %cst_140 : f32 to vector<8x128xf32>
    %433 = arith.mulf %432, %431 : vector<8x128xf32>
    %cst_141 = arith.constant 5.000000e-01 : f32
    %434 = vector.broadcast %cst_141 : f32 to vector<8x128xf32>
    %435 = arith.addf %433, %434 : vector<8x128xf32>
    %436 = vector.extract_strided_slice %424 {offsets = [0, 128], sizes = [8, 128], strides = [1, 1]} : vector<8x384xf32> to vector<8x128xf32>
    %437 = vector.extract_strided_slice %425 {offsets = [0, 128], sizes = [8, 128], strides = [1, 1]} : vector<8x256xf32> to vector<8x128xf32>
    %438 = arith.addf %436, %437 : vector<8x128xf32>
    %cst_142 = arith.constant 5.000000e-01 : f32
    %439 = vector.broadcast %cst_142 : f32 to vector<8x128xf32>
    %440 = arith.mulf %439, %438 : vector<8x128xf32>
    %441 = math.tanh %440 : vector<8x128xf32>
    %cst_143 = arith.constant 5.000000e-01 : f32
    %442 = vector.broadcast %cst_143 : f32 to vector<8x128xf32>
    %443 = arith.mulf %442, %441 : vector<8x128xf32>
    %cst_144 = arith.constant 5.000000e-01 : f32
    %444 = vector.broadcast %cst_144 : f32 to vector<8x128xf32>
    %445 = arith.addf %443, %444 : vector<8x128xf32>
    %446 = vector.extract_strided_slice %424 {offsets = [0, 256], sizes = [8, 128], strides = [1, 1]} : vector<8x384xf32> to vector<8x128xf32>
    %447 = arith.mulf %445, %421 : vector<8x128xf32>
    %cst_145 = arith.constant dense<0.000000e+00> : vector<8x128xf32>
    %448 = tpu.matmul %447, %4, %cst_145 {dimension_numbers = #tpu.dot_dimension_numbers<[1], [0], [0], [1], [0, 0, 1, 1], [], []>} : vector<8x128xf32>, vector<128x128xf32>, vector<8x128xf32> -> vector<8x128xf32>
    %449 = arith.addf %446, %448 : vector<8x128xf32>
    %450 = math.tanh %449 : vector<8x128xf32>
    %451 = arith.subf %450, %421 : vector<8x128xf32>
    %452 = arith.mulf %435, %451 : vector<8x128xf32>
    %453 = arith.addf %421, %452 : vector<8x128xf32>
    %c14_i32 = arith.constant 14 : i32
    %454 = arith.index_cast %c14_i32 : i32 to index
    %c0_146 = arith.constant 0 : index
    %c0_147 = arith.constant 0 : index
    %455 = vector.load %arg2[%454, %c0_146, %c0_147] : memref<16x8x384xf32, #tpu.memory_space<vmem>>, vector<1x8x384xf32>
    %456 = vector.shape_cast %455 : vector<1x8x384xf32> to vector<8x384xf32>
    %cst_148 = arith.constant dense<0.000000e+00> : vector<8x256xf32>
    %457 = tpu.matmul %453, %3, %cst_148 {dimension_numbers = #tpu.dot_dimension_numbers<[1], [0], [0], [1], [0, 0, 1, 1], [], []>} : vector<8x128xf32>, vector<128x256xf32>, vector<8x256xf32> -> vector<8x256xf32>
    %458 = vector.extract_strided_slice %456 {offsets = [0, 0], sizes = [8, 128], strides = [1, 1]} : vector<8x384xf32> to vector<8x128xf32>
    %459 = vector.extract_strided_slice %457 {offsets = [0, 0], sizes = [8, 128], strides = [1, 1]} : vector<8x256xf32> to vector<8x128xf32>
    %460 = arith.addf %458, %459 : vector<8x128xf32>
    %cst_149 = arith.constant 5.000000e-01 : f32
    %461 = vector.broadcast %cst_149 : f32 to vector<8x128xf32>
    %462 = arith.mulf %461, %460 : vector<8x128xf32>
    %463 = math.tanh %462 : vector<8x128xf32>
    %cst_150 = arith.constant 5.000000e-01 : f32
    %464 = vector.broadcast %cst_150 : f32 to vector<8x128xf32>
    %465 = arith.mulf %464, %463 : vector<8x128xf32>
    %cst_151 = arith.constant 5.000000e-01 : f32
    %466 = vector.broadcast %cst_151 : f32 to vector<8x128xf32>
    %467 = arith.addf %465, %466 : vector<8x128xf32>
    %468 = vector.extract_strided_slice %456 {offsets = [0, 128], sizes = [8, 128], strides = [1, 1]} : vector<8x384xf32> to vector<8x128xf32>
    %469 = vector.extract_strided_slice %457 {offsets = [0, 128], sizes = [8, 128], strides = [1, 1]} : vector<8x256xf32> to vector<8x128xf32>
    %470 = arith.addf %468, %469 : vector<8x128xf32>
    %cst_152 = arith.constant 5.000000e-01 : f32
    %471 = vector.broadcast %cst_152 : f32 to vector<8x128xf32>
    %472 = arith.mulf %471, %470 : vector<8x128xf32>
    %473 = math.tanh %472 : vector<8x128xf32>
    %cst_153 = arith.constant 5.000000e-01 : f32
    %474 = vector.broadcast %cst_153 : f32 to vector<8x128xf32>
    %475 = arith.mulf %474, %473 : vector<8x128xf32>
    %cst_154 = arith.constant 5.000000e-01 : f32
    %476 = vector.broadcast %cst_154 : f32 to vector<8x128xf32>
    %477 = arith.addf %475, %476 : vector<8x128xf32>
    %478 = vector.extract_strided_slice %456 {offsets = [0, 256], sizes = [8, 128], strides = [1, 1]} : vector<8x384xf32> to vector<8x128xf32>
    %479 = arith.mulf %477, %453 : vector<8x128xf32>
    %cst_155 = arith.constant dense<0.000000e+00> : vector<8x128xf32>
    %480 = tpu.matmul %479, %4, %cst_155 {dimension_numbers = #tpu.dot_dimension_numbers<[1], [0], [0], [1], [0, 0, 1, 1], [], []>} : vector<8x128xf32>, vector<128x128xf32>, vector<8x128xf32> -> vector<8x128xf32>
    %481 = arith.addf %478, %480 : vector<8x128xf32>
    %482 = math.tanh %481 : vector<8x128xf32>
    %483 = arith.subf %482, %453 : vector<8x128xf32>
    %484 = arith.mulf %467, %483 : vector<8x128xf32>
    %485 = arith.addf %453, %484 : vector<8x128xf32>
    %c15_i32 = arith.constant 15 : i32
    %486 = arith.index_cast %c15_i32 : i32 to index
    %c0_156 = arith.constant 0 : index
    %c0_157 = arith.constant 0 : index
    %487 = vector.load %arg2[%486, %c0_156, %c0_157] : memref<16x8x384xf32, #tpu.memory_space<vmem>>, vector<1x8x384xf32>
    %488 = vector.shape_cast %487 : vector<1x8x384xf32> to vector<8x384xf32>
    %cst_158 = arith.constant dense<0.000000e+00> : vector<8x256xf32>
    %489 = tpu.matmul %485, %3, %cst_158 {dimension_numbers = #tpu.dot_dimension_numbers<[1], [0], [0], [1], [0, 0, 1, 1], [], []>} : vector<8x128xf32>, vector<128x256xf32>, vector<8x256xf32> -> vector<8x256xf32>
    %490 = vector.extract_strided_slice %488 {offsets = [0, 0], sizes = [8, 128], strides = [1, 1]} : vector<8x384xf32> to vector<8x128xf32>
    %491 = vector.extract_strided_slice %489 {offsets = [0, 0], sizes = [8, 128], strides = [1, 1]} : vector<8x256xf32> to vector<8x128xf32>
    %492 = arith.addf %490, %491 : vector<8x128xf32>
    %cst_159 = arith.constant 5.000000e-01 : f32
    %493 = vector.broadcast %cst_159 : f32 to vector<8x128xf32>
    %494 = arith.mulf %493, %492 : vector<8x128xf32>
    %495 = math.tanh %494 : vector<8x128xf32>
    %cst_160 = arith.constant 5.000000e-01 : f32
    %496 = vector.broadcast %cst_160 : f32 to vector<8x128xf32>
    %497 = arith.mulf %496, %495 : vector<8x128xf32>
    %cst_161 = arith.constant 5.000000e-01 : f32
    %498 = vector.broadcast %cst_161 : f32 to vector<8x128xf32>
    %499 = arith.addf %497, %498 : vector<8x128xf32>
    %500 = vector.extract_strided_slice %488 {offsets = [0, 128], sizes = [8, 128], strides = [1, 1]} : vector<8x384xf32> to vector<8x128xf32>
    %501 = vector.extract_strided_slice %489 {offsets = [0, 128], sizes = [8, 128], strides = [1, 1]} : vector<8x256xf32> to vector<8x128xf32>
    %502 = arith.addf %500, %501 : vector<8x128xf32>
    %cst_162 = arith.constant 5.000000e-01 : f32
    %503 = vector.broadcast %cst_162 : f32 to vector<8x128xf32>
    %504 = arith.mulf %503, %502 : vector<8x128xf32>
    %505 = math.tanh %504 : vector<8x128xf32>
    %cst_163 = arith.constant 5.000000e-01 : f32
    %506 = vector.broadcast %cst_163 : f32 to vector<8x128xf32>
    %507 = arith.mulf %506, %505 : vector<8x128xf32>
    %cst_164 = arith.constant 5.000000e-01 : f32
    %508 = vector.broadcast %cst_164 : f32 to vector<8x128xf32>
    %509 = arith.addf %507, %508 : vector<8x128xf32>
    %510 = vector.extract_strided_slice %488 {offsets = [0, 256], sizes = [8, 128], strides = [1, 1]} : vector<8x384xf32> to vector<8x128xf32>
    %511 = arith.mulf %509, %485 : vector<8x128xf32>
    %cst_165 = arith.constant dense<0.000000e+00> : vector<8x128xf32>
    %512 = tpu.matmul %511, %4, %cst_165 {dimension_numbers = #tpu.dot_dimension_numbers<[1], [0], [0], [1], [0, 0, 1, 1], [], []>} : vector<8x128xf32>, vector<128x128xf32>, vector<8x128xf32> -> vector<8x128xf32>
    %513 = arith.addf %510, %512 : vector<8x128xf32>
    %514 = math.tanh %513 : vector<8x128xf32>
    %515 = arith.subf %514, %485 : vector<8x128xf32>
    %516 = arith.mulf %499, %515 : vector<8x128xf32>
    %517 = arith.addf %485, %516 : vector<8x128xf32>
    %c16_i32 = arith.constant 16 : i32
    %c0_166 = arith.constant 0 : index
    %c0_167 = arith.constant 0 : index
    %518 = vector.load %arg6[%c0_166, %c0_167] : memref<8x128xf32, #tpu.memory_space<vmem>>, vector<8x128xf32>
    tpu.vector_store %arg6[%c0_166, %c0_167], %517 {strides = array<i32>} : memref<8x128xf32, #tpu.memory_space<vmem>>, vector<8x128xf32>,
    return
  }
  func.func @transform_0(%arg0: i32, %arg1: i32) -> (i32, i32, i32) {
    %c0_i32 = arith.constant 0 : i32
    %c0_i32_0 = arith.constant 0 : i32
    return %arg1, %arg0, %c0_i32 : i32, i32, i32
  }
  func.func @transform_1(%arg0: i32, %arg1: i32) -> (i32, i32) {
    %c0_i32 = arith.constant 0 : i32
    %c0_i32_0 = arith.constant 0 : i32
    return %arg0, %c0_i32 : i32, i32
  }
  func.func @transform_2(%arg0: i32, %arg1: i32) -> (i32, i32) {
    %c0_i32 = arith.constant 0 : i32
    %c0_i32_0 = arith.constant 0 : i32
    %c0_i32_1 = arith.constant 0 : i32
    return %c0_i32, %c0_i32_0 : i32, i32
  }
  func.func @transform_3(%arg0: i32, %arg1: i32) -> (i32, i32) {
    %c0_i32 = arith.constant 0 : i32
    %c0_i32_0 = arith.constant 0 : i32
    %c0_i32_1 = arith.constant 0 : i32
    return %c0_i32, %c0_i32_0 : i32, i32
  }
  func.func @transform_4(%arg0: i32, %arg1: i32) -> (i32, i32) {
    %c0_i32 = arith.constant 0 : i32
    %c0_i32_0 = arith.constant 0 : i32
    return %arg0, %c0_i32 : i32, i32
  }
}

</mosaic_0001>

<bundles_post_ra>
// kernel: tpu_custom_call.1
= control target key start
LH: loop header
LB: loop body
LE: loop exit
PB: predicated region body
PF: predicated region fallthrough
CT: control target
= control target key end

     0   :  { %9 = vsyncpa [#allocation3], 0  ;;  %s2857_s0 = inlined_call_operand.hbm [shape: f32[16,8,384], index: 0, kind: input, shape index: {}]   ;;  %s2858_s1 = inlined_call_operand.hbm [shape: f32[8,128], index: 1, kind: input, shape index: {}]   ;;  %s2859_s2 = inlined_call_operand.hbm [shape: f32[128,256], index: 2, kind: input, shape index: {}]   ;;  %s2860_s3 = inlined_call_operand.hbm [shape: f32[128,128], index: 3, kind: input, shape index: {}]   ;;  %s2861_s4 = inlined_call_operand.hbm [shape: f32[8,128], index: 4, kind: output, shape index: {}]  }
   0x1   :  { %10 = vsyncpa [#allocation6], 0 }
   0x2   :  { %11 = vsyncpa [#allocation9], 0  ;;  %s31_s17 = sshll.u32 %s2858_s1, 4  ;;  %s32_s17 = int_to_ptr.hbm [resolvable:$true] %s31_s17 }
   0x3   :  { %12 = vsyncpa [#allocation4], 0  ;;  %s1754_s18 = smov [#allocation5]   ;;  %s17_s22 = sshll.u32 %s2857_s0, 4  ;;  %s18_s22 = int_to_ptr.hbm [resolvable:$true] %s17_s22 }
   0x4   :  { %s33_s19 = sshll.u32 %s1754_s18, 4  ;;  %s1755_s23 = smov [#allocation2]   ;;  %s34_s19 = int_to_ptr.vmem [resolvable:$true] %s33_s19 }
   0x5   :  { %36 = dma.hbm_to_vmem [thread:$0]  %s32_s17, 128, %s34_s19, [#allocation6]  }
   0x6   :  { %s19_s24 = sshll.u32 %s1755_s23, 4  ;;  %s1756_s25 = smov 384   ;;  %s20_s24 = int_to_ptr.vmem [resolvable:$true] %s19_s24 }
   0x7   :  { %s1757_s26 = smov 24   ;;  %s41_s1 = sshll.u32 %s2859_s2, 4  ;;  %s42_s1 = int_to_ptr.hbm [resolvable:$true] %s41_s1 }
   0x8   :  { %25 = dma.hbm_to_vmem [thread:$0]  %s18_s22, 6144, %s20_s24, [#allocation3], %s1756_s25, %s1756_s25, %s1757_s26  }
   0x9   :  { %s1758_s29 = smov [#allocation7]   ;;  %s54_s0 = sshll.u32 %s2860_s3, 4  ;;  %s55_s0 = int_to_ptr.hbm [resolvable:$true] %s54_s0 }
   0xa   :  { %s43_s30 = sshll.u32 %s1758_s29, 4  ;;  %s1759_s7 = smov 256   ;;  %s44_s30 = int_to_ptr.vmem [resolvable:$true] %s43_s30 }
   0xb   :  { %s1760_s8 = smov 16   ;;  %s1761_s9 = smov [#allocation8]  }
   0xc   :  { %49 = dma.hbm_to_vmem [thread:$0]  %s42_s1, 4096, %s44_s30, [#allocation6], %s1759_s7, %s1759_s7, %s1760_s8  }
   0xd   :  { %s56_s10 = sshll.u32 %s1761_s9, 4  ;;  %s1762_s11 = smov 128   ;;  %s57_s10 = int_to_ptr.vmem [resolvable:$true] %s56_s10 }
   0xe   :  { %s1763_s12 = smov 8  }
   0xf   :  { %62 = dma.hbm_to_vmem [thread:$0]  %s55_s0, 2048, %s57_s10, [#allocation9], %s1762_s11, %s1762_s11, %s1763_s12  }
  0x10   :  { %1746 = dma.done.wait [#allocation3], 6144  }
  0x11   :  { %1747 = vsyncadd [#allocation3], 4294961152 }
  0x12   :  { %1748 = dma.done.wait [#allocation6], 4224  }
  0x13   :  { %1749 = vsyncadd [#allocation6], 4294963072 }
  0x14   :  { %1750 = dma.done.wait [#allocation9], 2048  }
  0x15   :  { %1751 = vsyncadd [#allocation9], 4294965248  ;;  %v1802_v0 = vld [vmem:[#allocation7 + $0xf8] sm:$0xff]  ;;  %v1804_v1 = vld [vmem:[#allocation7 + $0xe8] sm:$0xff]  ;;  %s1764_s2 = smov [#allocation10]   ;;  %s1421_s15 = sshll.u32 %s2861_s4, 4  ;;  %s1422_s15 = int_to_ptr.hbm [resolvable:$true] %s1421_s15 }
  0x16   :  { %157 = vmatpush.msra.mxu1 %v1802_v0  ;;  %v1807_v2 = vld [vmem:[#allocation7 + $0xd8] sm:$0xff]  ;;  %v1810_v3 = vld [vmem:[#allocation7 + $0xc8] sm:$0xff]  ;;  %v1818_v6 = vld [vmem:[#allocation7 + $0xf0] sm:$0xff]  ;;  %s1419_s3 = sshll.u32 %s1764_s2, 4  ;;  %s1420_s3 = int_to_ptr.vmem [resolvable:$true] %s1419_s3 }
  0x17   :  { %v1813_v4 = vld [vmem:[#allocation7 + $0xb8] sm:$0xff]  ;;  %v1820_v7 = vld [vmem:[#allocation8 + $0x70] sm:$0xff]  ;;  %v1822_v8 = vld [vmem:[#allocation7 + $0xe0] sm:$0xff]  ;;  %137 = vmatpush.msra.mxu0 %v1818_v6  ;;  %217 = vmatpush.msra.mxu3 %v1818_v6 }
  0x18   :  { %158 = vmatpush.msra.mxu1 %v1804_v1  ;;  %v1815_v5 = vld [vmem:[#allocation8 + $0x78] sm:$0xff]  ;;  %v1826_v9 = vld [vmem:[#allocation8 + $0x68] sm:$0xff]  ;;  %v1831_v11 = vld [vmem:[#allocation7 + $0xd0] sm:$0xff] }
  0x19   :  { %188 = vmatpush.msra.mxu2 %v1815_v5  ;;  %v1828_v10 = vld [vmem:[#allocation7 + $0xa8] sm:$0xff]  ;;  %138 = vmatpush.msra.mxu0 %v1822_v8  ;;  %v1836_v12 = vld [vmem:[#allocation8 + $0x60] sm:$0xff]  ;;  %v1838_v13 = vld [vmem:[#allocation7 + $0x98] sm:$0xff] }
  0x1a   :  { %159 = vmatpush.msra.mxu1 %v1807_v2  ;;  %v1841_v14 = vld [vmem:[#allocation7 + $0xc0] sm:$0xff]  ;;  %218 = vmatpush.msra.mxu3 %v1822_v8  ;;  %v1846_v15 = vld [vmem:[#allocation8 + $0x58] sm:$0xff]  ;;  %v1848_v16 = vld [vmem:[#allocation7 + $0x88] sm:$0xff] }
  0x1b   :  { %189 = vmatpush.msra.mxu2 %v1820_v7  ;;  %139 = vmatpush.msra.mxu0 %v1831_v11  ;;  %v1851_v17 = vld [vmem:[#allocation7 + $0xb0] sm:$0xff]  ;;  %v1858_v19 = vld [vmem:[#allocation7 + $0x78] sm:$0xff]  ;;  %v1861_v20 = vld [vmem:[#allocation7 + $0xa0] sm:$0xff] }
  0x1c   :  { %160 = vmatpush.msra.mxu1 %v1810_v3  ;;  %219 = vmatpush.msra.mxu3 %v1831_v11  ;;  %v1856_v18 = vld [vmem:[#allocation8 + $0x50] sm:$0xff]  ;;  %v1866_v21 = vld [vmem:[#allocation8 + $0x48] sm:$0xff]  ;;  %v1874_v23 = vld [vmem:[#allocation7 + $0x58] sm:$0xff] }
  0x1d   :  { %190 = vmatpush.msra.mxu2 %v1826_v9  ;;  %140 = vmatpush.msra.mxu0 %v1841_v14  ;;  %v1868_v22 = vld [vmem:[#allocation7 + $0x68] sm:$0xff]  ;;  %v1882_v25 = vld [vmem:[#allocation7 + $0x38] sm:$0xff]  ;;  %v1905_v30 = vld [vmem:[#allocation7 + $0x90] sm:$0xff] }
  0x1e   :  { %161 = vmatpush.msra.mxu1 %v1813_v4  ;;  %220 = vmatpush.msra.mxu3 %v1841_v14  ;;  %v1879_v24 = vld [vmem:[#allocation7 + $0x48] sm:$0xff]  ;;  %v1888_v27 = vld [vmem:[#allocation7 + $0x18] sm:$0xff]  ;;  %v1907_v31 = vld [vmem:[#allocation8 + $0x40] sm:$0xff] }
  0x1f   :  { %191 = vmatpush.msra.mxu2 %v1836_v12  ;;  %141 = vmatpush.msra.mxu0 %v1851_v17  ;;  %v1885_v26 = vld [vmem:[#allocation7 + $0x28] sm:$0xff]  ;;  %v1894_v29 = vld [vmem:[#allocation5] sm:$0xff]  ;;  %v1911_v32 = vld [vmem:[#allocation7 + $0x80] sm:$0xff] }
  0x20   :  { %162 = vmatpush.msra.mxu1 %v1828_v10  ;;  %221 = vmatpush.msra.mxu3 %v1851_v17  ;;  %v1891_v28 = vld [vmem:[#allocation7 + $0x8] sm:$0xff]  ;;  %v1913_v33 = vld [vmem:[#allocation8 + $0x38] sm:$0xff]  ;;  %v1919_v34 = vld [vmem:[#allocation7 + $0x70] sm:$0xff] }
  0x21   :  { %192 = vmatpush.msra.mxu2 %v1846_v15  ;;  %142 = vmatpush.msra.mxu0 %v1861_v20  ;;  %v1921_v35 = vld [vmem:[#allocation8 + $0x30] sm:$0xff]  ;;  %v1927_v36 = vld [vmem:[#allocation7 + $0x60] sm:$0xff]  ;;  %v1929_v37 = vld [vmem:[#allocation8 + $0x28] sm:$0xff] }
  0x22   :  { %163 = vmatpush.msra.mxu1 %v1838_v13  ;;  %222 = vmatpush.msra.mxu3 %v1861_v20  ;;  %v1935_v38 = vld [vmem:[#allocation7 + $0x50] sm:$0xff]  ;;  %v1937_v39 = vld [vmem:[#allocation8 + $0x20] sm:$0xff]  ;;  %v1945_v41 = vld [vmem:[#allocation8 + $0x18] sm:$0xff] }
  0x23   :  { %193 = vmatpush.msra.mxu2 %v1856_v18  ;;  %143 = vmatpush.msra.mxu0 %v1905_v30  ;;  %v1943_v40 = vld [vmem:[#allocation7 + $0x40] sm:$0xff]  ;;  %v1951_v42 = vld [vmem:[#allocation7 + $0x30] sm:$0xff]  ;;  %v1961_v45 = vld [vmem:[#allocation8 + $0x8] sm:$0xff] }
  0x24   :  { %164 = vmatpush.msra.mxu1 %v1848_v16  ;;  %223 = vmatpush.msra.mxu3 %v1905_v30  ;;  %v1953_v43 = vld [vmem:[#allocation8 + $0x10] sm:$0xff]  ;;  %v1955_v44 = vld [vmem:[#allocation7 + $0x20] sm:$0xff]  ;;  %v134_v57 = vld [vmem:[#allocation2] sm:$0xff] }
  0x25   :  { %194 = vmatpush.msra.mxu2 %v1866_v21  ;;  %144 = vmatpush.msra.mxu0 %v1911_v32  ;;  %v1963_v46 = vld [vmem:[#allocation7 + $0x10] sm:$0xff]  ;;  %v1965_v47 = vld [vmem:[#allocation8] sm:$0xff]  ;;  %v136_v61 = vld [vmem:[#allocation2 + $0x10] sm:$0xff] }
  0x26   :  { %165 = vmatpush.msra.mxu1 %v1858_v19  ;;  %224 = vmatpush.msra.mxu3 %v1911_v32  ;;  %v1975_v48 = vld [vmem:[#allocation7] sm:$0xff] }
  0x27   :  { %195 = vmatpush.msra.mxu2 %v1907_v31  ;;  %145 = vmatpush.msra.mxu0 %v1919_v34  ;;  %v135_v49 = vld [vmem:[#allocation2 + $0x8] sm:$0xff] }
  0x28   :  { %166 = vmatpush.msra.mxu1 %v1868_v22  ;;  %225 = vmatpush.msra.mxu3 %v1919_v34 }
  0x29   :  { %196 = vmatpush.msra.mxu2 %v1913_v33  ;;  %146 = vmatpush.msra.mxu0 %v1927_v36 }
  0x2a   :  { %167 = vmatpush.msra.mxu1 %v1874_v23  ;;  %226 = vmatpush.msra.mxu3 %v1927_v36 }
  0x2b   :  { %197 = vmatpush.msra.mxu2 %v1921_v35  ;;  %147 = vmatpush.msra.mxu0 %v1935_v38 }
  0x2c   :  { %168 = vmatpush.msra.mxu1 %v1879_v24  ;;  %227 = vmatpush.msra.mxu3 %v1935_v38 }
  0x2d   :  { %198 = vmatpush.msra.mxu2 %v1929_v37  ;;  %148 = vmatpush.msra.mxu0 %v1943_v40 }
  0x2e   :  { %169 = vmatpush.msra.mxu1 %v1882_v25  ;;  %228 = vmatpush.msra.mxu3 %v1943_v40 }
  0x2f   :  { %199 = vmatpush.msra.mxu2 %v1937_v39  ;;  %149 = vmatpush.msra.mxu0 %v1951_v42 }
  0x30   :  { %170 = vmatpush.msra.mxu1 %v1885_v26  ;;  %229 = vmatpush.msra.mxu3 %v1951_v42 }
  0x31   :  { %200 = vmatpush.msra.mxu2 %v1945_v41  ;;  %150 = vmatpush.msra.mxu0 %v1955_v44 }
  0x32   :  { %171 = vmatpush.msra.mxu1 %v1888_v27  ;;  %230 = vmatpush.msra.mxu3 %v1955_v44 }
  0x33   :  { %201 = vmatpush.msra.mxu2 %v1953_v43  ;;  %151 = vmatpush.msra.mxu0 %v1963_v46 }
  0x34   :  { %172 = vmatpush.msra.mxu1 %v1891_v28  ;;  %231 = vmatpush.msra.mxu3 %v1963_v46 }
  0x35   :  { %173 = vmatmul.f32.vlgmr.msra.gmra.mxu1 %v1894_v29  ;;  %202 = vmatpush.msra.mxu2 %v1961_v45 }
  0x36   :  { %268 = vmatpush.msrb.mxu1 %v1815_v5  ;;  %152 = vmatpush.msra.mxu0 %v1975_v48 }
  0x37   :  { %203 = vmatpush.msra.mxu2 %v1965_v47  ;;  %153 = vmatmul.f32.vlgmr.msra.gmra.mxu0 %v1894_v29 }
  0x38   :  { %269 = vmatpush.msrb.mxu1 %v1820_v7  ;;  %232 = vmatpush.msra.mxu3 %v1975_v48 }
  0x39   :  { %297 = vmatpush.msrb.mxu2 %v1818_v6  ;;  %237 = vmatpush.msrb.mxu0 %v1802_v0 }
  0x3a   :  { %270 = vmatpush.msrb.mxu1 %v1826_v9  ;;  %317 = vmatpush.msrb.mxu3 %v1802_v0 }
  0x3b   :  { %298 = vmatpush.msrb.mxu2 %v1822_v8  ;;  %238 = vmatpush.msrb.mxu0 %v1804_v1 }
  0x3c   :  { %271 = vmatpush.msrb.mxu1 %v1836_v12  ;;  %318 = vmatpush.msrb.mxu3 %v1804_v1 }
  0x3d   :  { %299 = vmatpush.msrb.mxu2 %v1831_v11  ;;  %239 = vmatpush.msrb.mxu0 %v1807_v2 }
  0x3e   :  { %272 = vmatpush.msrb.mxu1 %v1846_v15  ;;  %319 = vmatpush.msrb.mxu3 %v1807_v2 }
  0x3f   :  { %300 = vmatpush.msrb.mxu2 %v1841_v14  ;;  %240 = vmatpush.msrb.mxu0 %v1810_v3 }
  0x40   :  { %273 = vmatpush.msrb.mxu1 %v1856_v18  ;;  %320 = vmatpush.msrb.mxu3 %v1810_v3 }
  0x41   :  { %301 = vmatpush.msrb.mxu2 %v1851_v17  ;;  %241 = vmatpush.msrb.mxu0 %v1813_v4 }
  0x42   :  { %274 = vmatpush.msrb.mxu1 %v1866_v21  ;;  %321 = vmatpush.msrb.mxu3 %v1813_v4 }
  0x43   :  { %302 = vmatpush.msrb.mxu2 %v1861_v20  ;;  %242 = vmatpush.msrb.mxu0 %v1828_v10 }
  0x44   :  { %275 = vmatpush.msrb.mxu1 %v1907_v31  ;;  %322 = vmatpush.msrb.mxu3 %v1828_v10 }
  0x45   :  { %303 = vmatpush.msrb.mxu2 %v1905_v30  ;;  %243 = vmatpush.msrb.mxu0 %v1838_v13 }
  0x46   :  { %276 = vmatpush.msrb.mxu1 %v1913_v33  ;;  %323 = vmatpush.msrb.mxu3 %v1838_v13 }
  0x47   :  { %304 = vmatpush.msrb.mxu2 %v1911_v32  ;;  %244 = vmatpush.msrb.mxu0 %v1848_v16 }
  0x48   :  { %277 = vmatpush.msrb.mxu1 %v1921_v35  ;;  %324 = vmatpush.msrb.mxu3 %v1848_v16 }
  0x49   :  { %305 = vmatpush.msrb.mxu2 %v1919_v34  ;;  %245 = vmatpush.msrb.mxu0 %v1858_v19 }
  0x4a   :  { %278 = vmatpush.msrb.mxu1 %v1929_v37  ;;  %325 = vmatpush.msrb.mxu3 %v1858_v19 }
  0x4b   :  { %306 = vmatpush.msrb.mxu2 %v1927_v36  ;;  %246 = vmatpush.msrb.mxu0 %v1868_v22 }
  0x4c   :  { %279 = vmatpush.msrb.mxu1 %v1937_v39  ;;  %326 = vmatpush.msrb.mxu3 %v1868_v22 }
  0x4d   :  { %307 = vmatpush.msrb.mxu2 %v1935_v38  ;;  %247 = vmatpush.msrb.mxu0 %v1874_v23 }
  0x4e   :  { %280 = vmatpush.msrb.mxu1 %v1945_v41  ;;  %327 = vmatpush.msrb.mxu3 %v1874_v23 }
  0x4f   :  { %308 = vmatpush.msrb.mxu2 %v1943_v40  ;;  %248 = vmatpush.msrb.mxu0 %v1879_v24 }
  0x50   :  { %281 = vmatpush.msrb.mxu1 %v1953_v43  ;;  %328 = vmatpush.msrb.mxu3 %v1879_v24 }
  0x51   :  { %309 = vmatpush.msrb.mxu2 %v1951_v42  ;;  %249 = vmatpush.msrb.mxu0 %v1882_v25 }
  0x52   :  { %282 = vmatpush.msrb.mxu1 %v1961_v45  ;;  %329 = vmatpush.msrb.mxu3 %v1882_v25 }
  0x53   :  { %310 = vmatpush.msrb.mxu2 %v1955_v44  ;;  %250 = vmatpush.msrb.mxu0 %v1885_v26 }
  0x54   :  { %283 = vmatpush.msrb.mxu1 %v1965_v47  ;;  %330 = vmatpush.msrb.mxu3 %v1885_v26 }
  0x55   :  { %311 = vmatpush.msrb.mxu2 %v1963_v46  ;;  %251 = vmatpush.msrb.mxu0 %v1888_v27 }
  0x56   :  { %377 = vmatpush.msra.mxu1 %v1818_v6  ;;  %331 = vmatpush.msrb.mxu3 %v1888_v27 }
  0x57   :  { %252 = vmatpush.msrb.mxu0 %v1891_v28  ;;  %312 = vmatpush.msrb.mxu2 %v1975_v48 }
  0x58   :  { %378 = vmatpush.msra.mxu1 %v1822_v8  ;;  %332 = vmatpush.msrb.mxu3 %v1891_v28 }
  0x59   :  { %348 = vmatpush.msra.mxu0 %v1815_v5 }
  0x5a   :  { %379 = vmatpush.msra.mxu1 %v1831_v11 }
  0x5b   :  { %349 = vmatpush.msra.mxu0 %v1820_v7 }
  0x5c   :  { %380 = vmatpush.msra.mxu1 %v1841_v14 }
  0x5d   :  { %350 = vmatpush.msra.mxu0 %v1826_v9 }
  0x5e   :  { %381 = vmatpush.msra.mxu1 %v1851_v17 }
  0x5f   :  { %351 = vmatpush.msra.mxu0 %v1836_v12 }
  0x60   :  { %382 = vmatpush.msra.mxu1 %v1861_v20 }
  0x61   :  { %352 = vmatpush.msra.mxu0 %v1846_v15 }
  0x62   :  { %383 = vmatpush.msra.mxu1 %v1905_v30 }
  0x63   :  { %353 = vmatpush.msra.mxu0 %v1856_v18 }
  0x64   :  { %384 = vmatpush.msra.mxu1 %v1911_v32 }
  0x65   :  { %354 = vmatpush.msra.mxu0 %v1866_v21 }
  0x66   :  { %385 = vmatpush.msra.mxu1 %v1919_v34 }
  0x67   :  { %355 = vmatpush.msra.mxu0 %v1907_v31 }
  0x68   :  { %386 = vmatpush.msra.mxu1 %v1927_v36 }
  0x69   :  { %356 = vmatpush.msra.mxu0 %v1913_v33 }
  0x6a   :  { %387 = vmatpush.msra.mxu1 %v1935_v38 }
  0x6b   :  { %357 = vmatpush.msra.mxu0 %v1921_v35 }
  0x6c   :  { %388 = vmatpush.msra.mxu1 %v1943_v40 }
  0x6d   :  { %358 = vmatpush.msra.mxu0 %v1929_v37 }
  0x6e   :  { %389 = vmatpush.msra.mxu1 %v1951_v42 }
  0x6f   :  { %359 = vmatpush.msra.mxu0 %v1937_v39 }
  0x70   :  { %390 = vmatpush.msra.mxu1 %v1955_v44 }
  0x71   :  { %360 = vmatpush.msra.mxu0 %v1945_v41 }
  0x72   :  { %391 = vmatpush.msra.mxu1 %v1963_v46 }
  0x73   :  { %361 = vmatpush.msra.mxu0 %v1953_v43 }
  0x74   :  { %392 = vmatpush.msra.mxu1 %v1975_v48 }
  0x75   :  { %362 = vmatpush.msra.mxu0 %v1961_v45 }
  0x77   :  { %363 = vmatpush.msra.mxu0 %v1965_v47 }
  0xb2   :  { %v174_v50 = vpop.f32.mrf.mxu1 }
  0xb3   :  { %v182_v51 = vadd.f32 %v174_v50, %v135_v49 }
  0xb4   :  { %v154_v58 = vpop.f32.mrf.mxu0 }
  0xb5   :  { %v183_v52 = vmul.f32 0.5, %v182_v51  ;;  %v177_v59 = vadd.f32 %v154_v58, %v134_v57 }
  0xb7   :  { %1444 = vtanh.f32 %v183_v52  ;;  %v178_v60 = vmul.f32 0.5, %v177_v59 }
  0xb9   :  { %1446 = vtanh.f32 %v178_v60 }
  0xbd   :  { %v1445_v53 = vpop.eup %1444 }
  0xbe   :  { %v185_v54 = vmul.f32 0.5, %v1445_v53 }
  0xbf   :  { %v1447_v63 = vpop.eup %1446 }
  0xc0   :  { %v186_v55 = vadd.f32 0.5, %v185_v54  ;;  %v180_v50 = vmul.f32 0.5, %v1447_v63  ;;  %v214_v63 = vld [vmem:[#allocation2 + $0x18] sm:$0xff] }
  0xc2   :  { %v187_v56 = vmul.f32 %v186_v55, %v1894_v29  ;;  %v181_v51 = vadd.f32 0.5, %v180_v50 }
  0xc4   :  { %204 = vmatmul.f32.vlgmr.msra.gmra.mxu2 %v187_v56 }
  0xc5   :  { %397 = vmatpush.msra.mxu2 %v1802_v0 }
  0xc7   :  { %398 = vmatpush.msra.mxu2 %v1804_v1 }
  0xc9   :  { %399 = vmatpush.msra.mxu2 %v1807_v2 }
  0xcb   :  { %400 = vmatpush.msra.mxu2 %v1810_v3 }
  0xcd   :  { %401 = vmatpush.msra.mxu2 %v1813_v4 }
  0xcf   :  { %402 = vmatpush.msra.mxu2 %v1828_v10 }
  0xd1   :  { %403 = vmatpush.msra.mxu2 %v1838_v13 }
  0xd3   :  { %404 = vmatpush.msra.mxu2 %v1848_v16 }
  0xd5   :  { %405 = vmatpush.msra.mxu2 %v1858_v19 }
  0xd7   :  { %406 = vmatpush.msra.mxu2 %v1868_v22 }
  0xd9   :  { %407 = vmatpush.msra.mxu2 %v1874_v23 }
  0xdb   :  { %408 = vmatpush.msra.mxu2 %v1879_v24 }
  0xdd   :  { %409 = vmatpush.msra.mxu2 %v1882_v25 }
  0xdf   :  { %410 = vmatpush.msra.mxu2 %v1885_v26 }
  0xe1   :  { %411 = vmatpush.msra.mxu2 %v1888_v27 }
  0xe3   :  { %412 = vmatpush.msra.mxu2 %v1891_v28 }
 0x147   :  { %v205_v62 = vpop.f32.mrf.mxu2 }
 0x148   :  { %v208_v49 = vadd.f32 %v205_v62, %v136_v61 }
 0x14a   :  { %1448 = vtanh.f32 %v208_v49 }
 0x150   :  { %v1449_v52 = vpop.eup %1448 }
 0x151   :  { %v210_v53 = vsub.f32 %v1449_v52, %v1894_v29  ;;  %v216_v52 = vld [vmem:[#allocation2 + $0x28] sm:$0xff] }
 0x153   :  { %v211_v54 = vmul.f32 %v210_v53, %v181_v51 }
 0x155   :  { %v2081_v55 = vadd.f32 %v211_v54, %v1894_v29  ;;  %v215_v29 = vld [vmem:[#allocation2 + $0x20] sm:$0xff] }
 0x157   :  { %233 = vmatmul.f32.vlgmr.msra.gmra.mxu3 %v2081_v55  ;;  %253 = vmatmul.f32.vlgmr.msrb.gmra.mxu0 %v2081_v55 }
 0x158   :  { %428 = vmatpush.msra.mxu3 %v1815_v5  ;;  %457 = vmatpush.msrb.mxu0 %v1818_v6 }
 0x15a   :  { %429 = vmatpush.msra.mxu3 %v1820_v7  ;;  %458 = vmatpush.msrb.mxu0 %v1822_v8 }
 0x15c   :  { %430 = vmatpush.msra.mxu3 %v1826_v9  ;;  %459 = vmatpush.msrb.mxu0 %v1831_v11 }
 0x15e   :  { %431 = vmatpush.msra.mxu3 %v1836_v12  ;;  %460 = vmatpush.msrb.mxu0 %v1841_v14 }
 0x160   :  { %432 = vmatpush.msra.mxu3 %v1846_v15  ;;  %461 = vmatpush.msrb.mxu0 %v1851_v17 }
 0x162   :  { %433 = vmatpush.msra.mxu3 %v1856_v18  ;;  %462 = vmatpush.msrb.mxu0 %v1861_v20 }
 0x164   :  { %434 = vmatpush.msra.mxu3 %v1866_v21  ;;  %463 = vmatpush.msrb.mxu0 %v1905_v30 }
 0x166   :  { %435 = vmatpush.msra.mxu3 %v1907_v31  ;;  %464 = vmatpush.msrb.mxu0 %v1911_v32 }
 0x168   :  { %436 = vmatpush.msra.mxu3 %v1913_v33  ;;  %465 = vmatpush.msrb.mxu0 %v1919_v34 }
 0x16a   :  { %437 = vmatpush.msra.mxu3 %v1921_v35  ;;  %466 = vmatpush.msrb.mxu0 %v1927_v36 }
 0x16c   :  { %438 = vmatpush.msra.mxu3 %v1929_v37  ;;  %467 = vmatpush.msrb.mxu0 %v1935_v38 }
 0x16e   :  { %439 = vmatpush.msra.mxu3 %v1937_v39  ;;  %468 = vmatpush.msrb.mxu0 %v1943_v40 }
 0x170   :  { %440 = vmatpush.msra.mxu3 %v1945_v41  ;;  %469 = vmatpush.msrb.mxu0 %v1951_v42 }
 0x172   :  { %441 = vmatpush.msra.mxu3 %v1953_v43  ;;  %470 = vmatpush.msrb.mxu0 %v1955_v44 }
 0x174   :  { %442 = vmatpush.msra.mxu3 %v1961_v45  ;;  %471 = vmatpush.msrb.mxu0 %v1963_v46 }
 0x176   :  { %443 = vmatpush.msra.mxu3 %v1965_v47  ;;  %472 = vmatpush.msrb.mxu0 %v1975_v48 }
 0x1d4   :  { %v254_v56 = vpop.f32.mrf.mxu0 }
 0x1d5   :  { %v262_v57 = vadd.f32 %v254_v56, %v215_v29 }
 0x1d7   :  { %v263_v58 = vmul.f32 0.5, %v262_v57 }
 0x1d9   :  { %1450 = vtanh.f32 %v263_v58 }
 0x1da   :  { %v234_v49 = vpop.f32.mrf.mxu3 }
 0x1db   :  { %v257_v50 = vadd.f32 %v234_v49, %v214_v63 }
 0x1dd   :  { %v258_v51 = vmul.f32 0.5, %v257_v50 }
 0x1df   :  { %v1451_v59 = vpop.eup %1450  ;;  %1452 = vtanh.f32 %v258_v51 }
 0x1e0   :  { %v265_v60 = vmul.f32 0.5, %v1451_v59 }
 0x1e2   :  { %v266_v61 = vadd.f32 0.5, %v265_v60 }
 0x1e4   :  { %v267_v62 = vmul.f32 %v266_v61, %v2081_v55 }
 0x1e5   :  { %v1453_v29 = vpop.eup %1452 }
 0x1e6   :  { %284 = vmatmul.f32.vlgmr.msrb.gmra.mxu1 %v267_v62  ;;  %v260_v56 = vmul.f32 0.5, %v1453_v29 }
 0x1e7   :  { %477 = vmatpush.msrb.mxu1 %v1802_v0 }
 0x1e8   :  { %v261_v58 = vadd.f32 0.5, %v260_v56 }
 0x1e9   :  { %478 = vmatpush.msrb.mxu1 %v1804_v1 }
 0x1eb   :  { %479 = vmatpush.msrb.mxu1 %v1807_v2 }
 0x1ed   :  { %480 = vmatpush.msrb.mxu1 %v1810_v3 }
 0x1ef   :  { %481 = vmatpush.msrb.mxu1 %v1813_v4 }
 0x1f1   :  { %482 = vmatpush.msrb.mxu1 %v1828_v10 }
 0x1f3   :  { %483 = vmatpush.msrb.mxu1 %v1838_v13 }
 0x1f5   :  { %484 = vmatpush.msrb.mxu1 %v1848_v16 }
 0x1f7   :  { %485 = vmatpush.msrb.mxu1 %v1858_v19 }
 0x1f9   :  { %486 = vmatpush.msrb.mxu1 %v1868_v22 }
 0x1fb   :  { %487 = vmatpush.msrb.mxu1 %v1874_v23 }
 0x1fd   :  { %488 = vmatpush.msrb.mxu1 %v1879_v24 }
 0x1ff   :  { %489 = vmatpush.msrb.mxu1 %v1882_v25 }
 0x201   :  { %490 = vmatpush.msrb.mxu1 %v1885_v26 }
 0x203   :  { %491 = vmatpush.msrb.mxu1 %v1888_v27 }
 0x205   :  { %492 = vmatpush.msrb.mxu1 %v1891_v28 }
 0x263   :  { %v285_v53 = vpop.f32.mrf.mxu1 }
 0x264   :  { %v288_v54 = vadd.f32 %v285_v53, %v216_v52 }
 0x266   :  { %1454 = vtanh.f32 %v288_v54  ;;  %v294_v54 = vld [vmem:[#allocation2 + $0x30] sm:$0xff] }
 0x26c   :  { %v1455_v57 = vpop.eup %1454 }
 0x26d   :  { %v290_v59 = vsub.f32 %v1455_v57, %v2081_v55 }
 0x26f   :  { %v291_v60 = vmul.f32 %v290_v59, %v261_v58  ;;  %v296_v58 = vld [vmem:[#allocation2 + $0x40] sm:$0xff] }
 0x271   :  { %v2136_v61 = vadd.f32 %v291_v60, %v2081_v55  ;;  %v295_v55 = vld [vmem:[#allocation2 + $0x38] sm:$0xff] }
 0x273   :  { %313 = vmatmul.f32.vlgmr.msrb.gmra.mxu2 %v2136_v61  ;;  %333 = vmatmul.f32.vlgmr.msrb.gmra.mxu3 %v2136_v61 }
 0x274   :  { %508 = vmatpush.msrb.mxu2 %v1815_v5  ;;  %537 = vmatpush.msrb.mxu3 %v1818_v6 }
 0x276   :  { %509 = vmatpush.msrb.mxu2 %v1820_v7  ;;  %538 = vmatpush.msrb.mxu3 %v1822_v8 }
 0x278   :  { %510 = vmatpush.msrb.mxu2 %v1826_v9  ;;  %539 = vmatpush.msrb.mxu3 %v1831_v11 }
 0x27a   :  { %511 = vmatpush.msrb.mxu2 %v1836_v12  ;;  %540 = vmatpush.msrb.mxu3 %v1841_v14 }
 0x27c   :  { %512 = vmatpush.msrb.mxu2 %v1846_v15  ;;  %541 = vmatpush.msrb.mxu3 %v1851_v17 }
 0x27e   :  { %513 = vmatpush.msrb.mxu2 %v1856_v18  ;;  %542 = vmatpush.msrb.mxu3 %v1861_v20 }
 0x280   :  { %514 = vmatpush.msrb.mxu2 %v1866_v21  ;;  %543 = vmatpush.msrb.mxu3 %v1905_v30 }
 0x282   :  { %515 = vmatpush.msrb.mxu2 %v1907_v31  ;;  %544 = vmatpush.msrb.mxu3 %v1911_v32 }
 0x284   :  { %516 = vmatpush.msrb.mxu2 %v1913_v33  ;;  %545 = vmatpush.msrb.mxu3 %v1919_v34 }
 0x286   :  { %517 = vmatpush.msrb.mxu2 %v1921_v35  ;;  %546 = vmatpush.msrb.mxu3 %v1927_v36 }
 0x288   :  { %518 = vmatpush.msrb.mxu2 %v1929_v37  ;;  %547 = vmatpush.msrb.mxu3 %v1935_v38 }
 0x28a   :  { %519 = vmatpush.msrb.mxu2 %v1937_v39  ;;  %548 = vmatpush.msrb.mxu3 %v1943_v40 }
 0x28c   :  { %520 = vmatpush.msrb.mxu2 %v1945_v41  ;;  %549 = vmatpush.msrb.mxu3 %v1951_v42 }
 0x28e   :  { %521 = vmatpush.msrb.mxu2 %v1953_v43  ;;  %550 = vmatpush.msrb.mxu3 %v1955_v44 }
 0x290   :  { %522 = vmatpush.msrb.mxu2 %v1961_v45  ;;  %551 = vmatpush.msrb.mxu3 %v1963_v46 }
 0x292   :  { %523 = vmatpush.msrb.mxu2 %v1965_v47  ;;  %552 = vmatpush.msrb.mxu3 %v1975_v48 }
 0x2f6   :  { %v334_v62 = vpop.f32.mrf.mxu3  ;;  %v314_v29 = vpop.f32.mrf.mxu2 }
 0x2f7   :  { %v342_v63 = vadd.f32 %v334_v62, %v295_v55  ;;  %v337_v56 = vadd.f32 %v314_v29, %v294_v54 }
 0x2f9   :  { %v343_v49 = vmul.f32 0.5, %v342_v63  ;;  %v338_v57 = vmul.f32 0.5, %v337_v56 }
 0x2fb   :  { %1456 = vtanh.f32 %v343_v49 }
 0x2fc   :  { %1458 = vtanh.f32 %v338_v57 }
 0x301   :  { %v1457_v50 = vpop.eup %1456 }
 0x302   :  { %v345_v51 = vmul.f32 0.5, %v1457_v50  ;;  %v1459_v55 = vpop.eup %1458 }
 0x303   :  { %v340_v62 = vmul.f32 0.5, %v1459_v55 }
 0x304   :  { %v346_v52 = vadd.f32 0.5, %v345_v51 }
 0x305   :  { %v341_v49 = vadd.f32 0.5, %v340_v62 }
 0x306   :  { %v347_v53 = vmul.f32 %v346_v52, %v2136_v61 }
 0x308   :  { %364 = vmatmul.f32.vlgmr.msra.gmra.mxu0 %v347_v53 }
 0x309   :  { %557 = vmatpush.msra.mxu0 %v1802_v0 }
 0x30b   :  { %558 = vmatpush.msra.mxu0 %v1804_v1 }
 0x30d   :  { %559 = vmatpush.msra.mxu0 %v1807_v2 }
 0x30f   :  { %560 = vmatpush.msra.mxu0 %v1810_v3 }
 0x311   :  { %561 = vmatpush.msra.mxu0 %v1813_v4 }
 0x313   :  { %562 = vmatpush.msra.mxu0 %v1828_v10 }
 0x315   :  { %563 = vmatpush.msra.mxu0 %v1838_v13 }
 0x317   :  { %564 = vmatpush.msra.mxu0 %v1848_v16 }
 0x319   :  { %565 = vmatpush.msra.mxu0 %v1858_v19 }
 0x31b   :  { %566 = vmatpush.msra.mxu0 %v1868_v22 }
 0x31d   :  { %567 = vmatpush.msra.mxu0 %v1874_v23 }
 0x31f   :  { %568 = vmatpush.msra.mxu0 %v1879_v24 }
 0x321   :  { %569 = vmatpush.msra.mxu0 %v1882_v25 }
 0x323   :  { %570 = vmatpush.msra.mxu0 %v1885_v26 }
 0x325   :  { %571 = vmatpush.msra.mxu0 %v1888_v27 }
 0x327   :  { %572 = vmatpush.msra.mxu0 %v1891_v28 }
 0x385   :  { %v365_v59 = vpop.f32.mrf.mxu0 }
 0x386   :  { %v368_v60 = vadd.f32 %v365_v59, %v296_v58 }
 0x388   :  { %1460 = vtanh.f32 %v368_v60 }
 0x38e   :  { %v1461_v63 = vpop.eup %1460 }
 0x38f   :  { %v370_v50 = vsub.f32 %v1461_v63, %v2136_v61 }
 0x391   :  { %v371_v51 = vmul.f32 %v370_v50, %v341_v49 }
 0x393   :  { %v2191_v52 = vadd.f32 %v371_v51, %v2136_v61  ;;  %v375_v61 = vld [vmem:[#allocation2 + $0x50] sm:$0xff] }
 0x395   :  { %393 = vmatmul.f32.vlgmr.msra.gmra.mxu1 %v2191_v52  ;;  %413 = vmatmul.f32.vlgmr.msra.gmra.mxu2 %v2191_v52 }
 0x396   :  { %588 = vmatpush.msra.mxu1 %v1815_v5  ;;  %617 = vmatpush.msra.mxu2 %v1818_v6 }
 0x398   :  { %589 = vmatpush.msra.mxu1 %v1820_v7  ;;  %618 = vmatpush.msra.mxu2 %v1822_v8 }
 0x39a   :  { %590 = vmatpush.msra.mxu1 %v1826_v9  ;;  %619 = vmatpush.msra.mxu2 %v1831_v11 }
 0x39c   :  { %591 = vmatpush.msra.mxu1 %v1836_v12  ;;  %620 = vmatpush.msra.mxu2 %v1841_v14 }
 0x39e   :  { %592 = vmatpush.msra.mxu1 %v1846_v15  ;;  %621 = vmatpush.msra.mxu2 %v1851_v17 }
 0x3a0   :  { %593 = vmatpush.msra.mxu1 %v1856_v18  ;;  %622 = vmatpush.msra.mxu2 %v1861_v20 }
 0x3a2   :  { %594 = vmatpush.msra.mxu1 %v1866_v21  ;;  %623 = vmatpush.msra.mxu2 %v1905_v30 }
 0x3a4   :  { %595 = vmatpush.msra.mxu1 %v1907_v31  ;;  %624 = vmatpush.msra.mxu2 %v1911_v32 }
 0x3a6   :  { %596 = vmatpush.msra.mxu1 %v1913_v33  ;;  %625 = vmatpush.msra.mxu2 %v1919_v34 }
 0x3a8   :  { %597 = vmatpush.msra.mxu1 %v1921_v35  ;;  %626 = vmatpush.msra.mxu2 %v1927_v36 }
 0x3aa   :  { %598 = vmatpush.msra.mxu1 %v1929_v37  ;;  %627 = vmatpush.msra.mxu2 %v1935_v38 }
 0x3ac   :  { %599 = vmatpush.msra.mxu1 %v1937_v39  ;;  %628 = vmatpush.msra.mxu2 %v1943_v40 }
 0x3ae   :  { %600 = vmatpush.msra.mxu1 %v1945_v41  ;;  %629 = vmatpush.msra.mxu2 %v1951_v42 }
 0x3b0   :  { %601 = vmatpush.msra.mxu1 %v1953_v43  ;;  %630 = vmatpush.msra.mxu2 %v1955_v44 }
 0x3b2   :  { %602 = vmatpush.msra.mxu1 %v1961_v45  ;;  %631 = vmatpush.msra.mxu2 %v1963_v46 }
 0x3b4   :  { %603 = vmatpush.msra.mxu1 %v1965_v47  ;;  %632 = vmatpush.msra.mxu2 %v1975_v48 }
 0x418   :  { %v414_v53 = vpop.f32.mrf.mxu2 }
 0x419   :  { %v422_v54 = vadd.f32 %v414_v53, %v375_v61  ;;  %v454_v53 = vld [vmem:[#allocation2 + $0x60] sm:$0xff] }
 0x41b   :  { %v423_v29 = vmul.f32 0.5, %v422_v54 }
 0x41d   :  { %1462 = vtanh.f32 %v423_v29 }
 0x423   :  { %v1463_v56 = vpop.eup %1462 }
 0x424   :  { %v425_v57 = vmul.f32 0.5, %v1463_v56 }
 0x426   :  { %v426_v58 = vadd.f32 0.5, %v425_v57 }
 0x428   :  { %v427_v59 = vmul.f32 %v426_v58, %v2191_v52  ;;  %v2320_v58 = vld [vmem:[#allocation7 + $0xf0] sm:$0xff] }
 0x42a   :  { %444 = vmatmul.f32.vlgmr.msra.gmra.mxu3 %v427_v59  ;;  %v2323_v59 = vld [vmem:[#allocation8 + $0x70] sm:$0xff] }
 0x42b   :  { %637 = vmatpush.msra.mxu3 %v1802_v0  ;;  %v374_v0 = vld [vmem:[#allocation2 + $0x48] sm:$0xff] }
 0x42d   :  { %638 = vmatpush.msra.mxu3 %v1804_v1  ;;  %v394_v1 = vpop.f32.mrf.mxu1 }
 0x42f   :  { %639 = vmatpush.msra.mxu3 %v1807_v2  ;;  %v417_v2 = vadd.f32 %v394_v1, %v374_v0  ;;  %v2326_v0 = vld [vmem:[#allocation7 + $0xe0] sm:$0xff]  ;;  %v2329_v1 = vld [vmem:[#allocation8 + $0x68] sm:$0xff] }
 0x431   :  { %640 = vmatpush.msra.mxu3 %v1810_v3  ;;  %v418_v3 = vmul.f32 0.5, %v417_v2  ;;  %v2332_v2 = vld [vmem:[#allocation7 + $0xd0] sm:$0xff] }
 0x433   :  { %641 = vmatpush.msra.mxu3 %v1813_v4  ;;  %1464 = vtanh.f32 %v418_v3  ;;  %v376_v4 = vld [vmem:[#allocation2 + $0x58] sm:$0xff]  ;;  %v2335_v3 = vld [vmem:[#allocation8 + $0x60] sm:$0xff] }
 0x435   :  { %642 = vmatpush.msra.mxu3 %v1828_v10 }
 0x437   :  { %643 = vmatpush.msra.mxu3 %v1838_v13 }
 0x439   :  { %644 = vmatpush.msra.mxu3 %v1848_v16  ;;  %v1465_v55 = vpop.eup %1464 }
 0x43a   :  { %v420_v62 = vmul.f32 0.5, %v1465_v55  ;;  %v2347_v55 = vld [vmem:[#allocation8 + $0x50] sm:$0xff] }
 0x43b   :  { %645 = vmatpush.msra.mxu3 %v1858_v19 }
 0x43c   :  { %v421_v49 = vadd.f32 0.5, %v420_v62  ;;  %v2350_v62 = vld [vmem:[#allocation7 + $0xa0] sm:$0xff] }
 0x43d   :  { %646 = vmatpush.msra.mxu3 %v1868_v22 }
 0x43f   :  { %647 = vmatpush.msra.mxu3 %v1874_v23 }
 0x441   :  { %648 = vmatpush.msra.mxu3 %v1879_v24 }
 0x443   :  { %649 = vmatpush.msra.mxu3 %v1882_v25 }
 0x445   :  { %650 = vmatpush.msra.mxu3 %v1885_v26 }
 0x447   :  { %651 = vmatpush.msra.mxu3 %v1888_v27 }
 0x449   :  { %652 = vmatpush.msra.mxu3 %v1891_v28 }
 0x4ad   :  { %v445_v10 = vpop.f32.mrf.mxu3 }
 0x4ae   :  { %v448_v60 = vadd.f32 %v445_v10, %v376_v4  ;;  %v2338_v4 = vld [vmem:[#allocation7 + $0xc0] sm:$0xff]  ;;  %v2341_v10 = vld [vmem:[#allocation8 + $0x58] sm:$0xff] }
 0x4b0   :  { %1466 = vtanh.f32 %v448_v60  ;;  %v2344_v60 = vld [vmem:[#allocation7 + $0xb0] sm:$0xff] }
 0x4b6   :  { %v1467_v63 = vpop.eup %1466 }
 0x4b7   :  { %v450_v50 = vsub.f32 %v1467_v63, %v2191_v52  ;;  %v2353_v63 = vld [vmem:[#allocation8 + $0x48] sm:$0xff] }
 0x4b9   :  { %v451_v51 = vmul.f32 %v450_v50, %v421_v49 }
 0x4bb   :  { %v2246_v61 = vadd.f32 %v451_v51, %v2191_v52  ;;  %v2298_v52 = vld [vmem:[#allocation7 + $0xa8] sm:$0xff] }
 0x4bd   :  { %473 = vmatmul.f32.vlgmr.msrb.gmra.mxu0 %v2246_v61  ;;  %493 = vmatmul.f32.vlgmr.msrb.gmra.mxu1 %v2246_v61 }
 0x4be   :  { %668 = vmatpush.msrb.mxu0 %v1815_v5  ;;  %697 = vmatpush.msrb.mxu1 %v1818_v6  ;;  %v455_v5 = vld [vmem:[#allocation2 + $0x68] sm:$0xff] }
 0x4c0   :  { %669 = vmatpush.msrb.mxu0 %v1820_v7  ;;  %698 = vmatpush.msrb.mxu1 %v1822_v8 }
 0x4c2   :  { %670 = vmatpush.msrb.mxu0 %v1826_v9  ;;  %699 = vmatpush.msrb.mxu1 %v1831_v11 }
 0x4c4   :  { %671 = vmatpush.msrb.mxu0 %v1836_v12  ;;  %700 = vmatpush.msrb.mxu1 %v1841_v14 }
 0x4c6   :  { %672 = vmatpush.msrb.mxu0 %v1846_v15  ;;  %701 = vmatpush.msrb.mxu1 %v1851_v17  ;;  %v2283_v15 = vld [vmem:[#allocation7 + $0xf8] sm:$0xff]  ;;  %v2286_v17 = vld [vmem:[#allocation7 + $0xe8] sm:$0xff] }
 0x4c8   :  { %673 = vmatpush.msrb.mxu0 %v1856_v18  ;;  %702 = vmatpush.msrb.mxu1 %v1861_v20  ;;  %v2289_v18 = vld [vmem:[#allocation7 + $0xd8] sm:$0xff]  ;;  %v2292_v20 = vld [vmem:[#allocation7 + $0xc8] sm:$0xff] }
 0x4ca   :  { %674 = vmatpush.msrb.mxu0 %v1866_v21  ;;  %703 = vmatpush.msrb.mxu1 %v1905_v30  ;;  %v2295_v21 = vld [vmem:[#allocation7 + $0xb8] sm:$0xff] }
 0x4cc   :  { %675 = vmatpush.msrb.mxu0 %v1907_v31  ;;  %704 = vmatpush.msrb.mxu1 %v1911_v32 }
 0x4ce   :  { %676 = vmatpush.msrb.mxu0 %v1913_v33  ;;  %705 = vmatpush.msrb.mxu1 %v1919_v34 }
 0x4d0   :  { %677 = vmatpush.msrb.mxu0 %v1921_v35  ;;  %706 = vmatpush.msrb.mxu1 %v1927_v36 }
 0x4d2   :  { %678 = vmatpush.msrb.mxu0 %v1929_v37  ;;  %707 = vmatpush.msrb.mxu1 %v1935_v38 }
 0x4d4   :  { %679 = vmatpush.msrb.mxu0 %v1937_v39  ;;  %708 = vmatpush.msrb.mxu1 %v1943_v40 }
 0x4d6   :  { %680 = vmatpush.msrb.mxu0 %v1945_v41  ;;  %709 = vmatpush.msrb.mxu1 %v1951_v42 }
 0x4d8   :  { %681 = vmatpush.msrb.mxu0 %v1953_v43  ;;  %710 = vmatpush.msrb.mxu1 %v1955_v44 }
 0x4da   :  { %682 = vmatpush.msrb.mxu0 %v1961_v45  ;;  %711 = vmatpush.msrb.mxu1 %v1963_v46 }
 0x4dc   :  { %683 = vmatpush.msrb.mxu0 %v1965_v47  ;;  %712 = vmatpush.msrb.mxu1 %v1975_v48 }
 0x53a   :  { %v494_v6 = vpop.f32.mrf.mxu1 }
 0x53b   :  { %v502_v7 = vadd.f32 %v494_v6, %v455_v5 }
 0x53d   :  { %v503_v8 = vmul.f32 0.5, %v502_v7 }
 0x53f   :  { %1468 = vtanh.f32 %v503_v8 }
 0x545   :  { %v1469_v9 = vpop.eup %1468 }
 0x546   :  { %v505_v11 = vmul.f32 0.5, %v1469_v9 }
 0x548   :  { %v506_v12 = vadd.f32 0.5, %v505_v11 }
 0x54a   :  { %v507_v14 = vmul.f32 %v506_v12, %v2246_v61 }
 0x54c   :  { %524 = vmatmul.f32.vlgmr.msrb.gmra.mxu2 %v507_v14 }
 0x54d   :  { %717 = vmatpush.msrb.mxu2 %v2283_v15 }
 0x54f   :  { %718 = vmatpush.msrb.mxu2 %v2286_v17 }
 0x551   :  { %719 = vmatpush.msrb.mxu2 %v2289_v18 }
 0x553   :  { %720 = vmatpush.msrb.mxu2 %v2292_v20 }
 0x555   :  { %721 = vmatpush.msrb.mxu2 %v2295_v21 }
 0x557   :  { %722 = vmatpush.msrb.mxu2 %v2298_v52 }
 0x559   :  { %723 = vmatpush.msrb.mxu2 %v1838_v13  ;;  %v474_v13 = vpop.f32.mrf.mxu0 }
 0x55a   :  { %v497_v54 = vadd.f32 %v474_v13, %v454_v53  ;;  %v2431_v13 = vld [vmem:[#allocation7 + $0x90] sm:$0xff] }
 0x55b   :  { %724 = vmatpush.msrb.mxu2 %v1848_v16 }
 0x55c   :  { %v498_v16 = vmul.f32 0.5, %v497_v54  ;;  %v2434_v54 = vld [vmem:[#allocation8 + $0x40] sm:$0xff] }
 0x55d   :  { %725 = vmatpush.msrb.mxu2 %v1858_v19  ;;  %v456_v19 = vld [vmem:[#allocation2 + $0x70] sm:$0xff] }
 0x55e   :  { %1470 = vtanh.f32 %v498_v16  ;;  %v2437_v16 = vld [vmem:[#allocation7 + $0x80] sm:$0xff] }
 0x55f   :  { %726 = vmatpush.msrb.mxu2 %v1868_v22 }
 0x561   :  { %727 = vmatpush.msrb.mxu2 %v1874_v23 }
 0x563   :  { %728 = vmatpush.msrb.mxu2 %v1879_v24 }
 0x564   :  { %v1471_v56 = vpop.eup %1470 }
 0x565   :  { %729 = vmatpush.msrb.mxu2 %v1882_v25  ;;  %v500_v23 = vmul.f32 0.5, %v1471_v56  ;;  %v2449_v56 = vld [vmem:[#allocation7 + $0x60] sm:$0xff] }
 0x567   :  { %730 = vmatpush.msrb.mxu2 %v1885_v26  ;;  %v501_v57 = vadd.f32 0.5, %v500_v23  ;;  %v2452_v23 = vld [vmem:[#allocation8 + $0x28] sm:$0xff] }
 0x569   :  { %731 = vmatpush.msrb.mxu2 %v1888_v27 }
 0x56b   :  { %732 = vmatpush.msrb.mxu2 %v1891_v28  ;;  %v2317_v28 = vld [vmem:[#allocation8 + $0x78] sm:$0xff] }
 0x5cf   :  { %v525_v29 = vpop.f32.mrf.mxu2 }
 0x5d0   :  { %v528_v22 = vadd.f32 %v525_v29, %v456_v19  ;;  %v2440_v19 = vld [vmem:[#allocation8 + $0x38] sm:$0xff]  ;;  %v2443_v29 = vld [vmem:[#allocation7 + $0x70] sm:$0xff] }
 0x5d2   :  { %1472 = vtanh.f32 %v528_v22  ;;  %v2446_v22 = vld [vmem:[#allocation8 + $0x30] sm:$0xff] }
 0x5d8   :  { %v1473_v24 = vpop.eup %1472 }
 0x5d9   :  { %v530_v25 = vsub.f32 %v1473_v24, %v2246_v61  ;;  %v2455_v24 = vld [vmem:[#allocation7 + $0x50] sm:$0xff] }
 0x5db   :  { %v531_v26 = vmul.f32 %v530_v25, %v501_v57  ;;  %v2458_v57 = vld [vmem:[#allocation8 + $0x20] sm:$0xff] }
 0x5dc   :  { %v2461_v25 = vld [vmem:[#allocation7 + $0x40] sm:$0xff] }
 0x5dd   :  { %v2313_v27 = vadd.f32 %v531_v26, %v2246_v61  ;;  %v536_v61 = vld [vmem:[#allocation2 + $0x88] sm:$0xff]  ;;  %v2464_v26 = vld [vmem:[#allocation8 + $0x18] sm:$0xff] }
 0x5df   :  { %553 = vmatmul.f32.vlgmr.msrb.gmra.mxu3 %v2313_v27  ;;  %573 = vmatmul.f32.vlgmr.msra.gmra.mxu0 %v2313_v27 }
 0x5e0   :  { %748 = vmatpush.msrb.mxu3 %v2317_v28  ;;  %777 = vmatpush.msra.mxu0 %v2320_v58 }
 0x5e2   :  { %749 = vmatpush.msrb.mxu3 %v2323_v59  ;;  %778 = vmatpush.msra.mxu0 %v2326_v0 }
 0x5e4   :  { %750 = vmatpush.msrb.mxu3 %v2329_v1  ;;  %779 = vmatpush.msra.mxu0 %v2332_v2 }
 0x5e6   :  { %751 = vmatpush.msrb.mxu3 %v2335_v3  ;;  %780 = vmatpush.msra.mxu0 %v2338_v4 }
 0x5e8   :  { %752 = vmatpush.msrb.mxu3 %v2341_v10  ;;  %781 = vmatpush.msra.mxu0 %v2344_v60 }
 0x5ea   :  { %753 = vmatpush.msrb.mxu3 %v2347_v55  ;;  %782 = vmatpush.msra.mxu0 %v2350_v62 }
 0x5ec   :  { %754 = vmatpush.msrb.mxu3 %v2353_v63  ;;  %783 = vmatpush.msra.mxu0 %v1905_v30  ;;  %v535_v30 = vld [vmem:[#allocation2 + $0x80] sm:$0xff] }
 0x5ee   :  { %755 = vmatpush.msrb.mxu3 %v1907_v31  ;;  %784 = vmatpush.msra.mxu0 %v1911_v32 }
 0x5f0   :  { %756 = vmatpush.msrb.mxu3 %v1913_v33  ;;  %785 = vmatpush.msra.mxu0 %v1919_v34 }
 0x5f2   :  { %757 = vmatpush.msrb.mxu3 %v1921_v35  ;;  %786 = vmatpush.msra.mxu0 %v1927_v36 }
 0x5f4   :  { %758 = vmatpush.msrb.mxu3 %v1929_v37  ;;  %787 = vmatpush.msra.mxu0 %v1935_v38  ;;  %v2382_v38 = vld [vmem:[#allocation7 + $0x98] sm:$0xff] }
 0x5f6   :  { %759 = vmatpush.msrb.mxu3 %v1937_v39  ;;  %788 = vmatpush.msra.mxu0 %v1943_v40  ;;  %v2385_v39 = vld [vmem:[#allocation7 + $0x88] sm:$0xff]  ;;  %v2388_v40 = vld [vmem:[#allocation7 + $0x78] sm:$0xff] }
 0x5f8   :  { %760 = vmatpush.msrb.mxu3 %v1945_v41  ;;  %789 = vmatpush.msra.mxu0 %v1951_v42  ;;  %v2391_v41 = vld [vmem:[#allocation7 + $0x68] sm:$0xff]  ;;  %v2394_v42 = vld [vmem:[#allocation7 + $0x58] sm:$0xff] }
 0x5fa   :  { %761 = vmatpush.msrb.mxu3 %v1953_v43  ;;  %790 = vmatpush.msra.mxu0 %v1955_v44  ;;  %v2397_v43 = vld [vmem:[#allocation7 + $0x48] sm:$0xff]  ;;  %v2400_v44 = vld [vmem:[#allocation7 + $0x38] sm:$0xff] }
 0x5fc   :  { %762 = vmatpush.msrb.mxu3 %v1961_v45  ;;  %791 = vmatpush.msra.mxu0 %v1963_v46  ;;  %v2403_v45 = vld [vmem:[#allocation7 + $0x28] sm:$0xff]  ;;  %v2406_v46 = vld [vmem:[#allocation7 + $0x18] sm:$0xff] }
 0x5fe   :  { %763 = vmatpush.msrb.mxu3 %v1965_v47  ;;  %792 = vmatpush.msra.mxu0 %v1975_v48  ;;  %v2409_v47 = vld [vmem:[#allocation7 + $0x8] sm:$0xff]  ;;  %v534_v48 = vld [vmem:[#allocation2 + $0x78] sm:$0xff] }
 0x65c   :  { %v574_v31 = vpop.f32.mrf.mxu0 }
 0x65d   :  { %v582_v32 = vadd.f32 %v574_v31, %v535_v30  ;;  %v2470_v30 = vld [vmem:[#allocation8 + $0x10] sm:$0xff]  ;;  %v2473_v31 = vld [vmem:[#allocation7 + $0x20] sm:$0xff] }
 0x65f   :  { %v583_v33 = vmul.f32 0.5, %v582_v32  ;;  %v2476_v32 = vld [vmem:[#allocation8 + $0x8] sm:$0xff] }
 0x661   :  { %1474 = vtanh.f32 %v583_v33  ;;  %v2479_v33 = vld [vmem:[#allocation7 + $0x10] sm:$0xff] }
 0x662   :  { %v554_v49 = vpop.f32.mrf.mxu3 }
 0x663   :  { %v577_v50 = vadd.f32 %v554_v49, %v534_v48 }
 0x665   :  { %v578_v51 = vmul.f32 0.5, %v577_v50 }
 0x667   :  { %v1475_v34 = vpop.eup %1474  ;;  %1476 = vtanh.f32 %v578_v51 }
 0x668   :  { %v585_v35 = vmul.f32 0.5, %v1475_v34  ;;  %v2482_v34 = vld [vmem:[#allocation8] sm:$0xff] }
 0x66a   :  { %v586_v36 = vadd.f32 0.5, %v585_v35  ;;  %v2485_v35 = vld [vmem:[#allocation7] sm:$0xff] }
 0x66c   :  { %v587_v37 = vmul.f32 %v586_v36, %v2313_v27  ;;  %v615_v36 = vld [vmem:[#allocation2 + $0x98] sm:$0xff] }
 0x66d   :  { %v1477_v7 = vpop.eup %1476 }
 0x66e   :  { %604 = vmatmul.f32.vlgmr.msra.gmra.mxu1 %v587_v37  ;;  %v580_v8 = vmul.f32 0.5, %v1477_v7 }
 0x66f   :  { %797 = vmatpush.msra.mxu1 %v2283_v15 }
 0x670   :  { %v581_v11 = vadd.f32 0.5, %v580_v8 }
 0x671   :  { %798 = vmatpush.msra.mxu1 %v2286_v17 }
 0x673   :  { %799 = vmatpush.msra.mxu1 %v2289_v18 }
 0x675   :  { %800 = vmatpush.msra.mxu1 %v2292_v20 }
 0x677   :  { %801 = vmatpush.msra.mxu1 %v2295_v21 }
 0x679   :  { %802 = vmatpush.msra.mxu1 %v2298_v52 }
 0x67b   :  { %803 = vmatpush.msra.mxu1 %v2382_v38 }
 0x67d   :  { %804 = vmatpush.msra.mxu1 %v2385_v39 }
 0x67f   :  { %805 = vmatpush.msra.mxu1 %v2388_v40 }
 0x681   :  { %806 = vmatpush.msra.mxu1 %v2391_v41 }
 0x683   :  { %807 = vmatpush.msra.mxu1 %v2394_v42 }
 0x685   :  { %808 = vmatpush.msra.mxu1 %v2397_v43 }
 0x687   :  { %809 = vmatpush.msra.mxu1 %v2400_v44 }
 0x689   :  { %810 = vmatpush.msra.mxu1 %v2403_v45 }
 0x68b   :  { %811 = vmatpush.msra.mxu1 %v2406_v46 }
 0x68d   :  { %812 = vmatpush.msra.mxu1 %v2409_v47 }
 0x6eb   :  { %v605_v5 = vpop.f32.mrf.mxu1 }
 0x6ec   :  { %v608_v6 = vadd.f32 %v605_v5, %v536_v61 }
 0x6ee   :  { %1478 = vtanh.f32 %v608_v6  ;;  %v614_v6 = vld [vmem:[#allocation2 + $0x90] sm:$0xff] }
 0x6f4   :  { %v1479_v9 = vpop.eup %1478 }
 0x6f5   :  { %v610_v12 = vsub.f32 %v1479_v9, %v2313_v27 }
 0x6f7   :  { %v611_v14 = vmul.f32 %v610_v12, %v581_v11  ;;  %v616_v11 = vld [vmem:[#allocation2 + $0xa0] sm:$0xff] }
 0x6f9   :  { %v2414_v53 = vadd.f32 %v611_v14, %v2313_v27  ;;  %v2467_v27 = vld [vmem:[#allocation7 + $0x30] sm:$0xff] }
 0x6fb   :  { %633 = vmatmul.f32.vlgmr.msra.gmra.mxu2 %v2414_v53  ;;  %653 = vmatmul.f32.vlgmr.msra.gmra.mxu3 %v2414_v53 }
 0x6fc   :  { %828 = vmatpush.msra.mxu2 %v2317_v28  ;;  %857 = vmatpush.msra.mxu3 %v2320_v58 }
 0x6fe   :  { %829 = vmatpush.msra.mxu2 %v2323_v59  ;;  %858 = vmatpush.msra.mxu3 %v2326_v0 }
 0x700   :  { %830 = vmatpush.msra.mxu2 %v2329_v1  ;;  %859 = vmatpush.msra.mxu3 %v2332_v2 }
 0x702   :  { %831 = vmatpush.msra.mxu2 %v2335_v3  ;;  %860 = vmatpush.msra.mxu3 %v2338_v4 }
 0x704   :  { %832 = vmatpush.msra.mxu2 %v2341_v10  ;;  %861 = vmatpush.msra.mxu3 %v2344_v60 }
 0x706   :  { %833 = vmatpush.msra.mxu2 %v2347_v55  ;;  %862 = vmatpush.msra.mxu3 %v2350_v62 }
 0x708   :  { %834 = vmatpush.msra.mxu2 %v2353_v63  ;;  %863 = vmatpush.msra.mxu3 %v2431_v13 }
 0x70a   :  { %835 = vmatpush.msra.mxu2 %v2434_v54  ;;  %864 = vmatpush.msra.mxu3 %v2437_v16 }
 0x70c   :  { %836 = vmatpush.msra.mxu2 %v2440_v19  ;;  %865 = vmatpush.msra.mxu3 %v2443_v29 }
 0x70e   :  { %837 = vmatpush.msra.mxu2 %v2446_v22  ;;  %866 = vmatpush.msra.mxu3 %v2449_v56 }
 0x710   :  { %838 = vmatpush.msra.mxu2 %v2452_v23  ;;  %867 = vmatpush.msra.mxu3 %v2455_v24 }
 0x712   :  { %839 = vmatpush.msra.mxu2 %v2458_v57  ;;  %868 = vmatpush.msra.mxu3 %v2461_v25 }
 0x714   :  { %840 = vmatpush.msra.mxu2 %v2464_v26  ;;  %869 = vmatpush.msra.mxu3 %v2467_v27 }
 0x716   :  { %841 = vmatpush.msra.mxu2 %v2470_v30  ;;  %870 = vmatpush.msra.mxu3 %v2473_v31 }
 0x718   :  { %842 = vmatpush.msra.mxu2 %v2476_v32  ;;  %871 = vmatpush.msra.mxu3 %v2479_v33 }
 0x71a   :  { %843 = vmatpush.msra.mxu2 %v2482_v34  ;;  %872 = vmatpush.msra.mxu3 %v2485_v35 }
 0x77e   :  { %v654_v37 = vpop.f32.mrf.mxu3  ;;  %v634_v7 = vpop.f32.mrf.mxu2 }
 0x77f   :  { %v662_v48 = vadd.f32 %v654_v37, %v615_v36  ;;  %v657_v8 = vadd.f32 %v634_v7, %v614_v6 }
 0x781   :  { %v663_v49 = vmul.f32 0.5, %v662_v48  ;;  %v658_v9 = vmul.f32 0.5, %v657_v8 }
 0x783   :  { %1480 = vtanh.f32 %v663_v49 }
 0x784   :  { %1482 = vtanh.f32 %v658_v9 }
 0x789   :  { %v1481_v50 = vpop.eup %1480 }
 0x78a   :  { %v665_v51 = vmul.f32 0.5, %v1481_v50  ;;  %v1483_v36 = vpop.eup %1482 }
 0x78b   :  { %v660_v37 = vmul.f32 0.5, %v1483_v36 }
 0x78c   :  { %v666_v61 = vadd.f32 0.5, %v665_v51 }
 0x78d   :  { %v661_v49 = vadd.f32 0.5, %v660_v37 }
 0x78e   :  { %v667_v5 = vmul.f32 %v666_v61, %v2414_v53 }
 0x790   :  { %684 = vmatmul.f32.vlgmr.msrb.gmra.mxu0 %v667_v5 }
 0x791   :  { %877 = vmatpush.msrb.mxu0 %v2283_v15 }
 0x793   :  { %878 = vmatpush.msrb.mxu0 %v2286_v17 }
 0x795   :  { %879 = vmatpush.msrb.mxu0 %v2289_v18 }
 0x797   :  { %880 = vmatpush.msrb.mxu0 %v2292_v20 }
 0x799   :  { %881 = vmatpush.msrb.mxu0 %v2295_v21 }
 0x79b   :  { %882 = vmatpush.msrb.mxu0 %v2298_v52 }
 0x79d   :  { %883 = vmatpush.msrb.mxu0 %v2382_v38 }
 0x79f   :  { %884 = vmatpush.msrb.mxu0 %v2385_v39 }
 0x7a1   :  { %885 = vmatpush.msrb.mxu0 %v2388_v40 }
 0x7a3   :  { %886 = vmatpush.msrb.mxu0 %v2391_v41 }
 0x7a5   :  { %887 = vmatpush.msrb.mxu0 %v2394_v42 }
 0x7a7   :  { %888 = vmatpush.msrb.mxu0 %v2397_v43 }
 0x7a9   :  { %889 = vmatpush.msrb.mxu0 %v2400_v44 }
 0x7ab   :  { %890 = vmatpush.msrb.mxu0 %v2403_v45 }
 0x7ad   :  { %891 = vmatpush.msrb.mxu0 %v2406_v46 }
 0x7af   :  { %892 = vmatpush.msrb.mxu0 %v2409_v47 }
 0x80d   :  { %v685_v12 = vpop.f32.mrf.mxu0 }
 0x80e   :  { %v688_v14 = vadd.f32 %v685_v12, %v616_v11 }
 0x810   :  { %1484 = vtanh.f32 %v688_v14  ;;  %v694_v14 = vld [vmem:[#allocation2 + $0xa8] sm:$0xff] }
 0x816   :  { %v1485_v48 = vpop.eup %1484 }
 0x817   :  { %v690_v50 = vsub.f32 %v1485_v48, %v2414_v53 }
 0x819   :  { %v691_v51 = vmul.f32 %v690_v50, %v661_v49  ;;  %v696_v49 = vld [vmem:[#allocation2 + $0xb8] sm:$0xff] }
 0x81b   :  { %v2507_v61 = vadd.f32 %v691_v51, %v2414_v53  ;;  %v695_v53 = vld [vmem:[#allocation2 + $0xb0] sm:$0xff] }
 0x81d   :  { %713 = vmatmul.f32.vlgmr.msrb.gmra.mxu1 %v2507_v61  ;;  %733 = vmatmul.f32.vlgmr.msrb.gmra.mxu2 %v2507_v61 }
 0x81e   :  { %908 = vmatpush.msrb.mxu1 %v2317_v28  ;;  %937 = vmatpush.msrb.mxu2 %v2320_v58 }
 0x820   :  { %909 = vmatpush.msrb.mxu1 %v2323_v59  ;;  %938 = vmatpush.msrb.mxu2 %v2326_v0 }
 0x822   :  { %910 = vmatpush.msrb.mxu1 %v2329_v1  ;;  %939 = vmatpush.msrb.mxu2 %v2332_v2 }
 0x824   :  { %911 = vmatpush.msrb.mxu1 %v2335_v3  ;;  %940 = vmatpush.msrb.mxu2 %v2338_v4 }
 0x826   :  { %912 = vmatpush.msrb.mxu1 %v2341_v10  ;;  %941 = vmatpush.msrb.mxu2 %v2344_v60 }
 0x828   :  { %913 = vmatpush.msrb.mxu1 %v2347_v55  ;;  %942 = vmatpush.msrb.mxu2 %v2350_v62 }
 0x82a   :  { %914 = vmatpush.msrb.mxu1 %v2353_v63  ;;  %943 = vmatpush.msrb.mxu2 %v2431_v13 }
 0x82c   :  { %915 = vmatpush.msrb.mxu1 %v2434_v54  ;;  %944 = vmatpush.msrb.mxu2 %v2437_v16 }
 0x82e   :  { %916 = vmatpush.msrb.mxu1 %v2440_v19  ;;  %945 = vmatpush.msrb.mxu2 %v2443_v29 }
 0x830   :  { %917 = vmatpush.msrb.mxu1 %v2446_v22  ;;  %946 = vmatpush.msrb.mxu2 %v2449_v56 }
 0x832   :  { %918 = vmatpush.msrb.mxu1 %v2452_v23  ;;  %947 = vmatpush.msrb.mxu2 %v2455_v24 }
 0x834   :  { %919 = vmatpush.msrb.mxu1 %v2458_v57  ;;  %948 = vmatpush.msrb.mxu2 %v2461_v25 }
 0x836   :  { %920 = vmatpush.msrb.mxu1 %v2464_v26  ;;  %949 = vmatpush.msrb.mxu2 %v2467_v27 }
 0x838   :  { %921 = vmatpush.msrb.mxu1 %v2470_v30  ;;  %950 = vmatpush.msrb.mxu2 %v2473_v31 }
 0x83a   :  { %922 = vmatpush.msrb.mxu1 %v2476_v32  ;;  %951 = vmatpush.msrb.mxu2 %v2479_v33 }
 0x83c   :  { %923 = vmatpush.msrb.mxu1 %v2482_v34  ;;  %952 = vmatpush.msrb.mxu2 %v2485_v35 }
 0x89a   :  { %v714_v36 = vpop.f32.mrf.mxu1 }
 0x89b   :  { %v737_v37 = vadd.f32 %v714_v36, %v694_v14 }
 0x89d   :  { %v738_v48 = vmul.f32 0.5, %v737_v37 }
 0x8a0   :  { %v734_v5 = vpop.f32.mrf.mxu2 }
 0x8a1   :  { %v742_v6 = vadd.f32 %v734_v5, %v695_v53 }
 0x8a3   :  { %v743_v7 = vmul.f32 0.5, %v742_v6 }
 0x8a5   :  { %1486 = vtanh.f32 %v743_v7 }
 0x8a6   :  { %1488 = vtanh.f32 %v738_v48 }
 0x8ab   :  { %v1487_v8 = vpop.eup %1486 }
 0x8ac   :  { %v745_v9 = vmul.f32 0.5, %v1487_v8  ;;  %v1489_v53 = vpop.eup %1488 }
 0x8ad   :  { %v740_v5 = vmul.f32 0.5, %v1489_v53 }
 0x8ae   :  { %v746_v11 = vadd.f32 0.5, %v745_v9 }
 0x8af   :  { %v741_v7 = vadd.f32 0.5, %v740_v5 }
 0x8b0   :  { %v747_v12 = vmul.f32 %v746_v11, %v2507_v61 }
 0x8b2   :  { %764 = vmatmul.f32.vlgmr.msrb.gmra.mxu3 %v747_v12 }
 0x8b3   :  { %957 = vmatpush.msrb.mxu3 %v2283_v15 }
 0x8b5   :  { %958 = vmatpush.msrb.mxu3 %v2286_v17 }
 0x8b7   :  { %959 = vmatpush.msrb.mxu3 %v2289_v18 }
 0x8b9   :  { %960 = vmatpush.msrb.mxu3 %v2292_v20 }
 0x8bb   :  { %961 = vmatpush.msrb.mxu3 %v2295_v21 }
 0x8bd   :  { %962 = vmatpush.msrb.mxu3 %v2298_v52 }
 0x8bf   :  { %963 = vmatpush.msrb.mxu3 %v2382_v38 }
 0x8c1   :  { %964 = vmatpush.msrb.mxu3 %v2385_v39 }
 0x8c3   :  { %965 = vmatpush.msrb.mxu3 %v2388_v40 }
 0x8c5   :  { %966 = vmatpush.msrb.mxu3 %v2391_v41 }
 0x8c7   :  { %967 = vmatpush.msrb.mxu3 %v2394_v42 }
 0x8c9   :  { %968 = vmatpush.msrb.mxu3 %v2397_v43 }
 0x8cb   :  { %969 = vmatpush.msrb.mxu3 %v2400_v44 }
 0x8cd   :  { %970 = vmatpush.msrb.mxu3 %v2403_v45 }
 0x8cf   :  { %971 = vmatpush.msrb.mxu3 %v2406_v46 }
 0x8d1   :  { %972 = vmatpush.msrb.mxu3 %v2409_v47 }
 0x935   :  { %v765_v50 = vpop.f32.mrf.mxu3 }
 0x936   :  { %v768_v51 = vadd.f32 %v765_v50, %v696_v49 }
 0x938   :  { %1490 = vtanh.f32 %v768_v51  ;;  %v774_v51 = vld [vmem:[#allocation2 + $0xc0] sm:$0xff] }
 0x93e   :  { %v1491_v6 = vpop.eup %1490 }
 0x93f   :  { %v770_v8 = vsub.f32 %v1491_v6, %v2507_v61 }
 0x941   :  { %v771_v9 = vmul.f32 %v770_v8, %v741_v7  ;;  %v776_v7 = vld [vmem:[#allocation2 + $0xd0] sm:$0xff] }
 0x943   :  { %v2562_v11 = vadd.f32 %v771_v9, %v2507_v61  ;;  %v775_v61 = vld [vmem:[#allocation2 + $0xc8] sm:$0xff] }
 0x945   :  { %793 = vmatmul.f32.vlgmr.msra.gmra.mxu0 %v2562_v11  ;;  %813 = vmatmul.f32.vlgmr.msra.gmra.mxu1 %v2562_v11 }
 0x946   :  { %988 = vmatpush.msra.mxu0 %v2317_v28  ;;  %1017 = vmatpush.msra.mxu1 %v2320_v58 }
 0x948   :  { %989 = vmatpush.msra.mxu0 %v2323_v59  ;;  %1018 = vmatpush.msra.mxu1 %v2326_v0 }
 0x94a   :  { %990 = vmatpush.msra.mxu0 %v2329_v1  ;;  %1019 = vmatpush.msra.mxu1 %v2332_v2 }
 0x94c   :  { %991 = vmatpush.msra.mxu0 %v2335_v3  ;;  %1020 = vmatpush.msra.mxu1 %v2338_v4 }
 0x94e   :  { %992 = vmatpush.msra.mxu0 %v2341_v10  ;;  %1021 = vmatpush.msra.mxu1 %v2344_v60 }
 0x950   :  { %993 = vmatpush.msra.mxu0 %v2347_v55  ;;  %1022 = vmatpush.msra.mxu1 %v2350_v62 }
 0x952   :  { %994 = vmatpush.msra.mxu0 %v2353_v63  ;;  %1023 = vmatpush.msra.mxu1 %v2431_v13 }
 0x954   :  { %995 = vmatpush.msra.mxu0 %v2434_v54  ;;  %1024 = vmatpush.msra.mxu1 %v2437_v16 }
 0x956   :  { %996 = vmatpush.msra.mxu0 %v2440_v19  ;;  %1025 = vmatpush.msra.mxu1 %v2443_v29 }
 0x958   :  { %997 = vmatpush.msra.mxu0 %v2446_v22  ;;  %1026 = vmatpush.msra.mxu1 %v2449_v56 }
 0x95a   :  { %998 = vmatpush.msra.mxu0 %v2452_v23  ;;  %1027 = vmatpush.msra.mxu1 %v2455_v24 }
 0x95c   :  { %999 = vmatpush.msra.mxu0 %v2458_v57  ;;  %1028 = vmatpush.msra.mxu1 %v2461_v25 }
 0x95e   :  { %1000 = vmatpush.msra.mxu0 %v2464_v26  ;;  %1029 = vmatpush.msra.mxu1 %v2467_v27 }
 0x960   :  { %1001 = vmatpush.msra.mxu0 %v2470_v30  ;;  %1030 = vmatpush.msra.mxu1 %v2473_v31 }
 0x962   :  { %1002 = vmatpush.msra.mxu0 %v2476_v32  ;;  %1031 = vmatpush.msra.mxu1 %v2479_v33 }
 0x964   :  { %1003 = vmatpush.msra.mxu0 %v2482_v34  ;;  %1032 = vmatpush.msra.mxu1 %v2485_v35 }
 0x9c2   :  { %v814_v12 = vpop.f32.mrf.mxu1  ;;  %v794_v53 = vpop.f32.mrf.mxu0 }
 0x9c3   :  { %v822_v14 = vadd.f32 %v814_v12, %v775_v61  ;;  %v817_v5 = vadd.f32 %v794_v53, %v774_v51 }
 0x9c5   :  { %v823_v36 = vmul.f32 0.5, %v822_v14  ;;  %v818_v6 = vmul.f32 0.5, %v817_v5 }
 0x9c7   :  { %1492 = vtanh.f32 %v823_v36 }
 0x9c8   :  { %1494 = vtanh.f32 %v818_v6 }
 0x9cd   :  { %v1493_v37 = vpop.eup %1492 }
 0x9ce   :  { %v825_v48 = vmul.f32 0.5, %v1493_v37  ;;  %v1495_v61 = vpop.eup %1494 }
 0x9cf   :  { %v820_v12 = vmul.f32 0.5, %v1495_v61 }
 0x9d0   :  { %v826_v49 = vadd.f32 0.5, %v825_v48 }
 0x9d1   :  { %v821_v36 = vadd.f32 0.5, %v820_v12 }
 0x9d2   :  { %v827_v50 = vmul.f32 %v826_v49, %v2562_v11 }
 0x9d4   :  { %844 = vmatmul.f32.vlgmr.msra.gmra.mxu2 %v827_v50 }
 0x9d5   :  { %1037 = vmatpush.msra.mxu2 %v2283_v15 }
 0x9d7   :  { %1038 = vmatpush.msra.mxu2 %v2286_v17 }
 0x9d9   :  { %1039 = vmatpush.msra.mxu2 %v2289_v18 }
 0x9db   :  { %1040 = vmatpush.msra.mxu2 %v2292_v20 }
 0x9dd   :  { %1041 = vmatpush.msra.mxu2 %v2295_v21 }
 0x9df   :  { %1042 = vmatpush.msra.mxu2 %v2298_v52 }
 0x9e1   :  { %1043 = vmatpush.msra.mxu2 %v2382_v38 }
 0x9e3   :  { %1044 = vmatpush.msra.mxu2 %v2385_v39 }
 0x9e5   :  { %1045 = vmatpush.msra.mxu2 %v2388_v40 }
 0x9e7   :  { %1046 = vmatpush.msra.mxu2 %v2391_v41 }
 0x9e9   :  { %1047 = vmatpush.msra.mxu2 %v2394_v42 }
 0x9eb   :  { %1048 = vmatpush.msra.mxu2 %v2397_v43 }
 0x9ed   :  { %1049 = vmatpush.msra.mxu2 %v2400_v44 }
 0x9ef   :  { %1050 = vmatpush.msra.mxu2 %v2403_v45 }
 0x9f1   :  { %1051 = vmatpush.msra.mxu2 %v2406_v46 }
 0x9f3   :  { %1052 = vmatpush.msra.mxu2 %v2409_v47 }
 0xa57   :  { %v845_v8 = vpop.f32.mrf.mxu2 }
 0xa58   :  { %v848_v9 = vadd.f32 %v845_v8, %v776_v7 }
 0xa5a   :  { %1496 = vtanh.f32 %v848_v9  ;;  %v854_v9 = vld [vmem:[#allocation2 + $0xd8] sm:$0xff] }
 0xa60   :  { %v1497_v14 = vpop.eup %1496 }
 0xa61   :  { %v850_v37 = vsub.f32 %v1497_v14, %v2562_v11 }
 0xa63   :  { %v851_v48 = vmul.f32 %v850_v37, %v821_v36  ;;  %v856_v36 = vld [vmem:[#allocation2 + $0xe8] sm:$0xff] }
 0xa65   :  { %v2617_v49 = vadd.f32 %v851_v48, %v2562_v11  ;;  %v855_v11 = vld [vmem:[#allocation2 + $0xe0] sm:$0xff] }
 0xa67   :  { %873 = vmatmul.f32.vlgmr.msra.gmra.mxu3 %v2617_v49  ;;  %893 = vmatmul.f32.vlgmr.msrb.gmra.mxu0 %v2617_v49 }
 0xa68   :  { %1068 = vmatpush.msra.mxu3 %v2317_v28  ;;  %1097 = vmatpush.msrb.mxu0 %v2320_v58 }
 0xa6a   :  { %1069 = vmatpush.msra.mxu3 %v2323_v59  ;;  %1098 = vmatpush.msrb.mxu0 %v2326_v0 }
 0xa6c   :  { %1070 = vmatpush.msra.mxu3 %v2329_v1  ;;  %1099 = vmatpush.msrb.mxu0 %v2332_v2 }
 0xa6e   :  { %1071 = vmatpush.msra.mxu3 %v2335_v3  ;;  %1100 = vmatpush.msrb.mxu0 %v2338_v4 }
 0xa70   :  { %1072 = vmatpush.msra.mxu3 %v2341_v10  ;;  %1101 = vmatpush.msrb.mxu0 %v2344_v60 }
 0xa72   :  { %1073 = vmatpush.msra.mxu3 %v2347_v55  ;;  %1102 = vmatpush.msrb.mxu0 %v2350_v62 }
 0xa74   :  { %1074 = vmatpush.msra.mxu3 %v2353_v63  ;;  %1103 = vmatpush.msrb.mxu0 %v2431_v13 }
 0xa76   :  { %1075 = vmatpush.msra.mxu3 %v2434_v54  ;;  %1104 = vmatpush.msrb.mxu0 %v2437_v16 }
 0xa78   :  { %1076 = vmatpush.msra.mxu3 %v2440_v19  ;;  %1105 = vmatpush.msrb.mxu0 %v2443_v29 }
 0xa7a   :  { %1077 = vmatpush.msra.mxu3 %v2446_v22  ;;  %1106 = vmatpush.msrb.mxu0 %v2449_v56 }
 0xa7c   :  { %1078 = vmatpush.msra.mxu3 %v2452_v23  ;;  %1107 = vmatpush.msrb.mxu0 %v2455_v24 }
 0xa7e   :  { %1079 = vmatpush.msra.mxu3 %v2458_v57  ;;  %1108 = vmatpush.msrb.mxu0 %v2461_v25 }
 0xa80   :  { %1080 = vmatpush.msra.mxu3 %v2464_v26  ;;  %1109 = vmatpush.msrb.mxu0 %v2467_v27 }
 0xa82   :  { %1081 = vmatpush.msra.mxu3 %v2470_v30  ;;  %1110 = vmatpush.msrb.mxu0 %v2473_v31 }
 0xa84   :  { %1082 = vmatpush.msra.mxu3 %v2476_v32  ;;  %1111 = vmatpush.msrb.mxu0 %v2479_v33 }
 0xa86   :  { %1083 = vmatpush.msra.mxu3 %v2482_v34  ;;  %1112 = vmatpush.msrb.mxu0 %v2485_v35 }
 0xae4   :  { %v894_v50 = vpop.f32.mrf.mxu0 }
 0xae5   :  { %v902_v51 = vadd.f32 %v894_v50, %v855_v11 }
 0xae7   :  { %v903_v53 = vmul.f32 0.5, %v902_v51 }
 0xae9   :  { %1498 = vtanh.f32 %v903_v53 }
 0xaea   :  { %v874_v61 = vpop.f32.mrf.mxu3 }
 0xaeb   :  { %v897_v12 = vadd.f32 %v874_v61, %v854_v9 }
 0xaed   :  { %v898_v14 = vmul.f32 0.5, %v897_v12 }
 0xaef   :  { %v1499_v5 = vpop.eup %1498  ;;  %1500 = vtanh.f32 %v898_v14 }
 0xaf0   :  { %v905_v6 = vmul.f32 0.5, %v1499_v5 }
 0xaf2   :  { %v906_v7 = vadd.f32 0.5, %v905_v6 }
 0xaf4   :  { %v907_v8 = vmul.f32 %v906_v7, %v2617_v49 }
 0xaf5   :  { %v1501_v11 = vpop.eup %1500 }
 0xaf6   :  { %924 = vmatmul.f32.vlgmr.msrb.gmra.mxu1 %v907_v8  ;;  %v900_v50 = vmul.f32 0.5, %v1501_v11 }
 0xaf7   :  { %1117 = vmatpush.msrb.mxu1 %v2283_v15 }
 0xaf8   :  { %v901_v53 = vadd.f32 0.5, %v900_v50 }
 0xaf9   :  { %1118 = vmatpush.msrb.mxu1 %v2286_v17 }
 0xafb   :  { %1119 = vmatpush.msrb.mxu1 %v2289_v18 }
 0xafd   :  { %1120 = vmatpush.msrb.mxu1 %v2292_v20 }
 0xaff   :  { %1121 = vmatpush.msrb.mxu1 %v2295_v21 }
 0xb01   :  { %1122 = vmatpush.msrb.mxu1 %v2298_v52 }
 0xb03   :  { %1123 = vmatpush.msrb.mxu1 %v2382_v38 }
 0xb05   :  { %1124 = vmatpush.msrb.mxu1 %v2385_v39 }
 0xb07   :  { %1125 = vmatpush.msrb.mxu1 %v2388_v40 }
 0xb09   :  { %1126 = vmatpush.msrb.mxu1 %v2391_v41 }
 0xb0b   :  { %1127 = vmatpush.msrb.mxu1 %v2394_v42 }
 0xb0d   :  { %1128 = vmatpush.msrb.mxu1 %v2397_v43 }
 0xb0f   :  { %1129 = vmatpush.msrb.mxu1 %v2400_v44 }
 0xb11   :  { %1130 = vmatpush.msrb.mxu1 %v2403_v45 }
 0xb13   :  { %1131 = vmatpush.msrb.mxu1 %v2406_v46 }
 0xb15   :  { %1132 = vmatpush.msrb.mxu1 %v2409_v47 }
 0xb73   :  { %v925_v37 = vpop.f32.mrf.mxu1 }
 0xb74   :  { %v928_v48 = vadd.f32 %v925_v37, %v856_v36 }
 0xb76   :  { %1502 = vtanh.f32 %v928_v48 }
 0xb7c   :  { %v1503_v51 = vpop.eup %1502 }
 0xb7d   :  { %v930_v5 = vsub.f32 %v1503_v51, %v2617_v49 }
 0xb7f   :  { %v931_v6 = vmul.f32 %v930_v5, %v901_v53 }
 0xb81   :  { %v2672_v7 = vadd.f32 %v931_v6, %v2617_v49  ;;  %v935_v49 = vld [vmem:[#allocation2 + $0xf8] sm:$0xff] }
 0xb83   :  { %953 = vmatmul.f32.vlgmr.msrb.gmra.mxu2 %v2672_v7  ;;  %973 = vmatmul.f32.vlgmr.msrb.gmra.mxu3 %v2672_v7 }
 0xb84   :  { %1148 = vmatpush.msrb.mxu2 %v2317_v28  ;;  %1177 = vmatpush.msrb.mxu3 %v2320_v58 }
 0xb86   :  { %1149 = vmatpush.msrb.mxu2 %v2323_v59  ;;  %1178 = vmatpush.msrb.mxu3 %v2326_v0 }
 0xb88   :  { %1150 = vmatpush.msrb.mxu2 %v2329_v1  ;;  %1179 = vmatpush.msrb.mxu3 %v2332_v2 }
 0xb8a   :  { %1151 = vmatpush.msrb.mxu2 %v2335_v3  ;;  %1180 = vmatpush.msrb.mxu3 %v2338_v4 }
 0xb8c   :  { %1152 = vmatpush.msrb.mxu2 %v2341_v10  ;;  %1181 = vmatpush.msrb.mxu3 %v2344_v60 }
 0xb8e   :  { %1153 = vmatpush.msrb.mxu2 %v2347_v55  ;;  %1182 = vmatpush.msrb.mxu3 %v2350_v62 }
 0xb90   :  { %1154 = vmatpush.msrb.mxu2 %v2353_v63  ;;  %1183 = vmatpush.msrb.mxu3 %v2431_v13 }
 0xb92   :  { %1155 = vmatpush.msrb.mxu2 %v2434_v54  ;;  %1184 = vmatpush.msrb.mxu3 %v2437_v16 }
 0xb94   :  { %1156 = vmatpush.msrb.mxu2 %v2440_v19  ;;  %1185 = vmatpush.msrb.mxu3 %v2443_v29 }
 0xb96   :  { %1157 = vmatpush.msrb.mxu2 %v2446_v22  ;;  %1186 = vmatpush.msrb.mxu3 %v2449_v56 }
 0xb98   :  { %1158 = vmatpush.msrb.mxu2 %v2452_v23  ;;  %1187 = vmatpush.msrb.mxu3 %v2455_v24 }
 0xb9a   :  { %1159 = vmatpush.msrb.mxu2 %v2458_v57  ;;  %1188 = vmatpush.msrb.mxu3 %v2461_v25 }
 0xb9c   :  { %1160 = vmatpush.msrb.mxu2 %v2464_v26  ;;  %1189 = vmatpush.msrb.mxu3 %v2467_v27 }
 0xb9e   :  { %1161 = vmatpush.msrb.mxu2 %v2470_v30  ;;  %1190 = vmatpush.msrb.mxu3 %v2473_v31 }
 0xba0   :  { %1162 = vmatpush.msrb.mxu2 %v2476_v32  ;;  %1191 = vmatpush.msrb.mxu3 %v2479_v33 }
 0xba2   :  { %1163 = vmatpush.msrb.mxu2 %v2482_v34  ;;  %1192 = vmatpush.msrb.mxu3 %v2485_v35 }
 0xc06   :  { %v974_v8 = vpop.f32.mrf.mxu3 }
 0xc07   :  { %v982_v9 = vadd.f32 %v974_v8, %v935_v49  ;;  %v1014_v8 = vld [vmem:[#allocation2 + $0x108] sm:$0xff] }
 0xc09   :  { %v983_v61 = vmul.f32 0.5, %v982_v9 }
 0xc0b   :  { %1504 = vtanh.f32 %v983_v61 }
 0xc11   :  { %v1505_v12 = vpop.eup %1504 }
 0xc12   :  { %v985_v14 = vmul.f32 0.5, %v1505_v12 }
 0xc14   :  { %v986_v36 = vadd.f32 0.5, %v985_v14 }
 0xc16   :  { %v987_v37 = vmul.f32 %v986_v36, %v2672_v7  ;;  %v1595_v36 = vld [vmem:[#allocation7 + $0xf0] sm:$0xff] }
 0xc18   :  { %1004 = vmatmul.f32.vlgmr.msra.gmra.mxu0 %v987_v37  ;;  %v2801_v37 = vld [vmem:[#allocation8 + $0x70] sm:$0xff] }
 0xc19   :  { %1197 = vmatpush.msra.mxu0 %v2283_v15  ;;  %v934_v15 = vld [vmem:[#allocation2 + $0xf0] sm:$0xff] }
 0xc1b   :  { %1198 = vmatpush.msra.mxu0 %v2286_v17  ;;  %v954_v17 = vpop.f32.mrf.mxu2 }
 0xc1d   :  { %1199 = vmatpush.msra.mxu0 %v2289_v18  ;;  %v977_v18 = vadd.f32 %v954_v17, %v934_v15  ;;  %v1597_v15 = vld [vmem:[#allocation7 + $0xe0] sm:$0xff]  ;;  %v2804_v17 = vld [vmem:[#allocation8 + $0x68] sm:$0xff] }
 0xc1f   :  { %1200 = vmatpush.msra.mxu0 %v2292_v20  ;;  %v978_v20 = vmul.f32 0.5, %v977_v18  ;;  %v1599_v18 = vld [vmem:[#allocation7 + $0xd0] sm:$0xff] }
 0xc21   :  { %1201 = vmatpush.msra.mxu0 %v2295_v21  ;;  %1506 = vtanh.f32 %v978_v20  ;;  %v936_v21 = vld [vmem:[#allocation2 + $0x100] sm:$0xff]  ;;  %v2807_v20 = vld [vmem:[#allocation8 + $0x60] sm:$0xff] }
 0xc23   :  { %1202 = vmatpush.msra.mxu0 %v2298_v52 }
 0xc25   :  { %1203 = vmatpush.msra.mxu0 %v2382_v38 }
 0xc27   :  { %1204 = vmatpush.msra.mxu0 %v2385_v39  ;;  %v1507_v11 = vpop.eup %1506 }
 0xc28   :  { %v980_v50 = vmul.f32 0.5, %v1507_v11  ;;  %v2813_v11 = vld [vmem:[#allocation8 + $0x50] sm:$0xff] }
 0xc29   :  { %1205 = vmatpush.msra.mxu0 %v2388_v40 }
 0xc2a   :  { %v981_v53 = vadd.f32 0.5, %v980_v50  ;;  %v1605_v50 = vld [vmem:[#allocation7 + $0xa0] sm:$0xff] }
 0xc2b   :  { %1206 = vmatpush.msra.mxu0 %v2391_v41 }
 0xc2d   :  { %1207 = vmatpush.msra.mxu0 %v2394_v42 }
 0xc2f   :  { %1208 = vmatpush.msra.mxu0 %v2397_v43 }
 0xc31   :  { %1209 = vmatpush.msra.mxu0 %v2400_v44 }
 0xc33   :  { %1210 = vmatpush.msra.mxu0 %v2403_v45 }
 0xc35   :  { %1211 = vmatpush.msra.mxu0 %v2406_v46 }
 0xc37   :  { %1212 = vmatpush.msra.mxu0 %v2409_v47 }
 0xc95   :  { %v1005_v52 = vpop.f32.mrf.mxu0 }
 0xc96   :  { %v1008_v48 = vadd.f32 %v1005_v52, %v936_v21  ;;  %v1601_v21 = vld [vmem:[#allocation7 + $0xc0] sm:$0xff]  ;;  %v2810_v52 = vld [vmem:[#allocation8 + $0x58] sm:$0xff] }
 0xc98   :  { %1508 = vtanh.f32 %v1008_v48  ;;  %v1603_v48 = vld [vmem:[#allocation7 + $0xb0] sm:$0xff] }
 0xc9e   :  { %v1509_v51 = vpop.eup %1508 }
 0xc9f   :  { %v1010_v5 = vsub.f32 %v1509_v51, %v2672_v7  ;;  %v2816_v51 = vld [vmem:[#allocation8 + $0x48] sm:$0xff] }
 0xca1   :  { %v1011_v6 = vmul.f32 %v1010_v5, %v981_v53 }
 0xca3   :  { %v2727_v49 = vadd.f32 %v1011_v6, %v2672_v7  ;;  %v2779_v7 = vld [vmem:[#allocation7 + $0xa8] sm:$0xff] }
 0xca5   :  { %1033 = vmatmul.f32.vlgmr.msra.gmra.mxu1 %v2727_v49  ;;  %1053 = vmatmul.f32.vlgmr.msra.gmra.mxu2 %v2727_v49 }
 0xca6   :  { %1228 = vmatpush.msra.mxu1 %v2317_v28  ;;  %1257 = vmatpush.msra.mxu2 %v2320_v58  ;;  %v1015_v28 = vld [vmem:[#allocation2 + $0x110] sm:$0xff] }
 0xca8   :  { %1229 = vmatpush.msra.mxu1 %v2323_v59  ;;  %1258 = vmatpush.msra.mxu2 %v2326_v0 }
 0xcaa   :  { %1230 = vmatpush.msra.mxu1 %v2329_v1  ;;  %1259 = vmatpush.msra.mxu2 %v2332_v2 }
 0xcac   :  { %1231 = vmatpush.msra.mxu1 %v2335_v3  ;;  %1260 = vmatpush.msra.mxu2 %v2338_v4 }
 0xcae   :  { %1232 = vmatpush.msra.mxu1 %v2341_v10  ;;  %1261 = vmatpush.msra.mxu2 %v2344_v60  ;;  %v2764_v10 = vld [vmem:[#allocation7 + $0xf8] sm:$0xff]  ;;  %v2767_v60 = vld [vmem:[#allocation7 + $0xe8] sm:$0xff] }
 0xcb0   :  { %1233 = vmatpush.msra.mxu1 %v2347_v55  ;;  %1262 = vmatpush.msra.mxu2 %v2350_v62  ;;  %v2770_v55 = vld [vmem:[#allocation7 + $0xd8] sm:$0xff]  ;;  %v2773_v62 = vld [vmem:[#allocation7 + $0xc8] sm:$0xff] }
 0xcb2   :  { %1234 = vmatpush.msra.mxu1 %v2353_v63  ;;  %1263 = vmatpush.msra.mxu2 %v2431_v13  ;;  %v2776_v63 = vld [vmem:[#allocation7 + $0xb8] sm:$0xff] }
 0xcb4   :  { %1235 = vmatpush.msra.mxu1 %v2434_v54  ;;  %1264 = vmatpush.msra.mxu2 %v2437_v16 }
 0xcb6   :  { %1236 = vmatpush.msra.mxu1 %v2440_v19  ;;  %1265 = vmatpush.msra.mxu2 %v2443_v29 }
 0xcb8   :  { %1237 = vmatpush.msra.mxu1 %v2446_v22  ;;  %1266 = vmatpush.msra.mxu2 %v2449_v56 }
 0xcba   :  { %1238 = vmatpush.msra.mxu1 %v2452_v23  ;;  %1267 = vmatpush.msra.mxu2 %v2455_v24 }
 0xcbc   :  { %1239 = vmatpush.msra.mxu1 %v2458_v57  ;;  %1268 = vmatpush.msra.mxu2 %v2461_v25 }
 0xcbe   :  { %1240 = vmatpush.msra.mxu1 %v2464_v26  ;;  %1269 = vmatpush.msra.mxu2 %v2467_v27 }
 0xcc0   :  { %1241 = vmatpush.msra.mxu1 %v2470_v30  ;;  %1270 = vmatpush.msra.mxu2 %v2473_v31 }
 0xcc2   :  { %1242 = vmatpush.msra.mxu1 %v2476_v32  ;;  %1271 = vmatpush.msra.mxu2 %v2479_v33 }
 0xcc4   :  { %1243 = vmatpush.msra.mxu1 %v2482_v34  ;;  %1272 = vmatpush.msra.mxu2 %v2485_v35 }
 0xd28   :  { %v1054_v58 = vpop.f32.mrf.mxu2 }
 0xd29   :  { %v1062_v59 = vadd.f32 %v1054_v58, %v1015_v28 }
 0xd2b   :  { %v1063_v0 = vmul.f32 0.5, %v1062_v59 }
 0xd2d   :  { %1510 = vtanh.f32 %v1063_v0 }
 0xd33   :  { %v1511_v1 = vpop.eup %1510 }
 0xd34   :  { %v1065_v2 = vmul.f32 0.5, %v1511_v1 }
 0xd36   :  { %v1066_v3 = vadd.f32 0.5, %v1065_v2 }
 0xd38   :  { %v1067_v4 = vmul.f32 %v1066_v3, %v2727_v49 }
 0xd3a   :  { %1084 = vmatmul.f32.vlgmr.msra.gmra.mxu3 %v1067_v4 }
 0xd3b   :  { %1277 = vmatpush.msra.mxu3 %v2764_v10 }
 0xd3d   :  { %1278 = vmatpush.msra.mxu3 %v2767_v60 }
 0xd3f   :  { %1279 = vmatpush.msra.mxu3 %v2770_v55 }
 0xd41   :  { %1280 = vmatpush.msra.mxu3 %v2773_v62 }
 0xd43   :  { %1281 = vmatpush.msra.mxu3 %v2776_v63 }
 0xd45   :  { %1282 = vmatpush.msra.mxu3 %v2779_v7 }
 0xd47   :  { %1283 = vmatpush.msra.mxu3 %v2382_v38  ;;  %v1034_v38 = vpop.f32.mrf.mxu1 }
 0xd48   :  { %v1057_v9 = vadd.f32 %v1034_v38, %v1014_v8  ;;  %v1622_v8 = vld [vmem:[#allocation8 + $0x18] sm:$0xff]  ;;  %v1623_v38 = vld [vmem:[#allocation8 + $0x10] sm:$0xff] }
 0xd49   :  { %1284 = vmatpush.msra.mxu3 %v2385_v39 }
 0xd4a   :  { %v1058_v39 = vmul.f32 0.5, %v1057_v9  ;;  %v1624_v9 = vld [vmem:[#allocation8 + $0x8] sm:$0xff] }
 0xd4b   :  { %1285 = vmatpush.msra.mxu3 %v2388_v40  ;;  %v1016_v40 = vld [vmem:[#allocation2 + $0x118] sm:$0xff] }
 0xd4c   :  { %1512 = vtanh.f32 %v1058_v39  ;;  %v1625_v39 = vld [vmem:[#allocation8] sm:$0xff] }
 0xd4d   :  { %1286 = vmatpush.msra.mxu3 %v2391_v41 }
 0xd4f   :  { %1287 = vmatpush.msra.mxu3 %v2394_v42 }
 0xd51   :  { %1288 = vmatpush.msra.mxu3 %v2397_v43 }
 0xd52   :  { %v1513_v12 = vpop.eup %1512 }
 0xd53   :  { %1289 = vmatpush.msra.mxu3 %v2400_v44  ;;  %v1060_v42 = vmul.f32 0.5, %v1513_v12 }
 0xd55   :  { %1290 = vmatpush.msra.mxu3 %v2403_v45  ;;  %v1061_v14 = vadd.f32 0.5, %v1060_v42 }
 0xd57   :  { %1291 = vmatpush.msra.mxu3 %v2406_v46 }
 0xd59   :  { %1292 = vmatpush.msra.mxu3 %v2409_v47  ;;  %v2798_v47 = vld [vmem:[#allocation8 + $0x78] sm:$0xff] }
 0xdbd   :  { %v1085_v61 = vpop.f32.mrf.mxu3 }
 0xdbe   :  { %v1088_v41 = vadd.f32 %v1085_v61, %v1016_v40  ;;  %v1175_v40 = vld [vmem:[#allocation2 + $0x140] sm:$0xff] }
 0xdc0   :  { %1514 = vtanh.f32 %v1088_v41 }
 0xdc6   :  { %v1515_v43 = vpop.eup %1514 }
 0xdc7   :  { %v1090_v44 = vsub.f32 %v1515_v43, %v2727_v49 }
 0xdc9   :  { %v1091_v45 = vmul.f32 %v1090_v44, %v1061_v14 }
 0xdcb   :  { %v2794_v46 = vadd.f32 %v1091_v45, %v2727_v49  ;;  %v1096_v49 = vld [vmem:[#allocation2 + $0x130] sm:$0xff]  ;;  %v1174_v45 = vld [vmem:[#allocation2 + $0x138] sm:$0xff] }
 0xdcd   :  { %1113 = vmatmul.f32.vlgmr.msrb.gmra.mxu0 %v2794_v46  ;;  %1133 = vmatmul.f32.vlgmr.msrb.gmra.mxu1 %v2794_v46 }
 0xdce   :  { %1308 = vmatpush.msrb.mxu0 %v2798_v47  ;;  %1337 = vmatpush.msrb.mxu1 %v1595_v36 }
 0xdd0   :  { %1309 = vmatpush.msrb.mxu0 %v2801_v37  ;;  %1338 = vmatpush.msrb.mxu1 %v1597_v15 }
 0xdd2   :  { %1310 = vmatpush.msrb.mxu0 %v2804_v17  ;;  %1339 = vmatpush.msrb.mxu1 %v1599_v18 }
 0xdd4   :  { %1311 = vmatpush.msrb.mxu0 %v2807_v20  ;;  %1340 = vmatpush.msrb.mxu1 %v1601_v21 }
 0xdd6   :  { %1312 = vmatpush.msrb.mxu0 %v2810_v52  ;;  %1341 = vmatpush.msrb.mxu1 %v1603_v48 }
 0xdd8   :  { %1313 = vmatpush.msrb.mxu0 %v2813_v11  ;;  %1342 = vmatpush.msrb.mxu1 %v1605_v50 }
 0xdda   :  { %1314 = vmatpush.msrb.mxu0 %v2816_v51  ;;  %1343 = vmatpush.msrb.mxu1 %v2431_v13  ;;  %v1095_v13 = vld [vmem:[#allocation2 + $0x128] sm:$0xff] }
 0xddc   :  { %1315 = vmatpush.msrb.mxu0 %v2434_v54  ;;  %1344 = vmatpush.msrb.mxu1 %v2437_v16 }
 0xdde   :  { %1316 = vmatpush.msrb.mxu0 %v2440_v19  ;;  %1345 = vmatpush.msrb.mxu1 %v2443_v29 }
 0xde0   :  { %1317 = vmatpush.msrb.mxu0 %v2446_v22  ;;  %1346 = vmatpush.msrb.mxu1 %v2449_v56 }
 0xde2   :  { %1318 = vmatpush.msrb.mxu0 %v2452_v23  ;;  %1347 = vmatpush.msrb.mxu1 %v2455_v24  ;;  %v1607_v24 = vld [vmem:[#allocation7 + $0x98] sm:$0xff] }
 0xde4   :  { %1319 = vmatpush.msrb.mxu0 %v2458_v57  ;;  %1348 = vmatpush.msrb.mxu1 %v2461_v25  ;;  %v1608_v57 = vld [vmem:[#allocation7 + $0x88] sm:$0xff]  ;;  %v1609_v25 = vld [vmem:[#allocation7 + $0x78] sm:$0xff] }
 0xde6   :  { %1320 = vmatpush.msrb.mxu0 %v2464_v26  ;;  %1349 = vmatpush.msrb.mxu1 %v2467_v27  ;;  %v1610_v26 = vld [vmem:[#allocation7 + $0x68] sm:$0xff]  ;;  %v1611_v27 = vld [vmem:[#allocation7 + $0x58] sm:$0xff] }
 0xde8   :  { %1321 = vmatpush.msrb.mxu0 %v2470_v30  ;;  %1350 = vmatpush.msrb.mxu1 %v2473_v31  ;;  %v1612_v30 = vld [vmem:[#allocation7 + $0x48] sm:$0xff]  ;;  %v1613_v31 = vld [vmem:[#allocation7 + $0x38] sm:$0xff] }
 0xdea   :  { %1322 = vmatpush.msrb.mxu0 %v2476_v32  ;;  %1351 = vmatpush.msrb.mxu1 %v2479_v33  ;;  %v1614_v32 = vld [vmem:[#allocation7 + $0x28] sm:$0xff]  ;;  %v1615_v33 = vld [vmem:[#allocation7 + $0x18] sm:$0xff] }
 0xdec   :  { %1323 = vmatpush.msrb.mxu0 %v2482_v34  ;;  %1352 = vmatpush.msrb.mxu1 %v2485_v35  ;;  %v1616_v34 = vld [vmem:[#allocation7 + $0x8] sm:$0xff]  ;;  %v1094_v35 = vld [vmem:[#allocation2 + $0x120] sm:$0xff] }
 0xe4a   :  { %v1134_v54 = vpop.f32.mrf.mxu1  ;;  %v1114_v53 = vpop.f32.mrf.mxu0 }
 0xe4b   :  { %v1142_v16 = vadd.f32 %v1134_v54, %v1095_v13  ;;  %v1137_v5 = vadd.f32 %v1114_v53, %v1094_v35 }
 0xe4d   :  { %v1143_v19 = vmul.f32 0.5, %v1142_v16  ;;  %v1138_v6 = vmul.f32 0.5, %v1137_v5 }
 0xe4f   :  { %1516 = vtanh.f32 %v1143_v19 }
 0xe50   :  { %1518 = vtanh.f32 %v1138_v6  ;;  %v1335_v6 = vld [vmem:[#allocation2 + $0x170] sm:$0xff] }
 0xe55   :  { %v1517_v29 = vpop.eup %1516 }
 0xe56   :  { %v1145_v22 = vmul.f32 0.5, %v1517_v29  ;;  %v1519_v59 = vpop.eup %1518 }
 0xe57   :  { %v1140_v0 = vmul.f32 0.5, %v1519_v59 }
 0xe58   :  { %v1146_v56 = vadd.f32 0.5, %v1145_v22 }
 0xe59   :  { %v1141_v2 = vadd.f32 0.5, %v1140_v0 }
 0xe5a   :  { %v1147_v23 = vmul.f32 %v1146_v56, %v2794_v46 }
 0xe5c   :  { %1164 = vmatmul.f32.vlgmr.msrb.gmra.mxu2 %v1147_v23  ;;  %v1254_v23 = vld [vmem:[#allocation2 + $0x150] sm:$0xff] }
 0xe5d   :  { %1357 = vmatpush.msrb.mxu2 %v2764_v10 }
 0xe5f   :  { %1358 = vmatpush.msrb.mxu2 %v2767_v60  ;;  %v1617_v60 = vld [vmem:[#allocation8 + $0x40] sm:$0xff] }
 0xe61   :  { %1359 = vmatpush.msrb.mxu2 %v2770_v55  ;;  %v1618_v55 = vld [vmem:[#allocation8 + $0x38] sm:$0xff] }
 0xe63   :  { %1360 = vmatpush.msrb.mxu2 %v2773_v62  ;;  %v1619_v62 = vld [vmem:[#allocation8 + $0x30] sm:$0xff] }
 0xe65   :  { %1361 = vmatpush.msrb.mxu2 %v2776_v63  ;;  %v1620_v63 = vld [vmem:[#allocation8 + $0x28] sm:$0xff] }
 0xe67   :  { %1362 = vmatpush.msrb.mxu2 %v2779_v7  ;;  %v1621_v7 = vld [vmem:[#allocation8 + $0x20] sm:$0xff] }
 0xe69   :  { %1363 = vmatpush.msrb.mxu2 %v1607_v24 }
 0xe6b   :  { %1364 = vmatpush.msrb.mxu2 %v1608_v57 }
 0xe6d   :  { %1365 = vmatpush.msrb.mxu2 %v1609_v25 }
 0xe6f   :  { %1366 = vmatpush.msrb.mxu2 %v1610_v26  ;;  %v1256_v26 = vld [vmem:[#allocation2 + $0x160] sm:$0xff] }
 0xe71   :  { %1367 = vmatpush.msrb.mxu2 %v1611_v27 }
 0xe73   :  { %1368 = vmatpush.msrb.mxu2 %v1612_v30 }
 0xe75   :  { %1369 = vmatpush.msrb.mxu2 %v1613_v31 }
 0xe77   :  { %1370 = vmatpush.msrb.mxu2 %v1614_v32 }
 0xe79   :  { %1371 = vmatpush.msrb.mxu2 %v1615_v33 }
 0xe7b   :  { %1372 = vmatpush.msrb.mxu2 %v1616_v34 }
 0xedf   :  { %v1165_v28 = vpop.f32.mrf.mxu2 }
 0xee0   :  { %v1168_v58 = vadd.f32 %v1165_v28, %v1096_v49 }
 0xee2   :  { %1520 = vtanh.f32 %v1168_v58 }
 0xee8   :  { %v1521_v1 = vpop.eup %1520 }
 0xee9   :  { %v1170_v3 = vsub.f32 %v1521_v1, %v2794_v46 }
 0xeeb   :  { %v1171_v4 = vmul.f32 %v1170_v3, %v1141_v2  ;;  %v1334_v3 = vld [vmem:[#allocation2 + $0x168] sm:$0xff] }
 0xeed   :  { %v1172_v10 = vadd.f32 %v1171_v4, %v2794_v46 }
 0xeef   :  { %1193 = vmatmul.f32.vlgmr.msrb.gmra.mxu3 %v1172_v10  ;;  %1213 = vmatmul.f32.vlgmr.msra.gmra.mxu0 %v1172_v10 }
 0xef0   :  { %1388 = vmatpush.msrb.mxu3 %v2798_v47 }
 0xef2   :  { %1389 = vmatpush.msrb.mxu3 %v2801_v37  ;;  %v1176_v37 = vld [vmem:[#allocation2 + $0x148] sm:$0xff] }
 0xef4   :  { %1390 = vmatpush.msrb.mxu3 %v2804_v17 }
 0xef6   :  { %1391 = vmatpush.msrb.mxu3 %v2807_v20 }
 0xef8   :  { %1392 = vmatpush.msrb.mxu3 %v2810_v52 }
 0xefa   :  { %1393 = vmatpush.msrb.mxu3 %v2813_v11 }
 0xefc   :  { %1394 = vmatpush.msrb.mxu3 %v2816_v51  ;;  %v1255_v51 = vld [vmem:[#allocation2 + $0x158] sm:$0xff] }
 0xefe   :  { %1395 = vmatpush.msrb.mxu3 %v1617_v60 }
 0xf00   :  { %1396 = vmatpush.msrb.mxu3 %v1618_v55  ;;  %v1336_v55 = vld [vmem:[#allocation2 + $0x178] sm:$0xff] }
 0xf02   :  { %1397 = vmatpush.msrb.mxu3 %v1619_v62 }
 0xf04   :  { %1398 = vmatpush.msrb.mxu3 %v1620_v63 }
 0xf06   :  { %1399 = vmatpush.msrb.mxu3 %v1621_v7 }
 0xf08   :  { %1400 = vmatpush.msrb.mxu3 %v1622_v8 }
 0xf0a   :  { %1401 = vmatpush.msrb.mxu3 %v1623_v38 }
 0xf0c   :  { %1402 = vmatpush.msrb.mxu3 %v1624_v9 }
 0xf0e   :  { %1403 = vmatpush.msrb.mxu3 %v1625_v39 }
 0xf6c   :  { %v1214_v61 = vpop.f32.mrf.mxu0 }
 0xf6d   :  { %v1222_v41 = vadd.f32 %v1214_v61, %v1175_v40 }
 0xf6f   :  { %v1223_v12 = vmul.f32 0.5, %v1222_v41 }
 0xf71   :  { %1522 = vtanh.f32 %v1223_v12 }
 0xf72   :  { %v1194_v46 = vpop.f32.mrf.mxu3 }
 0xf73   :  { %v1217_v47 = vadd.f32 %v1194_v46, %v1174_v45 }
 0xf75   :  { %v1218_v36 = vmul.f32 0.5, %v1217_v47 }
 0xf77   :  { %v1523_v42 = vpop.eup %1522  ;;  %1524 = vtanh.f32 %v1218_v36 }
 0xf78   :  { %v1225_v43 = vmul.f32 0.5, %v1523_v42 }
 0xf7a   :  { %v1226_v14 = vadd.f32 0.5, %v1225_v43 }
 0xf7c   :  { %v1227_v44 = vmul.f32 %v1226_v14, %v1172_v10 }
 0xf7d   :  { %v1525_v18 = vpop.eup %1524 }
 0xf7e   :  { %1244 = vmatmul.f32.vlgmr.msra.gmra.mxu1 %v1227_v44  ;;  %v1220_v20 = vmul.f32 0.5, %v1525_v18 }
 0xf80   :  { %v1221_v52 = vadd.f32 0.5, %v1220_v20 }
 0xffb   :  { %v1245_v15 = vpop.f32.mrf.mxu1 }
 0xffc   :  { %v1248_v17 = vadd.f32 %v1245_v15, %v1176_v37 }
 0xffe   :  { %1526 = vtanh.f32 %v1248_v17 }
0x1004   :  { %v1527_v21 = vpop.eup %1526 }
0x1005   :  { %v1250_v48 = vsub.f32 %v1527_v21, %v1172_v10 }
0x1007   :  { %v1251_v11 = vmul.f32 %v1250_v48, %v1221_v52 }
0x1009   :  { %v1252_v50 = vadd.f32 %v1251_v11, %v1172_v10 }
0x100b   :  { %1273 = vmatmul.f32.vlgmr.msra.gmra.mxu2 %v1252_v50  ;;  %1293 = vmatmul.f32.vlgmr.msra.gmra.mxu3 %v1252_v50 }
0x108e   :  { %v1294_v13 = vpop.f32.mrf.mxu3  ;;  %v1274_v24 = vpop.f32.mrf.mxu2 }
0x108f   :  { %v1302_v54 = vadd.f32 %v1294_v13, %v1255_v51  ;;  %v1297_v57 = vadd.f32 %v1274_v24, %v1254_v23 }
0x1091   :  { %v1303_v16 = vmul.f32 0.5, %v1302_v54  ;;  %v1298_v25 = vmul.f32 0.5, %v1297_v57 }
0x1093   :  { %1528 = vtanh.f32 %v1303_v16 }
0x1094   :  { %1530 = vtanh.f32 %v1298_v25 }
0x1099   :  { %v1529_v19 = vpop.eup %1528 }
0x109a   :  { %v1305_v29 = vmul.f32 0.5, %v1529_v19  ;;  %v1531_v31 = vpop.eup %1530 }
0x109b   :  { %v1300_v32 = vmul.f32 0.5, %v1531_v31 }
0x109c   :  { %v1306_v22 = vadd.f32 0.5, %v1305_v29 }
0x109d   :  { %v1301_v34 = vadd.f32 0.5, %v1300_v32 }
0x109e   :  { %v1307_v56 = vmul.f32 %v1306_v22, %v1252_v50 }
0x10a0   :  { %1324 = vmatmul.f32.vlgmr.msrb.gmra.mxu0 %v1307_v56 }
0x111d   :  { %v1325_v27 = vpop.f32.mrf.mxu0 }
0x111e   :  { %v1328_v30 = vadd.f32 %v1325_v27, %v1256_v26 }
0x1120   :  { %1532 = vtanh.f32 %v1328_v30 }
0x1126   :  { %v1533_v33 = vpop.eup %1532 }
0x1127   :  { %v1330_v35 = vsub.f32 %v1533_v33, %v1252_v50 }
0x1129   :  { %v1331_v53 = vmul.f32 %v1330_v35, %v1301_v34 }
0x112b   :  { %v1332_v5 = vadd.f32 %v1331_v53, %v1252_v50 }
0x112d   :  { %1353 = vmatmul.f32.vlgmr.msrb.gmra.mxu1 %v1332_v5  ;;  %1373 = vmatmul.f32.vlgmr.msrb.gmra.mxu2 %v1332_v5 }
0x11aa   :  { %v1354_v4 = vpop.f32.mrf.mxu1 }
0x11ab   :  { %v1377_v10 = vadd.f32 %v1354_v4, %v1334_v3 }
0x11ad   :  { %v1378_v60 = vmul.f32 0.5, %v1377_v10 }
0x11b0   :  { %v1374_v49 = vpop.f32.mrf.mxu2 }
0x11b1   :  { %v1382_v28 = vadd.f32 %v1374_v49, %v1335_v6 }
0x11b3   :  { %v1383_v58 = vmul.f32 0.5, %v1382_v28 }
0x11b5   :  { %1534 = vtanh.f32 %v1383_v58 }
0x11b6   :  { %1536 = vtanh.f32 %v1378_v60 }
0x11bb   :  { %v1535_v59 = vpop.eup %1534 }
0x11bc   :  { %v1385_v0 = vmul.f32 0.5, %v1535_v59  ;;  %v1537_v7 = vpop.eup %1536 }
0x11bd   :  { %v1380_v8 = vmul.f32 0.5, %v1537_v7 }
0x11be   :  { %v1386_v1 = vadd.f32 0.5, %v1385_v0 }
0x11bf   :  { %v1381_v9 = vadd.f32 0.5, %v1380_v8 }
0x11c0   :  { %v1387_v2 = vmul.f32 %v1386_v1, %v1332_v5 }
0x11c2   :  { %1404 = vmatmul.f32.vlgmr.msrb.gmra.mxu3 %v1387_v2 }
0x1245   :  { %v1405_v62 = vpop.f32.mrf.mxu3 }
0x1246   :  { %v1408_v63 = vadd.f32 %v1405_v62, %v1336_v55 }
0x1248   :  { %1538 = vtanh.f32 %v1408_v63 }
0x124e   :  { %v1539_v38 = vpop.eup %1538 }
0x124f   :  { %v1410_v39 = vsub.f32 %v1539_v38, %v1332_v5 }
0x1251   :  { %v1411_v40 = vmul.f32 %v1410_v39, %v1381_v9 }
0x1253   :  { %v1412_v61 = vadd.f32 %v1411_v40, %v1332_v5 }
0x1255   :  { %1413 = vst [vmem:[#allocation10] sm:$0xff] %v1412_v61 }
0x1256   :  { %1424 = dma.vmem_to_hbm [thread:$0]  %s1420_s3, 128, %s1422_s15, [#allocation4]  }
0x1257   :  { %1752 = dma.done.wait [#allocation4], 128  }
0x1258   :  { %1753 = vsyncadd [#allocation4], 4294967168 }
0x1259   :  { %1429 = vsyncpa [#allocation3], 1 }
0x125a   :  { %1430 = vsyncpa [#allocation6], 1 }
0x125b   :  { %1431 = vsyncpa [#allocation9], 1 }
0x125c   :  { %1432 = vsyncpa [#allocation4], 1 }

// kernel: tpu_custom_call.1
= control target key start
LH: loop header
LB: loop body
LE: loop exit
PB: predicated region body
PF: predicated region fallthrough
CT: control target
= control target key end

     0   :  { %9 = vsyncpa [#allocation3], 0  ;;  %s2857_s0 = inlined_call_operand.hbm [shape: f32[16,8,384], index: 0, kind: input, shape index: {}]   ;;  %s2858_s1 = inlined_call_operand.hbm [shape: f32[8,128], index: 1, kind: input, shape index: {}]   ;;  %s2859_s2 = inlined_call_operand.hbm [shape: f32[128,256], index: 2, kind: input, shape index: {}]   ;;  %s2860_s3 = inlined_call_operand.hbm [shape: f32[128,128], index: 3, kind: input, shape index: {}]   ;;  %s2861_s4 = inlined_call_operand.hbm [shape: f32[8,128], index: 4, kind: output, shape index: {}]  }
   0x1   :  { %10 = vsyncpa [#allocation6], 0 }
   0x2   :  { %11 = vsyncpa [#allocation9], 0  ;;  %s31_s17 = sshll.u32 %s2858_s1, 4  ;;  %s32_s17 = int_to_ptr.hbm [resolvable:$true] %s31_s17 }
   0x3   :  { %12 = vsyncpa [#allocation4], 0  ;;  %s1754_s18 = smov [#allocation5]   ;;  %s17_s22 = sshll.u32 %s2857_s0, 4  ;;  %s18_s22 = int_to_ptr.hbm [resolvable:$true] %s17_s22 }
   0x4   :  { %s33_s19 = sshll.u32 %s1754_s18, 4  ;;  %s1755_s23 = smov [#allocation2]   ;;  %s34_s19 = int_to_ptr.vmem [resolvable:$true] %s33_s19 }
   0x5   :  { %36 = dma.hbm_to_vmem [thread:$0]  %s32_s17, 128, %s34_s19, [#allocation6]  }
   0x6   :  { %s19_s24 = sshll.u32 %s1755_s23, 4  ;;  %s1756_s25 = smov 384   ;;  %s20_s24 = int_to_ptr.vmem [resolvable:$true] %s19_s24 }
   0x7   :  { %s1757_s26 = smov 24   ;;  %s41_s1 = sshll.u32 %s2859_s2, 4  ;;  %s42_s1 = int_to_ptr.hbm [resolvable:$true] %s41_s1 }
   0x8   :  { %25 = dma.hbm_to_vmem [thread:$0]  %s18_s22, 6144, %s20_s24, [#allocation3], %s1756_s25, %s1756_s25, %s1757_s26  }
   0x9   :  { %s1758_s29 = smov [#allocation7]   ;;  %s54_s0 = sshll.u32 %s2860_s3, 4  ;;  %s55_s0 = int_to_ptr.hbm [resolvable:$true] %s54_s0 }
   0xa   :  { %s43_s30 = sshll.u32 %s1758_s29, 4  ;;  %s1759_s7 = smov 256   ;;  %s44_s30 = int_to_ptr.vmem [resolvable:$true] %s43_s30 }
   0xb   :  { %s1760_s8 = smov 16   ;;  %s1761_s9 = smov [#allocation8]  }
   0xc   :  { %49 = dma.hbm_to_vmem [thread:$0]  %s42_s1, 4096, %s44_s30, [#allocation6], %s1759_s7, %s1759_s7, %s1760_s8  }
   0xd   :  { %s56_s10 = sshll.u32 %s1761_s9, 4  ;;  %s1762_s11 = smov 128   ;;  %s57_s10 = int_to_ptr.vmem [resolvable:$true] %s56_s10 }
   0xe   :  { %s1763_s12 = smov 8  }
   0xf   :  { %62 = dma.hbm_to_vmem [thread:$0]  %s55_s0, 2048, %s57_s10, [#allocation9], %s1762_s11, %s1762_s11, %s1763_s12  }
  0x10   :  { %1746 = dma.done.wait [#allocation3], 6144  }
  0x11   :  { %1747 = vsyncadd [#allocation3], 4294961152 }
  0x12   :  { %1748 = dma.done.wait [#allocation6], 4224  }
  0x13   :  { %1749 = vsyncadd [#allocation6], 4294963072 }
  0x14   :  { %1750 = dma.done.wait [#allocation9], 2048  }
  0x15   :  { %1751 = vsyncadd [#allocation9], 4294965248  ;;  %v1802_v0 = vld [vmem:[#allocation7 + $0xf8] sm:$0xff]  ;;  %v1804_v1 = vld [vmem:[#allocation7 + $0xe8] sm:$0xff]  ;;  %s1764_s2 = smov [#allocation10]   ;;  %s1421_s15 = sshll.u32 %s2861_s4, 4  ;;  %s1422_s15 = int_to_ptr.hbm [resolvable:$true] %s1421_s15 }
  0x16   :  { %157 = vmatpush.msra.mxu1 %v1802_v0  ;;  %v1807_v2 = vld [vmem:[#allocation7 + $0xd8] sm:$0xff]  ;;  %v1810_v3 = vld [vmem:[#allocation7 + $0xc8] sm:$0xff]  ;;  %v1818_v6 = vld [vmem:[#allocation7 + $0xf0] sm:$0xff]  ;;  %s1419_s3 = sshll.u32 %s1764_s2, 4  ;;  %s1420_s3 = int_to_ptr.vmem [resolvable:$true] %s1419_s3 }
  0x17   :  { %v1813_v4 = vld [vmem:[#allocation7 + $0xb8] sm:$0xff]  ;;  %v1820_v7 = vld [vmem:[#allocation8 + $0x70] sm:$0xff]  ;;  %v1822_v8 = vld [vmem:[#allocation7 + $0xe0] sm:$0xff]  ;;  %137 = vmatpush.msra.mxu0 %v1818_v6  ;;  %217 = vmatpush.msra.mxu3 %v1818_v6 }
  0x18   :  { %158 = vmatpush.msra.mxu1 %v1804_v1  ;;  %v1815_v5 = vld [vmem:[#allocation8 + $0x78] sm:$0xff]  ;;  %v1826_v9 = vld [vmem:[#allocation8 + $0x68] sm:$0xff]  ;;  %v1831_v11 = vld [vmem:[#allocation7 + $0xd0] sm:$0xff] }
  0x19   :  { %188 = vmatpush.msra.mxu2 %v1815_v5  ;;  %v1828_v10 = vld [vmem:[#allocation7 + $0xa8] sm:$0xff]  ;;  %138 = vmatpush.msra.mxu0 %v1822_v8  ;;  %v1836_v12 = vld [vmem:[#allocation8 + $0x60] sm:$0xff]  ;;  %v1838_v13 = vld [vmem:[#allocation7 + $0x98] sm:$0xff] }
  0x1a   :  { %159 = vmatpush.msra.mxu1 %v1807_v2  ;;  %v1841_v14 = vld [vmem:[#allocation7 + $0xc0] sm:$0xff]  ;;  %218 = vmatpush.msra.mxu3 %v1822_v8  ;;  %v1846_v15 = vld [vmem:[#allocation8 + $0x58] sm:$0xff]  ;;  %v1848_v16 = vld [vmem:[#allocation7 + $0x88] sm:$0xff] }
  0x1b   :  { %189 = vmatpush.msra.mxu2 %v1820_v7  ;;  %139 = vmatpush.msra.mxu0 %v1831_v11  ;;  %v1851_v17 = vld [vmem:[#allocation7 + $0xb0] sm:$0xff]  ;;  %v1858_v19 = vld [vmem:[#allocation7 + $0x78] sm:$0xff]  ;;  %v1861_v20 = vld [vmem:[#allocation7 + $0xa0] sm:$0xff] }
  0x1c   :  { %160 = vmatpush.msra.mxu1 %v1810_v3  ;;  %219 = vmatpush.msra.mxu3 %v1831_v11  ;;  %v1856_v18 = vld [vmem:[#allocation8 + $0x50] sm:$0xff]  ;;  %v1866_v21 = vld [vmem:[#allocation8 + $0x48] sm:$0xff]  ;;  %v1874_v23 = vld [vmem:[#allocation7 + $0x58] sm:$0xff] }
  0x1d   :  { %190 = vmatpush.msra.mxu2 %v1826_v9  ;;  %140 = vmatpush.msra.mxu0 %v1841_v14  ;;  %v1868_v22 = vld [vmem:[#allocation7 + $0x68] sm:$0xff]  ;;  %v1882_v25 = vld [vmem:[#allocation7 + $0x38] sm:$0xff]  ;;  %v1905_v30 = vld [vmem:[#allocation7 + $0x90] sm:$0xff] }
  0x1e   :  { %161 = vmatpush.msra.mxu1 %v1813_v4  ;;  %220 = vmatpush.msra.mxu3 %v1841_v14  ;;  %v1879_v24 = vld [vmem:[#allocation7 + $0x48] sm:$0xff]  ;;  %v1888_v27 = vld [vmem:[#allocation7 + $0x18] sm:$0xff]  ;;  %v1907_v31 = vld [vmem:[#allocation8 + $0x40] sm:$0xff] }
  0x1f   :  { %191 = vmatpush.msra.mxu2 %v1836_v12  ;;  %141 = vmatpush.msra.mxu0 %v1851_v17  ;;  %v1885_v26 = vld [vmem:[#allocation7 + $0x28] sm:$0xff]  ;;  %v1894_v29 = vld [vmem:[#allocation5] sm:$0xff]  ;;  %v1911_v32 = vld [vmem:[#allocation7 + $0x80] sm:$0xff] }
  0x20   :  { %162 = vmatpush.msra.mxu1 %v1828_v10  ;;  %221 = vmatpush.msra.mxu3 %v1851_v17  ;;  %v1891_v28 = vld [vmem:[#allocation7 + $0x8] sm:$0xff]  ;;  %v1913_v33 = vld [vmem:[#allocation8 + $0x38] sm:$0xff]  ;;  %v1919_v34 = vld [vmem:[#allocation7 + $0x70] sm:$0xff] }
  0x21   :  { %192 = vmatpush.msra.mxu2 %v1846_v15  ;;  %142 = vmatpush.msra.mxu0 %v1861_v20  ;;  %v1921_v35 = vld [vmem:[#allocation8 + $0x30] sm:$0xff]  ;;  %v1927_v36 = vld [vmem:[#allocation7 + $0x60] sm:$0xff]  ;;  %v1929_v37 = vld [vmem:[#allocation8 + $0x28] sm:$0xff] }
  0x22   :  { %163 = vmatpush.msra.mxu1 %v1838_v13  ;;  %222 = vmatpush.msra.mxu3 %v1861_v20  ;;  %v1935_v38 = vld [vmem:[#allocation7 + $0x50] sm:$0xff]  ;;  %v1937_v39 = vld [vmem:[#allocation8 + $0x20] sm:$0xff]  ;;  %v1945_v41 = vld [vmem:[#allocation8 + $0x18] sm:$0xff] }
  0x23   :  { %193 = vmatpush.msra.mxu2 %v1856_v18  ;;  %143 = vmatpush.msra.mxu0 %v1905_v30  ;;  %v1943_v40 = vld [vmem:[#allocation7 + $0x40] sm:$0xff]  ;;  %v1951_v42 = vld [vmem:[#allocation7 + $0x30] sm:$0xff]  ;;  %v1961_v45 = vld [vmem:[#allocation8 + $0x8] sm:$0xff] }
  0x24   :  { %164 = vmatpush.msra.mxu1 %v1848_v16  ;;  %223 = vmatpush.msra.mxu3 %v1905_v30  ;;  %v1953_v43 = vld [vmem:[#allocation8 + $0x10] sm:$0xff]  ;;  %v1955_v44 = vld [vmem:[#allocation7 + $0x20] sm:$0xff]  ;;  %v134_v57 = vld [vmem:[#allocation2] sm:$0xff] }
  0x25   :  { %194 = vmatpush.msra.mxu2 %v1866_v21  ;;  %144 = vmatpush.msra.mxu0 %v1911_v32  ;;  %v1963_v46 = vld [vmem:[#allocation7 + $0x10] sm:$0xff]  ;;  %v1965_v47 = vld [vmem:[#allocation8] sm:$0xff]  ;;  %v136_v61 = vld [vmem:[#allocation2 + $0x10] sm:$0xff] }
  0x26   :  { %165 = vmatpush.msra.mxu1 %v1858_v19  ;;  %224 = vmatpush.msra.mxu3 %v1911_v32  ;;  %v1975_v48 = vld [vmem:[#allocation7] sm:$0xff] }
  0x27   :  { %195 = vmatpush.msra.mxu2 %v1907_v31  ;;  %145 = vmatpush.msra.mxu0 %v1919_v34  ;;  %v135_v49 = vld [vmem:[#allocation2 + $0x8] sm:$0xff] }
  0x28   :  { %166 = vmatpush.msra.mxu1 %v1868_v22  ;;  %225 = vmatpush.msra.mxu3 %v1919_v34 }
  0x29   :  { %196 = vmatpush.msra.mxu2 %v1913_v33  ;;  %146 = vmatpush.msra.mxu0 %v1927_v36 }
  0x2a   :  { %167 = vmatpush.msra.mxu1 %v1874_v23  ;;  %226 = vmatpush.msra.mxu3 %v1927_v36 }
  0x2b   :  { %197 = vmatpush.msra.mxu2 %v1921_v35  ;;  %147 = vmatpush.msra.mxu0 %v1935_v38 }
  0x2c   :  { %168 = vmatpush.msra.mxu1 %v1879_v24  ;;  %227 = vmatpush.msra.mxu3 %v1935_v38 }
  0x2d   :  { %198 = vmatpush.msra.mxu2 %v1929_v37  ;;  %148 = vmatpush.msra.mxu0 %v1943_v40 }
  0x2e   :  { %169 = vmatpush.msra.mxu1 %v1882_v25  ;;  %228 = vmatpush.msra.mxu3 %v1943_v40 }
  0x2f   :  { %199 = vmatpush.msra.mxu2 %v1937_v39  ;;  %149 = vmatpush.msra.mxu0 %v1951_v42 }
  0x30   :  { %170 = vmatpush.msra.mxu1 %v1885_v26  ;;  %229 = vmatpush.msra.mxu3 %v1951_v42 }
  0x31   :  { %200 = vmatpush.msra.mxu2 %v1945_v41  ;;  %150 = vmatpush.msra.mxu0 %v1955_v44 }
  0x32   :  { %171 = vmatpush.msra.mxu1 %v1888_v27  ;;  %230 = vmatpush.msra.mxu3 %v1955_v44 }
  0x33   :  { %201 = vmatpush.msra.mxu2 %v1953_v43  ;;  %151 = vmatpush.msra.mxu0 %v1963_v46 }
  0x34   :  { %172 = vmatpush.msra.mxu1 %v1891_v28  ;;  %231 = vmatpush.msra.mxu3 %v1963_v46 }
  0x35   :  { %173 = vmatmul.f32.vlgmr.msra.gmra.mxu1 %v1894_v29  ;;  %202 = vmatpush.msra.mxu2 %v1961_v45 }
  0x36   :  { %268 = vmatpush.msrb.mxu1 %v1815_v5  ;;  %152 = vmatpush.msra.mxu0 %v1975_v48 }
  0x37   :  { %203 = vmatpush.msra.mxu2 %v1965_v47  ;;  %153 = vmatmul.f32.vlgmr.msra.gmra.mxu0 %v1894_v29 }
  0x38   :  { %269 = vmatpush.msrb.mxu1 %v1820_v7  ;;  %232 = vmatpush.msra.mxu3 %v1975_v48 }
  0x39   :  { %297 = vmatpush.msrb.mxu2 %v1818_v6  ;;  %237 = vmatpush.msrb.mxu0 %v1802_v0 }
  0x3a   :  { %270 = vmatpush.msrb.mxu1 %v1826_v9  ;;  %317 = vmatpush.msrb.mxu3 %v1802_v0 }
  0x3b   :  { %298 = vmatpush.msrb.mxu2 %v1822_v8  ;;  %238 = vmatpush.msrb.mxu0 %v1804_v1 }
  0x3c   :  { %271 = vmatpush.msrb.mxu1 %v1836_v12  ;;  %318 = vmatpush.msrb.mxu3 %v1804_v1 }
  0x3d   :  { %299 = vmatpush.msrb.mxu2 %v1831_v11  ;;  %239 = vmatpush.msrb.mxu0 %v1807_v2 }
  0x3e   :  { %272 = vmatpush.msrb.mxu1 %v1846_v15  ;;  %319 = vmatpush.msrb.mxu3 %v1807_v2 }
  0x3f   :  { %300 = vmatpush.msrb.mxu2 %v1841_v14  ;;  %240 = vmatpush.msrb.mxu0 %v1810_v3 }
  0x40   :  { %273 = vmatpush.msrb.mxu1 %v1856_v18  ;;  %320 = vmatpush.msrb.mxu3 %v1810_v3 }
  0x41   :  { %301 = vmatpush.msrb.mxu2 %v1851_v17  ;;  %241 = vmatpush.msrb.mxu0 %v1813_v4 }
  0x42   :  { %274 = vmatpush.msrb.mxu1 %v1866_v21  ;;  %321 = vmatpush.msrb.mxu3 %v1813_v4 }
  0x43   :  { %302 = vmatpush.msrb.mxu2 %v1861_v20  ;;  %242 = vmatpush.msrb.mxu0 %v1828_v10 }
  0x44   :  { %275 = vmatpush.msrb.mxu1 %v1907_v31  ;;  %322 = vmatpush.msrb.mxu3 %v1828_v10 }
  0x45   :  { %303 = vmatpush.msrb.mxu2 %v1905_v30  ;;  %243 = vmatpush.msrb.mxu0 %v1838_v13 }
  0x46   :  { %276 = vmatpush.msrb.mxu1 %v1913_v33  ;;  %323 = vmatpush.msrb.mxu3 %v1838_v13 }
  0x47   :  { %304 = vmatpush.msrb.mxu2 %v1911_v32  ;;  %244 = vmatpush.msrb.mxu0 %v1848_v16 }
  0x48   :  { %277 = vmatpush.msrb.mxu1 %v1921_v35  ;;  %324 = vmatpush.msrb.mxu3 %v1848_v16 }
  0x49   :  { %305 = vmatpush.msrb.mxu2 %v1919_v34  ;;  %245 = vmatpush.msrb.mxu0 %v1858_v19 }
  0x4a   :  { %278 = vmatpush.msrb.mxu1 %v1929_v37  ;;  %325 = vmatpush.msrb.mxu3 %v1858_v19 }
  0x4b   :  { %306 = vmatpush.msrb.mxu2 %v1927_v36  ;;  %246 = vmatpush.msrb.mxu0 %v1868_v22 }
  0x4c   :  { %279 = vmatpush.msrb.mxu1 %v1937_v39  ;;  %326 = vmatpush.msrb.mxu3 %v1868_v22 }
  0x4d   :  { %307 = vmatpush.msrb.mxu2 %v1935_v38  ;;  %247 = vmatpush.msrb.mxu0 %v1874_v23 }
  0x4e   :  { %280 = vmatpush.msrb.mxu1 %v1945_v41  ;;  %327 = vmatpush.msrb.mxu3 %v1874_v23 }
  0x4f   :  { %308 = vmatpush.msrb.mxu2 %v1943_v40  ;;  %248 = vmatpush.msrb.mxu0 %v1879_v24 }
  0x50   :  { %281 = vmatpush.msrb.mxu1 %v1953_v43  ;;  %328 = vmatpush.msrb.mxu3 %v1879_v24 }
  0x51   :  { %309 = vmatpush.msrb.mxu2 %v1951_v42  ;;  %249 = vmatpush.msrb.mxu0 %v1882_v25 }
  0x52   :  { %282 = vmatpush.msrb.mxu1 %v1961_v45  ;;  %329 = vmatpush.msrb.mxu3 %v1882_v25 }
  0x53   :  { %310 = vmatpush.msrb.mxu2 %v1955_v44  ;;  %250 = vmatpush.msrb.mxu0 %v1885_v26 }
  0x54   :  { %283 = vmatpush.msrb.mxu1 %v1965_v47  ;;  %330 = vmatpush.msrb.mxu3 %v1885_v26 }
  0x55   :  { %311 = vmatpush.msrb.mxu2 %v1963_v46  ;;  %251 = vmatpush.msrb.mxu0 %v1888_v27 }
  0x56   :  { %377 = vmatpush.msra.mxu1 %v1818_v6  ;;  %331 = vmatpush.msrb.mxu3 %v1888_v27 }
  0x57   :  { %252 = vmatpush.msrb.mxu0 %v1891_v28  ;;  %312 = vmatpush.msrb.mxu2 %v1975_v48 }
  0x58   :  { %378 = vmatpush.msra.mxu1 %v1822_v8  ;;  %332 = vmatpush.msrb.mxu3 %v1891_v28 }
  0x59   :  { %348 = vmatpush.msra.mxu0 %v1815_v5 }
  0x5a   :  { %379 = vmatpush.msra.mxu1 %v1831_v11 }
  0x5b   :  { %349 = vmatpush.msra.mxu0 %v1820_v7 }
  0x5c   :  { %380 = vmatpush.msra.mxu1 %v1841_v14 }
  0x5d   :  { %350 = vmatpush.msra.mxu0 %v1826_v9 }
  0x5e   :  { %381 = vmatpush.msra.mxu1 %v1851_v17 }
  0x5f   :  { %351 = vmatpush.msra.mxu0 %v1836_v12 }
  0x60   :  { %382 = vmatpush.msra.mxu1 %v1861_v20 }
  0x61   :  { %352 = vmatpush.msra.mxu0 %v1846_v15 }
  0x62   :  { %383 = vmatpush.msra.mxu1 %v1905_v30 }
  0x63   :  { %353 = vmatpush.msra.mxu0 %v1856_v18 }
  0x64   :  { %384 = vmatpush.msra.mxu1 %v1911_v32 }
  0x65   :  { %354 = vmatpush.msra.mxu0 %v1866_v21 }
  0x66   :  { %385 = vmatpush.msra.mxu1 %v1919_v34 }
  0x67   :  { %355 = vmatpush.msra.mxu0 %v1907_v31 }
  0x68   :  { %386 = vmatpush.msra.mxu1 %v1927_v36 }
  0x69   :  { %356 = vmatpush.msra.mxu0 %v1913_v33 }
  0x6a   :  { %387 = vmatpush.msra.mxu1 %v1935_v38 }
  0x6b   :  { %357 = vmatpush.msra.mxu0 %v1921_v35 }
  0x6c   :  { %388 = vmatpush.msra.mxu1 %v1943_v40 }
  0x6d   :  { %358 = vmatpush.msra.mxu0 %v1929_v37 }
  0x6e   :  { %389 = vmatpush.msra.mxu1 %v1951_v42 }
  0x6f   :  { %359 = vmatpush.msra.mxu0 %v1937_v39 }
  0x70   :  { %390 = vmatpush.msra.mxu1 %v1955_v44 }
  0x71   :  { %360 = vmatpush.msra.mxu0 %v1945_v41 }
  0x72   :  { %391 = vmatpush.msra.mxu1 %v1963_v46 }
  0x73   :  { %361 = vmatpush.msra.mxu0 %v1953_v43 }
  0x74   :  { %392 = vmatpush.msra.mxu1 %v1975_v48 }
  0x75   :  { %362 = vmatpush.msra.mxu0 %v1961_v45 }
  0x77   :  { %363 = vmatpush.msra.mxu0 %v1965_v47 }
  0xb2   :  { %v174_v50 = vpop.f32.mrf.mxu1 }
  0xb3   :  { %v182_v51 = vadd.f32 %v174_v50, %v135_v49 }
  0xb4   :  { %v154_v58 = vpop.f32.mrf.mxu0 }
  0xb5   :  { %v183_v52 = vmul.f32 0.5, %v182_v51  ;;  %v177_v59 = vadd.f32 %v154_v58, %v134_v57 }
  0xb7   :  { %1444 = vtanh.f32 %v183_v52  ;;  %v178_v60 = vmul.f32 0.5, %v177_v59 }
  0xb9   :  { %1446 = vtanh.f32 %v178_v60 }
  0xbd   :  { %v1445_v53 = vpop.eup %1444 }
  0xbe   :  { %v185_v54 = vmul.f32 0.5, %v1445_v53 }
  0xbf   :  { %v1447_v63 = vpop.eup %1446 }
  0xc0   :  { %v186_v55 = vadd.f32 0.5, %v185_v54  ;;  %v180_v50 = vmul.f32 0.5, %v1447_v63  ;;  %v214_v63 = vld [vmem:[#allocation2 + $0x18] sm:$0xff] }
  0xc2   :  { %v187_v56 = vmul.f32 %v186_v55, %v1894_v29  ;;  %v181_v51 = vadd.f32 0.5, %v180_v50 }
  0xc4   :  { %204 = vmatmul.f32.vlgmr.msra.gmra.mxu2 %v187_v56 }
  0xc5   :  { %397 = vmatpush.msra.mxu2 %v1802_v0 }
  0xc7   :  { %398 = vmatpush.msra.mxu2 %v1804_v1 }
  0xc9   :  { %399 = vmatpush.msra.mxu2 %v1807_v2 }
  0xcb   :  { %400 = vmatpush.msra.mxu2 %v1810_v3 }
  0xcd   :  { %401 = vmatpush.msra.mxu2 %v1813_v4 }
  0xcf   :  { %402 = vmatpush.msra.mxu2 %v1828_v10 }
  0xd1   :  { %403 = vmatpush.msra.mxu2 %v1838_v13 }
  0xd3   :  { %404 = vmatpush.msra.mxu2 %v1848_v16 }
  0xd5   :  { %405 = vmatpush.msra.mxu2 %v1858_v19 }
  0xd7   :  { %406 = vmatpush.msra.mxu2 %v1868_v22 }
  0xd9   :  { %407 = vmatpush.msra.mxu2 %v1874_v23 }
  0xdb   :  { %408 = vmatpush.msra.mxu2 %v1879_v24 }
  0xdd   :  { %409 = vmatpush.msra.mxu2 %v1882_v25 }
  0xdf   :  { %410 = vmatpush.msra.mxu2 %v1885_v26 }
  0xe1   :  { %411 = vmatpush.msra.mxu2 %v1888_v27 }
  0xe3   :  { %412 = vmatpush.msra.mxu2 %v1891_v28 }
 0x147   :  { %v205_v62 = vpop.f32.mrf.mxu2 }
 0x148   :  { %v208_v49 = vadd.f32 %v205_v62, %v136_v61 }
 0x14a   :  { %1448 = vtanh.f32 %v208_v49 }
 0x150   :  { %v1449_v52 = vpop.eup %1448 }
 0x151   :  { %v210_v53 = vsub.f32 %v1449_v52, %v1894_v29  ;;  %v216_v52 = vld [vmem:[#allocation2 + $0x28] sm:$0xff] }
 0x153   :  { %v211_v54 = vmul.f32 %v210_v53, %v181_v51 }
 0x155   :  { %v2081_v55 = vadd.f32 %v211_v54, %v1894_v29  ;;  %v215_v29 = vld [vmem:[#allocation2 + $0x20] sm:$0xff] }
 0x157   :  { %233 = vmatmul.f32.vlgmr.msra.gmra.mxu3 %v2081_v55  ;;  %253 = vmatmul.f32.vlgmr.msrb.gmra.mxu0 %v2081_v55 }
 0x158   :  { %428 = vmatpush.msra.mxu3 %v1815_v5  ;;  %457 = vmatpush.msrb.mxu0 %v1818_v6 }
 0x15a   :  { %429 = vmatpush.msra.mxu3 %v1820_v7  ;;  %458 = vmatpush.msrb.mxu0 %v1822_v8 }
 0x15c   :  { %430 = vmatpush.msra.mxu3 %v1826_v9  ;;  %459 = vmatpush.msrb.mxu0 %v1831_v11 }
 0x15e   :  { %431 = vmatpush.msra.mxu3 %v1836_v12  ;;  %460 = vmatpush.msrb.mxu0 %v1841_v14 }
 0x160   :  { %432 = vmatpush.msra.mxu3 %v1846_v15  ;;  %461 = vmatpush.msrb.mxu0 %v1851_v17 }
 0x162   :  { %433 = vmatpush.msra.mxu3 %v1856_v18  ;;  %462 = vmatpush.msrb.mxu0 %v1861_v20 }
 0x164   :  { %434 = vmatpush.msra.mxu3 %v1866_v21  ;;  %463 = vmatpush.msrb.mxu0 %v1905_v30 }
 0x166   :  { %435 = vmatpush.msra.mxu3 %v1907_v31  ;;  %464 = vmatpush.msrb.mxu0 %v1911_v32 }
 0x168   :  { %436 = vmatpush.msra.mxu3 %v1913_v33  ;;  %465 = vmatpush.msrb.mxu0 %v1919_v34 }
 0x16a   :  { %437 = vmatpush.msra.mxu3 %v1921_v35  ;;  %466 = vmatpush.msrb.mxu0 %v1927_v36 }
 0x16c   :  { %438 = vmatpush.msra.mxu3 %v1929_v37  ;;  %467 = vmatpush.msrb.mxu0 %v1935_v38 }
 0x16e   :  { %439 = vmatpush.msra.mxu3 %v1937_v39  ;;  %468 = vmatpush.msrb.mxu0 %v1943_v40 }
 0x170   :  { %440 = vmatpush.msra.mxu3 %v1945_v41  ;;  %469 = vmatpush.msrb.mxu0 %v1951_v42 }
 0x172   :  { %441 = vmatpush.msra.mxu3 %v1953_v43  ;;  %470 = vmatpush.msrb.mxu0 %v1955_v44 }
 0x174   :  { %442 = vmatpush.msra.mxu3 %v1961_v45  ;;  %471 = vmatpush.msrb.mxu0 %v1963_v46 }
 0x176   :  { %443 = vmatpush.msra.mxu3 %v1965_v47  ;;  %472 = vmatpush.msrb.mxu0 %v1975_v48 }
 0x1d4   :  { %v254_v56 = vpop.f32.mrf.mxu0 }
 0x1d5   :  { %v262_v57 = vadd.f32 %v254_v56, %v215_v29 }
 0x1d7   :  { %v263_v58 = vmul.f32 0.5, %v262_v57 }
 0x1d9   :  { %1450 = vtanh.f32 %v263_v58 }
 0x1da   :  { %v234_v49 = vpop.f32.mrf.mxu3 }
 0x1db   :  { %v257_v50 = vadd.f32 %v234_v49, %v214_v63 }
 0x1dd   :  { %v258_v51 = vmul.f32 0.5, %v257_v50 }
 0x1df   :  { %v1451_v59 = vpop.eup %1450  ;;  %1452 = vtanh.f32 %v258_v51 }
 0x1e0   :  { %v265_v60 = vmul.f32 0.5, %v1451_v59 }
 0x1e2   :  { %v266_v61 = vadd.f32 0.5, %v265_v60 }
 0x1e4   :  { %v267_v62 = vmul.f32 %v266_v61, %v2081_v55 }
 0x1e5   :  { %v1453_v29 = vpop.eup %1452 }
 0x1e6   :  { %284 = vmatmul.f32.vlgmr.msrb.gmra.mxu1 %v267_v62  ;;  %v260_v56 = vmul.f32 0.5, %v1453_v29 }
 0x1e7   :  { %477 = vmatpush.msrb.mxu1 %v1802_v0 }
 0x1e8   :  { %v261_v58 = vadd.f32 0.5, %v260_v56 }
 0x1e9   :  { %478 = vmatpush.msrb.mxu1 %v1804_v1 }
 0x1eb   :  { %479 = vmatpush.msrb.mxu1 %v1807_v2 }
 0x1ed   :  { %480 = vmatpush.msrb.mxu1 %v1810_v3 }
 0x1ef   :  { %481 = vmatpush.msrb.mxu1 %v1813_v4 }
 0x1f1   :  { %482 = vmatpush.msrb.mxu1 %v1828_v10 }
 0x1f3   :  { %483 = vmatpush.msrb.mxu1 %v1838_v13 }
 0x1f5   :  { %484 = vmatpush.msrb.mxu1 %v1848_v16 }
 0x1f7   :  { %485 = vmatpush.msrb.mxu1 %v1858_v19 }
 0x1f9   :  { %486 = vmatpush.msrb.mxu1 %v1868_v22 }
 0x1fb   :  { %487 = vmatpush.msrb.mxu1 %v1874_v23 }
 0x1fd   :  { %488 = vmatpush.msrb.mxu1 %v1879_v24 }
 0x1ff   :  { %489 = vmatpush.msrb.mxu1 %v1882_v25 }
 0x201   :  { %490 = vmatpush.msrb.mxu1 %v1885_v26 }
 0x203   :  { %491 = vmatpush.msrb.mxu1 %v1888_v27 }
 0x205   :  { %492 = vmatpush.msrb.mxu1 %v1891_v28 }
 0x263   :  { %v285_v53 = vpop.f32.mrf.mxu1 }
 0x264   :  { %v288_v54 = vadd.f32 %v285_v53, %v216_v52 }
 0x266   :  { %1454 = vtanh.f32 %v288_v54  ;;  %v294_v54 = vld [vmem:[#allocation2 + $0x30] sm:$0xff] }
 0x26c   :  { %v1455_v57 = vpop.eup %1454 }
 0x26d   :  { %v290_v59 = vsub.f32 %v1455_v57, %v2081_v55 }
 0x26f   :  { %v291_v60 = vmul.f32 %v290_v59, %v261_v58  ;;  %v296_v58 = vld [vmem:[#allocation2 + $0x40] sm:$0xff] }
 0x271   :  { %v2136_v61 = vadd.f32 %v291_v60, %v2081_v55  ;;  %v295_v55 = vld [vmem:[#allocation2 + $0x38] sm:$0xff] }
 0x273   :  { %313 = vmatmul.f32.vlgmr.msrb.gmra.mxu2 %v2136_v61  ;;  %333 = vmatmul.f32.vlgmr.msrb.gmra.mxu3 %v2136_v61 }
 0x274   :  { %508 = vmatpush.msrb.mxu2 %v1815_v5  ;;  %537 = vmatpush.msrb.mxu3 %v1818_v6 }
 0x276   :  { %509 = vmatpush.msrb.mxu2 %v1820_v7  ;;  %538 = vmatpush.msrb.mxu3 %v1822_v8 }
 0x278   :  { %510 = vmatpush.msrb.mxu2 %v1826_v9  ;;  %539 = vmatpush.msrb.mxu3 %v1831_v11 }
 0x27a   :  { %511 = vmatpush.msrb.mxu2 %v1836_v12  ;;  %540 = vmatpush.msrb.mxu3 %v1841_v14 }
 0x27c   :  { %512 = vmatpush.msrb.mxu2 %v1846_v15  ;;  %541 = vmatpush.msrb.mxu3 %v1851_v17 }
 0x27e   :  { %513 = vmatpush.msrb.mxu2 %v1856_v18  ;;  %542 = vmatpush.msrb.mxu3 %v1861_v20 }
 0x280   :  { %514 = vmatpush.msrb.mxu2 %v1866_v21  ;;  %543 = vmatpush.msrb.mxu3 %v1905_v30 }
 0x282   :  { %515 = vmatpush.msrb.mxu2 %v1907_v31  ;;  %544 = vmatpush.msrb.mxu3 %v1911_v32 }
 0x284   :  { %516 = vmatpush.msrb.mxu2 %v1913_v33  ;;  %545 = vmatpush.msrb.mxu3 %v1919_v34 }
 0x286   :  { %517 = vmatpush.msrb.mxu2 %v1921_v35  ;;  %546 = vmatpush.msrb.mxu3 %v1927_v36 }
 0x288   :  { %518 = vmatpush.msrb.mxu2 %v1929_v37  ;;  %547 = vmatpush.msrb.mxu3 %v1935_v38 }
 0x28a   :  { %519 = vmatpush.msrb.mxu2 %v1937_v39  ;;  %548 = vmatpush.msrb.mxu3 %v1943_v40 }
 0x28c   :  { %520 = vmatpush.msrb.mxu2 %v1945_v41  ;;  %549 = vmatpush.msrb.mxu3 %v1951_v42 }
 0x28e   :  { %521 = vmatpush.msrb.mxu2 %v1953_v43  ;;  %550 = vmatpush.msrb.mxu3 %v1955_v44 }
 0x290   :  { %522 = vmatpush.msrb.mxu2 %v1961_v45  ;;  %551 = vmatpush.msrb.mxu3 %v1963_v46 }
 0x292   :  { %523 = vmatpush.msrb.mxu2 %v1965_v47  ;;  %552 = vmatpush.msrb.mxu3 %v1975_v48 }
 0x2f6   :  { %v334_v62 = vpop.f32.mrf.mxu3  ;;  %v314_v29 = vpop.f32.mrf.mxu2 }
 0x2f7   :  { %v342_v63 = vadd.f32 %v334_v62, %v295_v55  ;;  %v337_v56 = vadd.f32 %v314_v29, %v294_v54 }
 0x2f9   :  { %v343_v49 = vmul.f32 0.5, %v342_v63  ;;  %v338_v57 = vmul.f32 0.5, %v337_v56 }
 0x2fb   :  { %1456 = vtanh.f32 %v343_v49 }
 0x2fc   :  { %1458 = vtanh.f32 %v338_v57 }
 0x301   :  { %v1457_v50 = vpop.eup %1456 }
 0x302   :  { %v345_v51 = vmul.f32 0.5, %v1457_v50  ;;  %v1459_v55 = vpop.eup %1458 }
 0x303   :  { %v340_v62 = vmul.f32 0.5, %v1459_v55 }
 0x304   :  { %v346_v52 = vadd.f32 0.5, %v345_v51 }
 0x305   :  { %v341_v49 = vadd.f32 0.5, %v340_v62 }
 0x306   :  { %v347_v53 = vmul.f32 %v346_v52, %v2136_v61 }
 0x308   :  { %364 = vmatmul.f32.vlgmr.msra.gmra.mxu0 %v347_v53 }
 0x309   :  { %557 = vmatpush.msra.mxu0 %v1802_v0 }
 0x30b   :  { %558 = vmatpush.msra.mxu0 %v1804_v1 }
 0x30d   :  { %559 = vmatpush.msra.mxu0 %v1807_v2 }
 0x30f   :  { %560 = vmatpush.msra.mxu0 %v1810_v3 }
 0x311   :  { %561 = vmatpush.msra.mxu0 %v1813_v4 }
 0x313   :  { %562 = vmatpush.msra.mxu0 %v1828_v10 }
 0x315   :  { %563 = vmatpush.msra.mxu0 %v1838_v13 }
 0x317   :  { %564 = vmatpush.msra.mxu0 %v1848_v16 }
 0x319   :  { %565 = vmatpush.msra.mxu0 %v1858_v19 }
 0x31b   :  { %566 = vmatpush.msra.mxu0 %v1868_v22 }
 0x31d   :  { %567 = vmatpush.msra.mxu0 %v1874_v23 }
 0x31f   :  { %568 = vmatpush.msra.mxu0 %v1879_v24 }
 0x321   :  { %569 = vmatpush.msra.mxu0 %v1882_v25 }
 0x323   :  { %570 = vmatpush.msra.mxu0 %v1885_v26 }
 0x325   :  { %571 = vmatpush.msra.mxu0 %v1888_v27 }
 0x327   :  { %572 = vmatpush.msra.mxu0 %v1891_v28 }
 0x385   :  { %v365_v59 = vpop.f32.mrf.mxu0 }
 0x386   :  { %v368_v60 = vadd.f32 %v365_v59, %v296_v58 }
 0x388   :  { %1460 = vtanh.f32 %v368_v60 }
 0x38e   :  { %v1461_v63 = vpop.eup %1460 }
 0x38f   :  { %v370_v50 = vsub.f32 %v1461_v63, %v2136_v61 }
 0x391   :  { %v371_v51 = vmul.f32 %v370_v50, %v341_v49 }
 0x393   :  { %v2191_v52 = vadd.f32 %v371_v51, %v2136_v61  ;;  %v375_v61 = vld [vmem:[#allocation2 + $0x50] sm:$0xff] }
 0x395   :  { %393 = vmatmul.f32.vlgmr.msra.gmra.mxu1 %v2191_v52  ;;  %413 = vmatmul.f32.vlgmr.msra.gmra.mxu2 %v2191_v52 }
 0x396   :  { %588 = vmatpush.msra.mxu1 %v1815_v5  ;;  %617 = vmatpush.msra.mxu2 %v1818_v6 }
 0x398   :  { %589 = vmatpush.msra.mxu1 %v1820_v7  ;;  %618 = vmatpush.msra.mxu2 %v1822_v8 }
 0x39a   :  { %590 = vmatpush.msra.mxu1 %v1826_v9  ;;  %619 = vmatpush.msra.mxu2 %v1831_v11 }
 0x39c   :  { %591 = vmatpush.msra.mxu1 %v1836_v12  ;;  %620 = vmatpush.msra.mxu2 %v1841_v14 }
 0x39e   :  { %592 = vmatpush.msra.mxu1 %v1846_v15  ;;  %621 = vmatpush.msra.mxu2 %v1851_v17 }
 0x3a0   :  { %593 = vmatpush.msra.mxu1 %v1856_v18  ;;  %622 = vmatpush.msra.mxu2 %v1861_v20 }
 0x3a2   :  { %594 = vmatpush.msra.mxu1 %v1866_v21  ;;  %623 = vmatpush.msra.mxu2 %v1905_v30 }
 0x3a4   :  { %595 = vmatpush.msra.mxu1 %v1907_v31  ;;  %624 = vmatpush.msra.mxu2 %v1911_v32 }
 0x3a6   :  { %596 = vmatpush.msra.mxu1 %v1913_v33  ;;  %625 = vmatpush.msra.mxu2 %v1919_v34 }
 0x3a8   :  { %597 = vmatpush.msra.mxu1 %v1921_v35  ;;  %626 = vmatpush.msra.mxu2 %v1927_v36 }
 0x3aa   :  { %598 = vmatpush.msra.mxu1 %v1929_v37  ;;  %627 = vmatpush.msra.mxu2 %v1935_v38 }
 0x3ac   :  { %599 = vmatpush.msra.mxu1 %v1937_v39  ;;  %628 = vmatpush.msra.mxu2 %v1943_v40 }
 0x3ae   :  { %600 = vmatpush.msra.mxu1 %v1945_v41  ;;  %629 = vmatpush.msra.mxu2 %v1951_v42 }
 0x3b0   :  { %601 = vmatpush.msra.mxu1 %v1953_v43  ;;  %630 = vmatpush.msra.mxu2 %v1955_v44 }
 0x3b2   :  { %602 = vmatpush.msra.mxu1 %v1961_v45  ;;  %631 = vmatpush.msra.mxu2 %v1963_v46 }
 0x3b4   :  { %603 = vmatpush.msra.mxu1 %v1965_v47  ;;  %632 = vmatpush.msra.mxu2 %v1975_v48 }
 0x418   :  { %v414_v53 = vpop.f32.mrf.mxu2 }
 0x419   :  { %v422_v54 = vadd.f32 %v414_v53, %v375_v61  ;;  %v454_v53 = vld [vmem:[#allocation2 + $0x60] sm:$0xff] }
 0x41b   :  { %v423_v29 = vmul.f32 0.5, %v422_v54 }
 0x41d   :  { %1462 = vtanh.f32 %v423_v29 }
 0x423   :  { %v1463_v56 = vpop.eup %1462 }
 0x424   :  { %v425_v57 = vmul.f32 0.5, %v1463_v56 }
 0x426   :  { %v426_v58 = vadd.f32 0.5, %v425_v57 }
 0x428   :  { %v427_v59 = vmul.f32 %v426_v58, %v2191_v52  ;;  %v2320_v58 = vld [vmem:[#allocation7 + $0xf0] sm:$0xff] }
 0x42a   :  { %444 = vmatmul.f32.vlgmr.msra.gmra.mxu3 %v427_v59  ;;  %v2323_v59 = vld [vmem:[#allocation8 + $0x70] sm:$0xff] }
 0x42b   :  { %637 = vmatpush.msra.mxu3 %v1802_v0  ;;  %v374_v0 = vld [vmem:[#allocation2 + $0x48] sm:$0xff] }
 0x42d   :  { %638 = vmatpush.msra.mxu3 %v1804_v1  ;;  %v394_v1 = vpop.f32.mrf.mxu1 }
 0x42f   :  { %639 = vmatpush.msra.mxu3 %v1807_v2  ;;  %v417_v2 = vadd.f32 %v394_v1, %v374_v0  ;;  %v2326_v0 = vld [vmem:[#allocation7 + $0xe0] sm:$0xff]  ;;  %v2329_v1 = vld [vmem:[#allocation8 + $0x68] sm:$0xff] }
 0x431   :  { %640 = vmatpush.msra.mxu3 %v1810_v3  ;;  %v418_v3 = vmul.f32 0.5, %v417_v2  ;;  %v2332_v2 = vld [vmem:[#allocation7 + $0xd0] sm:$0xff] }
 0x433   :  { %641 = vmatpush.msra.mxu3 %v1813_v4  ;;  %1464 = vtanh.f32 %v418_v3  ;;  %v376_v4 = vld [vmem:[#allocation2 + $0x58] sm:$0xff]  ;;  %v2335_v3 = vld [vmem:[#allocation8 + $0x60] sm:$0xff] }
 0x435   :  { %642 = vmatpush.msra.mxu3 %v1828_v10 }
 0x437   :  { %643 = vmatpush.msra.mxu3 %v1838_v13 }
 0x439   :  { %644 = vmatpush.msra.mxu3 %v1848_v16  ;;  %v1465_v55 = vpop.eup %1464 }
 0x43a   :  { %v420_v62 = vmul.f32 0.5, %v1465_v55  ;;  %v2347_v55 = vld [vmem:[#allocation8 + $0x50] sm:$0xff] }
 0x43b   :  { %645 = vmatpush.msra.mxu3 %v1858_v19 }
 0x43c   :  { %v421_v49 = vadd.f32 0.5, %v420_v62  ;;  %v2350_v62 = vld [vmem:[#allocation7 + $0xa0] sm:$0xff] }
 0x43d   :  { %646 = vmatpush.msra.mxu3 %v1868_v22 }
 0x43f   :  { %647 = vmatpush.msra.mxu3 %v1874_v23 }
 0x441   :  { %648 = vmatpush.msra.mxu3 %v1879_v24 }
 0x443   :  { %649 = vmatpush.msra.mxu3 %v1882_v25 }
 0x445   :  { %650 = vmatpush.msra.mxu3 %v1885_v26 }
 0x447   :  { %651 = vmatpush.msra.mxu3 %v1888_v27 }
 0x449   :  { %652 = vmatpush.msra.mxu3 %v1891_v28 }
 0x4ad   :  { %v445_v10 = vpop.f32.mrf.mxu3 }
 0x4ae   :  { %v448_v60 = vadd.f32 %v445_v10, %v376_v4  ;;  %v2338_v4 = vld [vmem:[#allocation7 + $0xc0] sm:$0xff]  ;;  %v2341_v10 = vld [vmem:[#allocation8 + $0x58] sm:$0xff] }
 0x4b0   :  { %1466 = vtanh.f32 %v448_v60  ;;  %v2344_v60 = vld [vmem:[#allocation7 + $0xb0] sm:$0xff] }
 0x4b6   :  { %v1467_v63 = vpop.eup %1466 }
 0x4b7   :  { %v450_v50 = vsub.f32 %v1467_v63, %v2191_v52  ;;  %v2353_v63 = vld [vmem:[#allocation8 + $0x48] sm:$0xff] }
 0x4b9   :  { %v451_v51 = vmul.f32 %v450_v50, %v421_v49 }
 0x4bb   :  { %v2246_v61 = vadd.f32 %v451_v51, %v2191_v52  ;;  %v2298_v52 = vld [vmem:[#allocation7 + $0xa8] sm:$0xff] }
 0x4bd   :  { %473 = vmatmul.f32.vlgmr.msrb.gmra.mxu0 %v2246_v61  ;;  %493 = vmatmul.f32.vlgmr.msrb.gmra.mxu1 %v2246_v61 }
 0x4be   :  { %668 = vmatpush.msrb.mxu0 %v1815_v5  ;;  %697 = vmatpush.msrb.mxu1 %v1818_v6  ;;  %v455_v5 = vld [vmem:[#allocation2 + $0x68] sm:$0xff] }
 0x4c0   :  { %669 = vmatpush.msrb.mxu0 %v1820_v7  ;;  %698 = vmatpush.msrb.mxu1 %v1822_v8 }
 0x4c2   :  { %670 = vmatpush.msrb.mxu0 %v1826_v9  ;;  %699 = vmatpush.msrb.mxu1 %v1831_v11 }
 0x4c4   :  { %671 = vmatpush.msrb.mxu0 %v1836_v12  ;;  %700 = vmatpush.msrb.mxu1 %v1841_v14 }
 0x4c6   :  { %672 = vmatpush.msrb.mxu0 %v1846_v15  ;;  %701 = vmatpush.msrb.mxu1 %v1851_v17  ;;  %v2283_v15 = vld [vmem:[#allocation7 + $0xf8] sm:$0xff]  ;;  %v2286_v17 = vld [vmem:[#allocation7 + $0xe8] sm:$0xff] }
 0x4c8   :  { %673 = vmatpush.msrb.mxu0 %v1856_v18  ;;  %702 = vmatpush.msrb.mxu1 %v1861_v20  ;;  %v2289_v18 = vld [vmem:[#allocation7 + $0xd8] sm:$0xff]  ;;  %v2292_v20 = vld [vmem:[#allocation7 + $0xc8] sm:$0xff] }
 0x4ca   :  { %674 = vmatpush.msrb.mxu0 %v1866_v21  ;;  %703 = vmatpush.msrb.mxu1 %v1905_v30  ;;  %v2295_v21 = vld [vmem:[#allocation7 + $0xb8] sm:$0xff] }
 0x4cc   :  { %675 = vmatpush.msrb.mxu0 %v1907_v31  ;;  %704 = vmatpush.msrb.mxu1 %v1911_v32 }
 0x4ce   :  { %676 = vmatpush.msrb.mxu0 %v1913_v33  ;;  %705 = vmatpush.msrb.mxu1 %v1919_v34 }
 0x4d0   :  { %677 = vmatpush.msrb.mxu0 %v1921_v35  ;;  %706 = vmatpush.msrb.mxu1 %v1927_v36 }
 0x4d2   :  { %678 = vmatpush.msrb.mxu0 %v1929_v37  ;;  %707 = vmatpush.msrb.mxu1 %v1935_v38 }
 0x4d4   :  { %679 = vmatpush.msrb.mxu0 %v1937_v39  ;;  %708 = vmatpush.msrb.mxu1 %v1943_v40 }
 0x4d6   :  { %680 = vmatpush.msrb.mxu0 %v1945_v41  ;;  %709 = vmatpush.msrb.mxu1 %v1951_v42 }
 0x4d8   :  { %681 = vmatpush.msrb.mxu0 %v1953_v43  ;;  %710 = vmatpush.msrb.mxu1 %v1955_v44 }
 0x4da   :  { %682 = vmatpush.msrb.mxu0 %v1961_v45  ;;  %711 = vmatpush.msrb.mxu1 %v1963_v46 }
 0x4dc   :  { %683 = vmatpush.msrb.mxu0 %v1965_v47  ;;  %712 = vmatpush.msrb.mxu1 %v1975_v48 }
 0x53a   :  { %v494_v6 = vpop.f32.mrf.mxu1 }
 0x53b   :  { %v502_v7 = vadd.f32 %v494_v6, %v455_v5 }
 0x53d   :  { %v503_v8 = vmul.f32 0.5, %v502_v7 }
 0x53f   :  { %1468 = vtanh.f32 %v503_v8 }
 0x545   :  { %v1469_v9 = vpop.eup %1468 }
 0x546   :  { %v505_v11 = vmul.f32 0.5, %v1469_v9 }
 0x548   :  { %v506_v12 = vadd.f32 0.5, %v505_v11 }
 0x54a   :  { %v507_v14 = vmul.f32 %v506_v12, %v2246_v61 }
 0x54c   :  { %524 = vmatmul.f32.vlgmr.msrb.gmra.mxu2 %v507_v14 }
 0x54d   :  { %717 = vmatpush.msrb.mxu2 %v2283_v15 }
 0x54f   :  { %718 = vmatpush.msrb.mxu2 %v2286_v17 }
 0x551   :  { %719 = vmatpush.msrb.mxu2 %v2289_v18 }
 0x553   :  { %720 = vmatpush.msrb.mxu2 %v2292_v20 }
 0x555   :  { %721 = vmatpush.msrb.mxu2 %v2295_v21 }
 0x557   :  { %722 = vmatpush.msrb.mxu2 %v2298_v52 }
 0x559   :  { %723 = vmatpush.msrb.mxu2 %v1838_v13  ;;  %v474_v13 = vpop.f32.mrf.mxu0 }
 0x55a   :  { %v497_v54 = vadd.f32 %v474_v13, %v454_v53  ;;  %v2431_v13 = vld [vmem:[#allocation7 + $0x90] sm:$0xff] }
 0x55b   :  { %724 = vmatpush.msrb.mxu2 %v1848_v16 }
 0x55c   :  { %v498_v16 = vmul.f32 0.5, %v497_v54  ;;  %v2434_v54 = vld [vmem:[#allocation8 + $0x40] sm:$0xff] }
 0x55d   :  { %725 = vmatpush.msrb.mxu2 %v1858_v19  ;;  %v456_v19 = vld [vmem:[#allocation2 + $0x70] sm:$0xff] }
 0x55e   :  { %1470 = vtanh.f32 %v498_v16  ;;  %v2437_v16 = vld [vmem:[#allocation7 + $0x80] sm:$0xff] }
 0x55f   :  { %726 = vmatpush.msrb.mxu2 %v1868_v22 }
 0x561   :  { %727 = vmatpush.msrb.mxu2 %v1874_v23 }
 0x563   :  { %728 = vmatpush.msrb.mxu2 %v1879_v24 }
 0x564   :  { %v1471_v56 = vpop.eup %1470 }
 0x565   :  { %729 = vmatpush.msrb.mxu2 %v1882_v25  ;;  %v500_v23 = vmul.f32 0.5, %v1471_v56  ;;  %v2449_v56 = vld [vmem:[#allocation7 + $0x60] sm:$0xff] }
 0x567   :  { %730 = vmatpush.msrb.mxu2 %v1885_v26  ;;  %v501_v57 = vadd.f32 0.5, %v500_v23  ;;  %v2452_v23 = vld [vmem:[#allocation8 + $0x28] sm:$0xff] }
 0x569   :  { %731 = vmatpush.msrb.mxu2 %v1888_v27 }
 0x56b   :  { %732 = vmatpush.msrb.mxu2 %v1891_v28  ;;  %v2317_v28 = vld [vmem:[#allocation8 + $0x78] sm:$0xff] }
 0x5cf   :  { %v525_v29 = vpop.f32.mrf.mxu2 }
 0x5d0   :  { %v528_v22 = vadd.f32 %v525_v29, %v456_v19  ;;  %v2440_v19 = vld [vmem:[#allocation8 + $0x38] sm:$0xff]  ;;  %v2443_v29 = vld [vmem:[#allocation7 + $0x70] sm:$0xff] }
 0x5d2   :  { %1472 = vtanh.f32 %v528_v22  ;;  %v2446_v22 = vld [vmem:[#allocation8 + $0x30] sm:$0xff] }
 0x5d8   :  { %v1473_v24 = vpop.eup %1472 }
 0x5d9   :  { %v530_v25 = vsub.f32 %v1473_v24, %v2246_v61  ;;  %v2455_v24 = vld [vmem:[#allocation7 + $0x50] sm:$0xff] }
 0x5db   :  { %v531_v26 = vmul.f32 %v530_v25, %v501_v57  ;;  %v2458_v57 = vld [vmem:[#allocation8 + $0x20] sm:$0xff] }
 0x5dc   :  { %v2461_v25 = vld [vmem:[#allocation7 + $0x40] sm:$0xff] }
 0x5dd   :  { %v2313_v27 = vadd.f32 %v531_v26, %v2246_v61  ;;  %v536_v61 = vld [vmem:[#allocation2 + $0x88] sm:$0xff]  ;;  %v2464_v26 = vld [vmem:[#allocation8 + $0x18] sm:$0xff] }
 0x5df   :  { %553 = vmatmul.f32.vlgmr.msrb.gmra.mxu3 %v2313_v27  ;;  %573 = vmatmul.f32.vlgmr.msra.gmra.mxu0 %v2313_v27 }
 0x5e0   :  { %748 = vmatpush.msrb.mxu3 %v2317_v28  ;;  %777 = vmatpush.msra.mxu0 %v2320_v58 }
 0x5e2   :  { %749 = vmatpush.msrb.mxu3 %v2323_v59  ;;  %778 = vmatpush.msra.mxu0 %v2326_v0 }
 0x5e4   :  { %750 = vmatpush.msrb.mxu3 %v2329_v1  ;;  %779 = vmatpush.msra.mxu0 %v2332_v2 }
 0x5e6   :  { %751 = vmatpush.msrb.mxu3 %v2335_v3  ;;  %780 = vmatpush.msra.mxu0 %v2338_v4 }
 0x5e8   :  { %752 = vmatpush.msrb.mxu3 %v2341_v10  ;;  %781 = vmatpush.msra.mxu0 %v2344_v60 }
 0x5ea   :  { %753 = vmatpush.msrb.mxu3 %v2347_v55  ;;  %782 = vmatpush.msra.mxu0 %v2350_v62 }
 0x5ec   :  { %754 = vmatpush.msrb.mxu3 %v2353_v63  ;;  %783 = vmatpush.msra.mxu0 %v1905_v30  ;;  %v535_v30 = vld [vmem:[#allocation2 + $0x80] sm:$0xff] }
 0x5ee   :  { %755 = vmatpush.msrb.mxu3 %v1907_v31  ;;  %784 = vmatpush.msra.mxu0 %v1911_v32 }
 0x5f0   :  { %756 = vmatpush.msrb.mxu3 %v1913_v33  ;;  %785 = vmatpush.msra.mxu0 %v1919_v34 }
 0x5f2   :  { %757 = vmatpush.msrb.mxu3 %v1921_v35  ;;  %786 = vmatpush.msra.mxu0 %v1927_v36 }
 0x5f4   :  { %758 = vmatpush.msrb.mxu3 %v1929_v37  ;;  %787 = vmatpush.msra.mxu0 %v1935_v38  ;;  %v2382_v38 = vld [vmem:[#allocation7 + $0x98] sm:$0xff] }
 0x5f6   :  { %759 = vmatpush.msrb.mxu3 %v1937_v39  ;;  %788 = vmatpush.msra.mxu0 %v1943_v40  ;;  %v2385_v39 = vld [vmem:[#allocation7 + $0x88] sm:$0xff]  ;;  %v2388_v40 = vld [vmem:[#allocation7 + $0x78] sm:$0xff] }
 0x5f8   :  { %760 = vmatpush.msrb.mxu3 %v1945_v41  ;;  %789 = vmatpush.msra.mxu0 %v1951_v42  ;;  %v2391_v41 = vld [vmem:[#allocation7 + $0x68] sm:$0xff]  ;;  %v2394_v42 = vld [vmem:[#allocation7 + $0x58] sm:$0xff] }
 0x5fa   :  { %761 = vmatpush.msrb.mxu3 %v1953_v43  ;;  %790 = vmatpush.msra.mxu0 %v1955_v44  ;;  %v2397_v43 = vld [vmem:[#allocation7 + $0x48] sm:$0xff]  ;;  %v2400_v44 = vld [vmem:[#allocation7 + $0x38] sm:$0xff] }
 0x5fc   :  { %762 = vmatpush.msrb.mxu3 %v1961_v45  ;;  %791 = vmatpush.msra.mxu0 %v1963_v46  ;;  %v2403_v45 = vld [vmem:[#allocation7 + $0x28] sm:$0xff]  ;;  %v2406_v46 = vld [vmem:[#allocation7 + $0x18] sm:$0xff] }
 0x5fe   :  { %763 = vmatpush.msrb.mxu3 %v1965_v47  ;;  %792 = vmatpush.msra.mxu0 %v1975_v48  ;;  %v2409_v47 = vld [vmem:[#allocation7 + $0x8] sm:$0xff]  ;;  %v534_v48 = vld [vmem:[#allocation2 + $0x78] sm:$0xff] }
 0x65c   :  { %v574_v31 = vpop.f32.mrf.mxu0 }
 0x65d   :  { %v582_v32 = vadd.f32 %v574_v31, %v535_v30  ;;  %v2470_v30 = vld [vmem:[#allocation8 + $0x10] sm:$0xff]  ;;  %v2473_v31 = vld [vmem:[#allocation7 + $0x20] sm:$0xff] }
 0x65f   :  { %v583_v33 = vmul.f32 0.5, %v582_v32  ;;  %v2476_v32 = vld [vmem:[#allocation8 + $0x8] sm:$0xff] }
 0x661   :  { %1474 = vtanh.f32 %v583_v33  ;;  %v2479_v33 = vld [vmem:[#allocation7 + $0x10] sm:$0xff] }
 0x662   :  { %v554_v49 = vpop.f32.mrf.mxu3 }
 0x663   :  { %v577_v50 = vadd.f32 %v554_v49, %v534_v48 }
 0x665   :  { %v578_v51 = vmul.f32 0.5, %v577_v50 }
 0x667   :  { %v1475_v34 = vpop.eup %1474  ;;  %1476 = vtanh.f32 %v578_v51 }
 0x668   :  { %v585_v35 = vmul.f32 0.5, %v1475_v34  ;;  %v2482_v34 = vld [vmem:[#allocation8] sm:$0xff] }
 0x66a   :  { %v586_v36 = vadd.f32 0.5, %v585_v35  ;;  %v2485_v35 = vld [vmem:[#allocation7] sm:$0xff] }
 0x66c   :  { %v587_v37 = vmul.f32 %v586_v36, %v2313_v27  ;;  %v615_v36 = vld [vmem:[#allocation2 + $0x98] sm:$0xff] }
 0x66d   :  { %v1477_v7 = vpop.eup %1476 }
 0x66e   :  { %604 = vmatmul.f32.vlgmr.msra.gmra.mxu1 %v587_v37  ;;  %v580_v8 = vmul.f32 0.5, %v1477_v7 }
 0x66f   :  { %797 = vmatpush.msra.mxu1 %v2283_v15 }
 0x670   :  { %v581_v11 = vadd.f32 0.5, %v580_v8 }
 0x671   :  { %798 = vmatpush.msra.mxu1 %v2286_v17 }
 0x673   :  { %799 = vmatpush.msra.mxu1 %v2289_v18 }
 0x675   :  { %800 = vmatpush.msra.mxu1 %v2292_v20 }
 0x677   :  { %801 = vmatpush.msra.mxu1 %v2295_v21 }
 0x679   :  { %802 = vmatpush.msra.mxu1 %v2298_v52 }
 0x67b   :  { %803 = vmatpush.msra.mxu1 %v2382_v38 }
 0x67d   :  { %804 = vmatpush.msra.mxu1 %v2385_v39 }
 0x67f   :  { %805 = vmatpush.msra.mxu1 %v2388_v40 }
 0x681   :  { %806 = vmatpush.msra.mxu1 %v2391_v41 }
 0x683   :  { %807 = vmatpush.msra.mxu1 %v2394_v42 }
 0x685   :  { %808 = vmatpush.msra.mxu1 %v2397_v43 }
 0x687   :  { %809 = vmatpush.msra.mxu1 %v2400_v44 }
 0x689   :  { %810 = vmatpush.msra.mxu1 %v2403_v45 }
 0x68b   :  { %811 = vmatpush.msra.mxu1 %v2406_v46 }
 0x68d   :  { %812 = vmatpush.msra.mxu1 %v2409_v47 }
 0x6eb   :  { %v605_v5 = vpop.f32.mrf.mxu1 }
 0x6ec   :  { %v608_v6 = vadd.f32 %v605_v5, %v536_v61 }
 0x6ee   :  { %1478 = vtanh.f32 %v608_v6  ;;  %v614_v6 = vld [vmem:[#allocation2 + $0x90] sm:$0xff] }
 0x6f4   :  { %v1479_v9 = vpop.eup %1478 }
 0x6f5   :  { %v610_v12 = vsub.f32 %v1479_v9, %v2313_v27 }
 0x6f7   :  { %v611_v14 = vmul.f32 %v610_v12, %v581_v11  ;;  %v616_v11 = vld [vmem:[#allocation2 + $0xa0] sm:$0xff] }
 0x6f9   :  { %v2414_v53 = vadd.f32 %v611_v14, %v2313_v27  ;;  %v2467_v27 = vld [vmem:[#allocation7 + $0x30] sm:$0xff] }
 0x6fb   :  { %633 = vmatmul.f32.vlgmr.msra.gmra.mxu2 %v2414_v53  ;;  %653 = vmatmul.f32.vlgmr.msra.gmra.mxu3 %v2414_v53 }
 0x6fc   :  { %828 = vmatpush.msra.mxu2 %v2317_v28  ;;  %857 = vmatpush.msra.mxu3 %v2320_v58 }
 0x6fe   :  { %829 = vmatpush.msra.mxu2 %v2323_v59  ;;  %858 = vmatpush.msra.mxu3 %v2326_v0 }
 0x700   :  { %830 = vmatpush.msra.mxu2 %v2329_v1  ;;  %859 = vmatpush.msra.mxu3 %v2332_v2 }
 0x702   :  { %831 = vmatpush.msra.mxu2 %v2335_v3  ;;  %860 = vmatpush.msra.mxu3 %v2338_v4 }
 0x704   :  { %832 = vmatpush.msra.mxu2 %v2341_v10  ;;  %861 = vmatpush.msra.mxu3 %v2344_v60 }
 0x706   :  { %833 = vmatpush.msra.mxu2 %v2347_v55  ;;  %862 = vmatpush.msra.mxu3 %v2350_v62 }
 0x708   :  { %834 = vmatpush.msra.mxu2 %v2353_v63  ;;  %863 = vmatpush.msra.mxu3 %v2431_v13 }
 0x70a   :  { %835 = vmatpush.msra.mxu2 %v2434_v54  ;;  %864 = vmatpush.msra.mxu3 %v2437_v16 }
 0x70c   :  { %836 = vmatpush.msra.mxu2 %v2440_v19  ;;  %865 = vmatpush.msra.mxu3 %v2443_v29 }
 0x70e   :  { %837 = vmatpush.msra.mxu2 %v2446_v22  ;;  %866 = vmatpush.msra.mxu3 %v2449_v56 }
 0x710   :  { %838 = vmatpush.msra.mxu2 %v2452_v23  ;;  %867 = vmatpush.msra.mxu3 %v2455_v24 }
 0x712   :  { %839 = vmatpush.msra.mxu2 %v2458_v57  ;;  %868 = vmatpush.msra.mxu3 %v2461_v25 }
 0x714   :  { %840 = vmatpush.msra.mxu2 %v2464_v26  ;;  %869 = vmatpush.msra.mxu3 %v2467_v27 }
 0x716   :  { %841 = vmatpush.msra.mxu2 %v2470_v30  ;;  %870 = vmatpush.msra.mxu3 %v2473_v31 }
 0x718   :  { %842 = vmatpush.msra.mxu2 %v2476_v32  ;;  %871 = vmatpush.msra.mxu3 %v2479_v33 }
 0x71a   :  { %843 = vmatpush.msra.mxu2 %v2482_v34  ;;  %872 = vmatpush.msra.mxu3 %v2485_v35 }
 0x77e   :  { %v654_v37 = vpop.f32.mrf.mxu3  ;;  %v634_v7 = vpop.f32.mrf.mxu2 }
 0x77f   :  { %v662_v48 = vadd.f32 %v654_v37, %v615_v36  ;;  %v657_v8 = vadd.f32 %v634_v7, %v614_v6 }
 0x781   :  { %v663_v49 = vmul.f32 0.5, %v662_v48  ;;  %v658_v9 = vmul.f32 0.5, %v657_v8 }
 0x783   :  { %1480 = vtanh.f32 %v663_v49 }
 0x784   :  { %1482 = vtanh.f32 %v658_v9 }
 0x789   :  { %v1481_v50 = vpop.eup %1480 }
 0x78a   :  { %v665_v51 = vmul.f32 0.5, %v1481_v50  ;;  %v1483_v36 = vpop.eup %1482 }
 0x78b   :  { %v660_v37 = vmul.f32 0.5, %v1483_v36 }
 0x78c   :  { %v666_v61 = vadd.f32 0.5, %v665_v51 }
 0x78d   :  { %v661_v49 = vadd.f32 0.5, %v660_v37 }
 0x78e   :  { %v667_v5 = vmul.f32 %v666_v61, %v2414_v53 }
 0x790   :  { %684 = vmatmul.f32.vlgmr.msrb.gmra.mxu0 %v667_v5 }
 0x791   :  { %877 = vmatpush.msrb.mxu0 %v2283_v15 }
 0x793   :  { %878 = vmatpush.msrb.mxu0 %v2286_v17 }
 0x795   :  { %879 = vmatpush.msrb.mxu0 %v2289_v18 }
 0x797   :  { %880 = vmatpush.msrb.mxu0 %v2292_v20 }
 0x799   :  { %881 = vmatpush.msrb.mxu0 %v2295_v21 }
 0x79b   :  { %882 = vmatpush.msrb.mxu0 %v2298_v52 }
 0x79d   :  { %883 = vmatpush.msrb.mxu0 %v2382_v38 }
 0x79f   :  { %884 = vmatpush.msrb.mxu0 %v2385_v39 }
 0x7a1   :  { %885 = vmatpush.msrb.mxu0 %v2388_v40 }
 0x7a3   :  { %886 = vmatpush.msrb.mxu0 %v2391_v41 }
 0x7a5   :  { %887 = vmatpush.msrb.mxu0 %v2394_v42 }
 0x7a7   :  { %888 = vmatpush.msrb.mxu0 %v2397_v43 }
 0x7a9   :  { %889 = vmatpush.msrb.mxu0 %v2400_v44 }
 0x7ab   :  { %890 = vmatpush.msrb.mxu0 %v2403_v45 }
 0x7ad   :  { %891 = vmatpush.msrb.mxu0 %v2406_v46 }
 0x7af   :  { %892 = vmatpush.msrb.mxu0 %v2409_v47 }
 0x80d   :  { %v685_v12 = vpop.f32.mrf.mxu0 }
 0x80e   :  { %v688_v14 = vadd.f32 %v685_v12, %v616_v11 }
 0x810   :  { %1484 = vtanh.f32 %v688_v14  ;;  %v694_v14 = vld [vmem:[#allocation2 + $0xa8] sm:$0xff] }
 0x816   :  { %v1485_v48 = vpop.eup %1484 }
 0x817   :  { %v690_v50 = vsub.f32 %v1485_v48, %v2414_v53 }
 0x819   :  { %v691_v51 = vmul.f32 %v690_v50, %v661_v49  ;;  %v696_v49 = vld [vmem:[#allocation2 + $0xb8] sm:$0xff] }
 0x81b   :  { %v2507_v61 = vadd.f32 %v691_v51, %v2414_v53  ;;  %v695_v53 = vld [vmem:[#allocation2 + $0xb0] sm:$0xff] }
 0x81d   :  { %713 = vmatmul.f32.vlgmr.msrb.gmra.mxu1 %v2507_v61  ;;  %733 = vmatmul.f32.vlgmr.msrb.gmra.mxu2 %v2507_v61 }
 0x81e   :  { %908 = vmatpush.msrb.mxu1 %v2317_v28  ;;  %937 = vmatpush.msrb.mxu2 %v2320_v58 }
 0x820   :  { %909 = vmatpush.msrb.mxu1 %v2323_v59  ;;  %938 = vmatpush.msrb.mxu2 %v2326_v0 }
 0x822   :  { %910 = vmatpush.msrb.mxu1 %v2329_v1  ;;  %939 = vmatpush.msrb.mxu2 %v2332_v2 }
 0x824   :  { %911 = vmatpush.msrb.mxu1 %v2335_v3  ;;  %940 = vmatpush.msrb.mxu2 %v2338_v4 }
 0x826   :  { %912 = vmatpush.msrb.mxu1 %v2341_v10  ;;  %941 = vmatpush.msrb.mxu2 %v2344_v60 }
 0x828   :  { %913 = vmatpush.msrb.mxu1 %v2347_v55  ;;  %942 = vmatpush.msrb.mxu2 %v2350_v62 }
 0x82a   :  { %914 = vmatpush.msrb.mxu1 %v2353_v63  ;;  %943 = vmatpush.msrb.mxu2 %v2431_v13 }
 0x82c   :  { %915 = vmatpush.msrb.mxu1 %v2434_v54  ;;  %944 = vmatpush.msrb.mxu2 %v2437_v16 }
 0x82e   :  { %916 = vmatpush.msrb.mxu1 %v2440_v19  ;;  %945 = vmatpush.msrb.mxu2 %v2443_v29 }
 0x830   :  { %917 = vmatpush.msrb.mxu1 %v2446_v22  ;;  %946 = vmatpush.msrb.mxu2 %v2449_v56 }
 0x832   :  { %918 = vmatpush.msrb.mxu1 %v2452_v23  ;;  %947 = vmatpush.msrb.mxu2 %v2455_v24 }
 0x834   :  { %919 = vmatpush.msrb.mxu1 %v2458_v57  ;;  %948 = vmatpush.msrb.mxu2 %v2461_v25 }
 0x836   :  { %920 = vmatpush.msrb.mxu1 %v2464_v26  ;;  %949 = vmatpush.msrb.mxu2 %v2467_v27 }
 0x838   :  { %921 = vmatpush.msrb.mxu1 %v2470_v30  ;;  %950 = vmatpush.msrb.mxu2 %v2473_v31 }
 0x83a   :  { %922 = vmatpush.msrb.mxu1 %v2476_v32  ;;  %951 = vmatpush.msrb.mxu2 %v2479_v33 }
 0x83c   :  { %923 = vmatpush.msrb.mxu1 %v2482_v34  ;;  %952 = vmatpush.msrb.mxu2 %v2485_v35 }
 0x89a   :  { %v714_v36 = vpop.f32.mrf.mxu1 }
 0x89b   :  { %v737_v37 = vadd.f32 %v714_v36, %v694_v14 }
 0x89d   :  { %v738_v48 = vmul.f32 0.5, %v737_v37 }
 0x8a0   :  { %v734_v5 = vpop.f32.mrf.mxu2 }
 0x8a1   :  { %v742_v6 = vadd.f32 %v734_v5, %v695_v53 }
 0x8a3   :  { %v743_v7 = vmul.f32 0.5, %v742_v6 }
 0x8a5   :  { %1486 = vtanh.f32 %v743_v7 }
 0x8a6   :  { %1488 = vtanh.f32 %v738_v48 }
 0x8ab   :  { %v1487_v8 = vpop.eup %1486 }
 0x8ac   :  { %v745_v9 = vmul.f32 0.5, %v1487_v8  ;;  %v1489_v53 = vpop.eup %1488 }
 0x8ad   :  { %v740_v5 = vmul.f32 0.5, %v1489_v53 }
 0x8ae   :  { %v746_v11 = vadd.f32 0.5, %v745_v9 }
 0x8af   :  { %v741_v7 = vadd.f32 0.5, %v740_v5 }
 0x8b0   :  { %v747_v12 = vmul.f32 %v746_v11, %v2507_v61 }
 0x8b2   :  { %764 = vmatmul.f32.vlgmr.msrb.gmra.mxu3 %v747_v12 }
 0x8b3   :  { %957 = vmatpush.msrb.mxu3 %v2283_v15 }
 0x8b5   :  { %958 = vmatpush.msrb.mxu3 %v2286_v17 }
 0x8b7   :  { %959 = vmatpush.msrb.mxu3 %v2289_v18 }
 0x8b9   :  { %960 = vmatpush.msrb.mxu3 %v2292_v20 }
 0x8bb   :  { %961 = vmatpush.msrb.mxu3 %v2295_v21 }
 0x8bd   :  { %962 = vmatpush.msrb.mxu3 %v2298_v52 }
 0x8bf   :  { %963 = vmatpush.msrb.mxu3 %v2382_v38 }
 0x8c1   :  { %964 = vmatpush.msrb.mxu3 %v2385_v39 }
 0x8c3   :  { %965 = vmatpush.msrb.mxu3 %v2388_v40 }
 0x8c5   :  { %966 = vmatpush.msrb.mxu3 %v2391_v41 }
 0x8c7   :  { %967 = vmatpush.msrb.mxu3 %v2394_v42 }
 0x8c9   :  { %968 = vmatpush.msrb.mxu3 %v2397_v43 }
 0x8cb   :  { %969 = vmatpush.msrb.mxu3 %v2400_v44 }
 0x8cd   :  { %970 = vmatpush.msrb.mxu3 %v2403_v45 }
 0x8cf   :  { %971 = vmatpush.msrb.mxu3 %v2406_v46 }
 0x8d1   :  { %972 = vmatpush.msrb.mxu3 %v2409_v47 }
 0x935   :  { %v765_v50 = vpop.f32.mrf.mxu3 }
 0x936   :  { %v768_v51 = vadd.f32 %v765_v50, %v696_v49 }
 0x938   :  { %1490 = vtanh.f32 %v768_v51  ;;  %v774_v51 = vld [vmem:[#allocation2 + $0xc0] sm:$0xff] }
 0x93e   :  { %v1491_v6 = vpop.eup %1490 }
 0x93f   :  { %v770_v8 = vsub.f32 %v1491_v6, %v2507_v61 }
 0x941   :  { %v771_v9 = vmul.f32 %v770_v8, %v741_v7  ;;  %v776_v7 = vld [vmem:[#allocation2 + $0xd0] sm:$0xff] }
 0x943   :  { %v2562_v11 = vadd.f32 %v771_v9, %v2507_v61  ;;  %v775_v61 = vld [vmem:[#allocation2 + $0xc8] sm:$0xff] }
 0x945   :  { %793 = vmatmul.f32.vlgmr.msra.gmra.mxu0 %v2562_v11  ;;  %813 = vmatmul.f32.vlgmr.msra.gmra.mxu1 %v2562_v11 }
 0x946   :  { %988 = vmatpush.msra.mxu0 %v2317_v28  ;;  %1017 = vmatpush.msra.mxu1 %v2320_v58 }
 0x948   :  { %989 = vmatpush.msra.mxu0 %v2323_v59  ;;  %1018 = vmatpush.msra.mxu1 %v2326_v0 }
 0x94a   :  { %990 = vmatpush.msra.mxu0 %v2329_v1  ;;  %1019 = vmatpush.msra.mxu1 %v2332_v2 }
 0x94c   :  { %991 = vmatpush.msra.mxu0 %v2335_v3  ;;  %1020 = vmatpush.msra.mxu1 %v2338_v4 }
 0x94e   :  { %992 = vmatpush.msra.mxu0 %v2341_v10  ;;  %1021 = vmatpush.msra.mxu1 %v2344_v60 }
 0x950   :  { %993 = vmatpush.msra.mxu0 %v2347_v55  ;;  %1022 = vmatpush.msra.mxu1 %v2350_v62 }
 0x952   :  { %994 = vmatpush.msra.mxu0 %v2353_v63  ;;  %1023 = vmatpush.msra.mxu1 %v2431_v13 }
 0x954   :  { %995 = vmatpush.msra.mxu0 %v2434_v54  ;;  %1024 = vmatpush.msra.mxu1 %v2437_v16 }
 0x956   :  { %996 = vmatpush.msra.mxu0 %v2440_v19  ;;  %1025 = vmatpush.msra.mxu1 %v2443_v29 }
 0x958   :  { %997 = vmatpush.msra.mxu0 %v2446_v22  ;;  %1026 = vmatpush.msra.mxu1 %v2449_v56 }
 0x95a   :  { %998 = vmatpush.msra.mxu0 %v2452_v23  ;;  %1027 = vmatpush.msra.mxu1 %v2455_v24 }
 0x95c   :  { %999 = vmatpush.msra.mxu0 %v2458_v57  ;;  %1028 = vmatpush.msra.mxu1 %v2461_v25 }
 0x95e   :  { %1000 = vmatpush.msra.mxu0 %v2464_v26  ;;  %1029 = vmatpush.msra.mxu1 %v2467_v27 }
 0x960   :  { %1001 = vmatpush.msra.mxu0 %v2470_v30  ;;  %1030 = vmatpush.msra.mxu1 %v2473_v31 }
 0x962   :  { %1002 = vmatpush.msra.mxu0 %v2476_v32  ;;  %1031 = vmatpush.msra.mxu1 %v2479_v33 }
 0x964   :  { %1003 = vmatpush.msra.mxu0 %v2482_v34  ;;  %1032 = vmatpush.msra.mxu1 %v2485_v35 }
 0x9c2   :  { %v814_v12 = vpop.f32.mrf.mxu1  ;;  %v794_v53 = vpop.f32.mrf.mxu0 }
 0x9c3   :  { %v822_v14 = vadd.f32 %v814_v12, %v775_v61  ;;  %v817_v5 = vadd.f32 %v794_v53, %v774_v51 }
 0x9c5   :  { %v823_v36 = vmul.f32 0.5, %v822_v14  ;;  %v818_v6 = vmul.f32 0.5, %v817_v5 }
 0x9c7   :  { %1492 = vtanh.f32 %v823_v36 }
 0x9c8   :  { %1494 = vtanh.f32 %v818_v6 }
 0x9cd   :  { %v1493_v37 = vpop.eup %1492 }
 0x9ce   :  { %v825_v48 = vmul.f32 0.5, %v1493_v37  ;;  %v1495_v61 = vpop.eup %1494 }
 0x9cf   :  { %v820_v12 = vmul.f32 0.5, %v1495_v61 }
 0x9d0   :  { %v826_v49 = vadd.f32 0.5, %v825_v48 }
 0x9d1   :  { %v821_v36 = vadd.f32 0.5, %v820_v12 }
 0x9d2   :  { %v827_v50 = vmul.f32 %v826_v49, %v2562_v11 }
 0x9d4   :  { %844 = vmatmul.f32.vlgmr.msra.gmra.mxu2 %v827_v50 }
 0x9d5   :  { %1037 = vmatpush.msra.mxu2 %v2283_v15 }
 0x9d7   :  { %1038 = vmatpush.msra.mxu2 %v2286_v17 }
 0x9d9   :  { %1039 = vmatpush.msra.mxu2 %v2289_v18 }
 0x9db   :  { %1040 = vmatpush.msra.mxu2 %v2292_v20 }
 0x9dd   :  { %1041 = vmatpush.msra.mxu2 %v2295_v21 }
 0x9df   :  { %1042 = vmatpush.msra.mxu2 %v2298_v52 }
 0x9e1   :  { %1043 = vmatpush.msra.mxu2 %v2382_v38 }
 0x9e3   :  { %1044 = vmatpush.msra.mxu2 %v2385_v39 }
 0x9e5   :  { %1045 = vmatpush.msra.mxu2 %v2388_v40 }
 0x9e7   :  { %1046 = vmatpush.msra.mxu2 %v2391_v41 }
 0x9e9   :  { %1047 = vmatpush.msra.mxu2 %v2394_v42 }
 0x9eb   :  { %1048 = vmatpush.msra.mxu2 %v2397_v43 }
 0x9ed   :  { %1049 = vmatpush.msra.mxu2 %v2400_v44 }
 0x9ef   :  { %1050 = vmatpush.msra.mxu2 %v2403_v45 }
 0x9f1   :  { %1051 = vmatpush.msra.mxu2 %v2406_v46 }
 0x9f3   :  { %1052 = vmatpush.msra.mxu2 %v2409_v47 }
 0xa57   :  { %v845_v8 = vpop.f32.mrf.mxu2 }
 0xa58   :  { %v848_v9 = vadd.f32 %v845_v8, %v776_v7 }
 0xa5a   :  { %1496 = vtanh.f32 %v848_v9  ;;  %v854_v9 = vld [vmem:[#allocation2 + $0xd8] sm:$0xff] }
 0xa60   :  { %v1497_v14 = vpop.eup %1496 }
 0xa61   :  { %v850_v37 = vsub.f32 %v1497_v14, %v2562_v11 }
 0xa63   :  { %v851_v48 = vmul.f32 %v850_v37, %v821_v36  ;;  %v856_v36 = vld [vmem:[#allocation2 + $0xe8] sm:$0xff] }
 0xa65   :  { %v2617_v49 = vadd.f32 %v851_v48, %v2562_v11  ;;  %v855_v11 = vld [vmem:[#allocation2 + $0xe0] sm:$0xff] }
 0xa67   :  { %873 = vmatmul.f32.vlgmr.msra.gmra.mxu3 %v2617_v49  ;;  %893 = vmatmul.f32.vlgmr.msrb.gmra.mxu0 %v2617_v49 }
 0xa68   :  { %1068 = vmatpush.msra.mxu3 %v2317_v28  ;;  %1097 = vmatpush.msrb.mxu0 %v2320_v58 }
 0xa6a   :  { %1069 = vmatpush.msra.mxu3 %v2323_v59  ;;  %1098 = vmatpush.msrb.mxu0 %v2326_v0 }
 0xa6c   :  { %1070 = vmatpush.msra.mxu3 %v2329_v1  ;;  %1099 = vmatpush.msrb.mxu0 %v2332_v2 }
 0xa6e   :  { %1071 = vmatpush.msra.mxu3 %v2335_v3  ;;  %1100 = vmatpush.msrb.mxu0 %v2338_v4 }
 0xa70   :  { %1072 = vmatpush.msra.mxu3 %v2341_v10  ;;  %1101 = vmatpush.msrb.mxu0 %v2344_v60 }
 0xa72   :  { %1073 = vmatpush.msra.mxu3 %v2347_v55  ;;  %1102 = vmatpush.msrb.mxu0 %v2350_v62 }
 0xa74   :  { %1074 = vmatpush.msra.mxu3 %v2353_v63  ;;  %1103 = vmatpush.msrb.mxu0 %v2431_v13 }
 0xa76   :  { %1075 = vmatpush.msra.mxu3 %v2434_v54  ;;  %1104 = vmatpush.msrb.mxu0 %v2437_v16 }
 0xa78   :  { %1076 = vmatpush.msra.mxu3 %v2440_v19  ;;  %1105 = vmatpush.msrb.mxu0 %v2443_v29 }
 0xa7a   :  { %1077 = vmatpush.msra.mxu3 %v2446_v22  ;;  %1106 = vmatpush.msrb.mxu0 %v2449_v56 }
 0xa7c   :  { %1078 = vmatpush.msra.mxu3 %v2452_v23  ;;  %1107 = vmatpush.msrb.mxu0 %v2455_v24 }
 0xa7e   :  { %1079 = vmatpush.msra.mxu3 %v2458_v57  ;;  %1108 = vmatpush.msrb.mxu0 %v2461_v25 }
 0xa80   :  { %1080 = vmatpush.msra.mxu3 %v2464_v26  ;;  %1109 = vmatpush.msrb.mxu0 %v2467_v27 }
 0xa82   :  { %1081 = vmatpush.msra.mxu3 %v2470_v30  ;;  %1110 = vmatpush.msrb.mxu0 %v2473_v31 }
 0xa84   :  { %1082 = vmatpush.msra.mxu3 %v2476_v32  ;;  %1111 = vmatpush.msrb.mxu0 %v2479_v33 }
 0xa86   :  { %1083 = vmatpush.msra.mxu3 %v2482_v34  ;;  %1112 = vmatpush.msrb.mxu0 %v2485_v35 }
 0xae4   :  { %v894_v50 = vpop.f32.mrf.mxu0 }
 0xae5   :  { %v902_v51 = vadd.f32 %v894_v50, %v855_v11 }
 0xae7   :  { %v903_v53 = vmul.f32 0.5, %v902_v51 }
 0xae9   :  { %1498 = vtanh.f32 %v903_v53 }
 0xaea   :  { %v874_v61 = vpop.f32.mrf.mxu3 }
 0xaeb   :  { %v897_v12 = vadd.f32 %v874_v61, %v854_v9 }
 0xaed   :  { %v898_v14 = vmul.f32 0.5, %v897_v12 }
 0xaef   :  { %v1499_v5 = vpop.eup %1498  ;;  %1500 = vtanh.f32 %v898_v14 }
 0xaf0   :  { %v905_v6 = vmul.f32 0.5, %v1499_v5 }
 0xaf2   :  { %v906_v7 = vadd.f32 0.5, %v905_v6 }
 0xaf4   :  { %v907_v8 = vmul.f32 %v906_v7, %v2617_v49 }
 0xaf5   :  { %v1501_v11 = vpop.eup %1500 }
 0xaf6   :  { %924 = vmatmul.f32.vlgmr.msrb.gmra.mxu1 %v907_v8  ;;  %v900_v50 = vmul.f32 0.5, %v1501_v11 }
 0xaf7   :  { %1117 = vmatpush.msrb.mxu1 %v2283_v15 }
 0xaf8   :  { %v901_v53 = vadd.f32 0.5, %v900_v50 }
 0xaf9   :  { %1118 = vmatpush.msrb.mxu1 %v2286_v17 }
 0xafb   :  { %1119 = vmatpush.msrb.mxu1 %v2289_v18 }
 0xafd   :  { %1120 = vmatpush.msrb.mxu1 %v2292_v20 }
 0xaff   :  { %1121 = vmatpush.msrb.mxu1 %v2295_v21 }
 0xb01   :  { %1122 = vmatpush.msrb.mxu1 %v2298_v52 }
 0xb03   :  { %1123 = vmatpush.msrb.mxu1 %v2382_v38 }
 0xb05   :  { %1124 = vmatpush.msrb.mxu1 %v2385_v39 }
 0xb07   :  { %1125 = vmatpush.msrb.mxu1 %v2388_v40 }
 0xb09   :  { %1126 = vmatpush.msrb.mxu1 %v2391_v41 }
 0xb0b   :  { %1127 = vmatpush.msrb.mxu1 %v2394_v42 }
 0xb0d   :  { %1128 = vmatpush.msrb.mxu1 %v2397_v43 }
 0xb0f   :  { %1129 = vmatpush.msrb.mxu1 %v2400_v44 }
 0xb11   :  { %1130 = vmatpush.msrb.mxu1 %v2403_v45 }
 0xb13   :  { %1131 = vmatpush.msrb.mxu1 %v2406_v46 }
 0xb15   :  { %1132 = vmatpush.msrb.mxu1 %v2409_v47 }
 0xb73   :  { %v925_v37 = vpop.f32.mrf.mxu1 }
 0xb74   :  { %v928_v48 = vadd.f32 %v925_v37, %v856_v36 }
 0xb76   :  { %1502 = vtanh.f32 %v928_v48 }
 0xb7c   :  { %v1503_v51 = vpop.eup %1502 }
 0xb7d   :  { %v930_v5 = vsub.f32 %v1503_v51, %v2617_v49 }
 0xb7f   :  { %v931_v6 = vmul.f32 %v930_v5, %v901_v53 }
 0xb81   :  { %v2672_v7 = vadd.f32 %v931_v6, %v2617_v49  ;;  %v935_v49 = vld [vmem:[#allocation2 + $0xf8] sm:$0xff] }
 0xb83   :  { %953 = vmatmul.f32.vlgmr.msrb.gmra.mxu2 %v2672_v7  ;;  %973 = vmatmul.f32.vlgmr.msrb.gmra.mxu3 %v2672_v7 }
 0xb84   :  { %1148 = vmatpush.msrb.mxu2 %v2317_v28  ;;  %1177 = vmatpush.msrb.mxu3 %v2320_v58 }
 0xb86   :  { %1149 = vmatpush.msrb.mxu2 %v2323_v59  ;;  %1178 = vmatpush.msrb.mxu3 %v2326_v0 }
 0xb88   :  { %1150 = vmatpush.msrb.mxu2 %v2329_v1  ;;  %1179 = vmatpush.msrb.mxu3 %v2332_v2 }
 0xb8a   :  { %1151 = vmatpush.msrb.mxu2 %v2335_v3  ;;  %1180 = vmatpush.msrb.mxu3 %v2338_v4 }
 0xb8c   :  { %1152 = vmatpush.msrb.mxu2 %v2341_v10  ;;  %1181 = vmatpush.msrb.mxu3 %v2344_v60 }
 0xb8e   :  { %1153 = vmatpush.msrb.mxu2 %v2347_v55  ;;  %1182 = vmatpush.msrb.mxu3 %v2350_v62 }
 0xb90   :  { %1154 = vmatpush.msrb.mxu2 %v2353_v63  ;;  %1183 = vmatpush.msrb.mxu3 %v2431_v13 }
 0xb92   :  { %1155 = vmatpush.msrb.mxu2 %v2434_v54  ;;  %1184 = vmatpush.msrb.mxu3 %v2437_v16 }
 0xb94   :  { %1156 = vmatpush.msrb.mxu2 %v2440_v19  ;;  %1185 = vmatpush.msrb.mxu3 %v2443_v29 }
 0xb96   :  { %1157 = vmatpush.msrb.mxu2 %v2446_v22  ;;  %1186 = vmatpush.msrb.mxu3 %v2449_v56 }
 0xb98   :  { %1158 = vmatpush.msrb.mxu2 %v2452_v23  ;;  %1187 = vmatpush.msrb.mxu3 %v2455_v24 }
 0xb9a   :  { %1159 = vmatpush.msrb.mxu2 %v2458_v57  ;;  %1188 = vmatpush.msrb.mxu3 %v2461_v25 }
 0xb9c   :  { %1160 = vmatpush.msrb.mxu2 %v2464_v26  ;;  %1189 = vmatpush.msrb.mxu3 %v2467_v27 }
 0xb9e   :  { %1161 = vmatpush.msrb.mxu2 %v2470_v30  ;;  %1190 = vmatpush.msrb.mxu3 %v2473_v31 }
 0xba0   :  { %1162 = vmatpush.msrb.mxu2 %v2476_v32  ;;  %1191 = vmatpush.msrb.mxu3 %v2479_v33 }
 0xba2   :  { %1163 = vmatpush.msrb.mxu2 %v2482_v34  ;;  %1192 = vmatpush.msrb.mxu3 %v2485_v35 }
 0xc06   :  { %v974_v8 = vpop.f32.mrf.mxu3 }
 0xc07   :  { %v982_v9 = vadd.f32 %v974_v8, %v935_v49  ;;  %v1014_v8 = vld [vmem:[#allocation2 + $0x108] sm:$0xff] }
 0xc09   :  { %v983_v61 = vmul.f32 0.5, %v982_v9 }
 0xc0b   :  { %1504 = vtanh.f32 %v983_v61 }
 0xc11   :  { %v1505_v12 = vpop.eup %1504 }
 0xc12   :  { %v985_v14 = vmul.f32 0.5, %v1505_v12 }
 0xc14   :  { %v986_v36 = vadd.f32 0.5, %v985_v14 }
 0xc16   :  { %v987_v37 = vmul.f32 %v986_v36, %v2672_v7  ;;  %v1595_v36 = vld [vmem:[#allocation7 + $0xf0] sm:$0xff] }
 0xc18   :  { %1004 = vmatmul.f32.vlgmr.msra.gmra.mxu0 %v987_v37  ;;  %v2801_v37 = vld [vmem:[#allocation8 + $0x70] sm:$0xff] }
 0xc19   :  { %1197 = vmatpush.msra.mxu0 %v2283_v15  ;;  %v934_v15 = vld [vmem:[#allocation2 + $0xf0] sm:$0xff] }
 0xc1b   :  { %1198 = vmatpush.msra.mxu0 %v2286_v17  ;;  %v954_v17 = vpop.f32.mrf.mxu2 }
 0xc1d   :  { %1199 = vmatpush.msra.mxu0 %v2289_v18  ;;  %v977_v18 = vadd.f32 %v954_v17, %v934_v15  ;;  %v1597_v15 = vld [vmem:[#allocation7 + $0xe0] sm:$0xff]  ;;  %v2804_v17 = vld [vmem:[#allocation8 + $0x68] sm:$0xff] }
 0xc1f   :  { %1200 = vmatpush.msra.mxu0 %v2292_v20  ;;  %v978_v20 = vmul.f32 0.5, %v977_v18  ;;  %v1599_v18 = vld [vmem:[#allocation7 + $0xd0] sm:$0xff] }
 0xc21   :  { %1201 = vmatpush.msra.mxu0 %v2295_v21  ;;  %1506 = vtanh.f32 %v978_v20  ;;  %v936_v21 = vld [vmem:[#allocation2 + $0x100] sm:$0xff]  ;;  %v2807_v20 = vld [vmem:[#allocation8 + $0x60] sm:$0xff] }
 0xc23   :  { %1202 = vmatpush.msra.mxu0 %v2298_v52 }
 0xc25   :  { %1203 = vmatpush.msra.mxu0 %v2382_v38 }
 0xc27   :  { %1204 = vmatpush.msra.mxu0 %v2385_v39  ;;  %v1507_v11 = vpop.eup %1506 }
 0xc28   :  { %v980_v50 = vmul.f32 0.5, %v1507_v11  ;;  %v2813_v11 = vld [vmem:[#allocation8 + $0x50] sm:$0xff] }
 0xc29   :  { %1205 = vmatpush.msra.mxu0 %v2388_v40 }
 0xc2a   :  { %v981_v53 = vadd.f32 0.5, %v980_v50  ;;  %v1605_v50 = vld [vmem:[#allocation7 + $0xa0] sm:$0xff] }
 0xc2b   :  { %1206 = vmatpush.msra.mxu0 %v2391_v41 }
 0xc2d   :  { %1207 = vmatpush.msra.mxu0 %v2394_v42 }
 0xc2f   :  { %1208 = vmatpush.msra.mxu0 %v2397_v43 }
 0xc31   :  { %1209 = vmatpush.msra.mxu0 %v2400_v44 }
 0xc33   :  { %1210 = vmatpush.msra.mxu0 %v2403_v45 }
 0xc35   :  { %1211 = vmatpush.msra.mxu0 %v2406_v46 }
 0xc37   :  { %1212 = vmatpush.msra.mxu0 %v2409_v47 }
 0xc95   :  { %v1005_v52 = vpop.f32.mrf.mxu0 }
 0xc96   :  { %v1008_v48 = vadd.f32 %v1005_v52, %v936_v21  ;;  %v1601_v21 = vld [vmem:[#allocation7 + $0xc0] sm:$0xff]  ;;  %v2810_v52 = vld [vmem:[#allocation8 + $0x58] sm:$0xff] }
 0xc98   :  { %1508 = vtanh.f32 %v1008_v48  ;;  %v1603_v48 = vld [vmem:[#allocation7 + $0xb0] sm:$0xff] }
 0xc9e   :  { %v1509_v51 = vpop.eup %1508 }
 0xc9f   :  { %v1010_v5 = vsub.f32 %v1509_v51, %v2672_v7  ;;  %v2816_v51 = vld [vmem:[#allocation8 + $0x48] sm:$0xff] }
 0xca1   :  { %v1011_v6 = vmul.f32 %v1010_v5, %v981_v53 }
 0xca3   :  { %v2727_v49 = vadd.f32 %v1011_v6, %v2672_v7  ;;  %v2779_v7 = vld [vmem:[#allocation7 + $0xa8] sm:$0xff] }
 0xca5   :  { %1033 = vmatmul.f32.vlgmr.msra.gmra.mxu1 %v2727_v49  ;;  %1053 = vmatmul.f32.vlgmr.msra.gmra.mxu2 %v2727_v49 }
 0xca6   :  { %1228 = vmatpush.msra.mxu1 %v2317_v28  ;;  %1257 = vmatpush.msra.mxu2 %v2320_v58  ;;  %v1015_v28 = vld [vmem:[#allocation2 + $0x110] sm:$0xff] }
 0xca8   :  { %1229 = vmatpush.msra.mxu1 %v2323_v59  ;;  %1258 = vmatpush.msra.mxu2 %v2326_v0 }
 0xcaa   :  { %1230 = vmatpush.msra.mxu1 %v2329_v1  ;;  %1259 = vmatpush.msra.mxu2 %v2332_v2 }
 0xcac   :  { %1231 = vmatpush.msra.mxu1 %v2335_v3  ;;  %1260 = vmatpush.msra.mxu2 %v2338_v4 }
 0xcae   :  { %1232 = vmatpush.msra.mxu1 %v2341_v10  ;;  %1261 = vmatpush.msra.mxu2 %v2344_v60  ;;  %v2764_v10 = vld [vmem:[#allocation7 + $0xf8] sm:$0xff]  ;;  %v2767_v60 = vld [vmem:[#allocation7 + $0xe8] sm:$0xff] }
 0xcb0   :  { %1233 = vmatpush.msra.mxu1 %v2347_v55  ;;  %1262 = vmatpush.msra.mxu2 %v2350_v62  ;;  %v2770_v55 = vld [vmem:[#allocation7 + $0xd8] sm:$0xff]  ;;  %v2773_v62 = vld [vmem:[#allocation7 + $0xc8] sm:$0xff] }
 0xcb2   :  { %1234 = vmatpush.msra.mxu1 %v2353_v63  ;;  %1263 = vmatpush.msra.mxu2 %v2431_v13  ;;  %v2776_v63 = vld [vmem:[#allocation7 + $0xb8] sm:$0xff] }
 0xcb4   :  { %1235 = vmatpush.msra.mxu1 %v2434_v54  ;;  %1264 = vmatpush.msra.mxu2 %v2437_v16 }
 0xcb6   :  { %1236 = vmatpush.msra.mxu1 %v2440_v19  ;;  %1265 = vmatpush.msra.mxu2 %v2443_v29 }
 0xcb8   :  { %1237 = vmatpush.msra.mxu1 %v2446_v22  ;;  %1266 = vmatpush.msra.mxu2 %v2449_v56 }
 0xcba   :  { %1238 = vmatpush.msra.mxu1 %v2452_v23  ;;  %1267 = vmatpush.msra.mxu2 %v2455_v24 }
 0xcbc   :  { %1239 = vmatpush.msra.mxu1 %v2458_v57  ;;  %1268 = vmatpush.msra.mxu2 %v2461_v25 }
 0xcbe   :  { %1240 = vmatpush.msra.mxu1 %v2464_v26  ;;  %1269 = vmatpush.msra.mxu2 %v2467_v27 }
 0xcc0   :  { %1241 = vmatpush.msra.mxu1 %v2470_v30  ;;  %1270 = vmatpush.msra.mxu2 %v2473_v31 }
 0xcc2   :  { %1242 = vmatpush.msra.mxu1 %v2476_v32  ;;  %1271 = vmatpush.msra.mxu2 %v2479_v33 }
 0xcc4   :  { %1243 = vmatpush.msra.mxu1 %v2482_v34  ;;  %1272 = vmatpush.msra.mxu2 %v2485_v35 }
 0xd28   :  { %v1054_v58 = vpop.f32.mrf.mxu2 }
 0xd29   :  { %v1062_v59 = vadd.f32 %v1054_v58, %v1015_v28 }
 0xd2b   :  { %v1063_v0 = vmul.f32 0.5, %v1062_v59 }
 0xd2d   :  { %1510 = vtanh.f32 %v1063_v0 }
 0xd33   :  { %v1511_v1 = vpop.eup %1510 }
 0xd34   :  { %v1065_v2 = vmul.f32 0.5, %v1511_v1 }
 0xd36   :  { %v1066_v3 = vadd.f32 0.5, %v1065_v2 }
 0xd38   :  { %v1067_v4 = vmul.f32 %v1066_v3, %v2727_v49 }
 0xd3a   :  { %1084 = vmatmul.f32.vlgmr.msra.gmra.mxu3 %v1067_v4 }
 0xd3b   :  { %1277 = vmatpush.msra.mxu3 %v2764_v10 }
 0xd3d   :  { %1278 = vmatpush.msra.mxu3 %v2767_v60 }
 0xd3f   :  { %1279 = vmatpush.msra.mxu3 %v2770_v55 }
 0xd41   :  { %1280 = vmatpush.msra.mxu3 %v2773_v62 }
 0xd43   :  { %1281 = vmatpush.msra.mxu3 %v2776_v63 }
 0xd45   :  { %1282 = vmatpush.msra.mxu3 %v2779_v7 }
 0xd47   :  { %1283 = vmatpush.msra.mxu3 %v2382_v38  ;;  %v1034_v38 = vpop.f32.mrf.mxu1 }
 0xd48   :  { %v1057_v9 = vadd.f32 %v1034_v38, %v1014_v8  ;;  %v1622_v8 = vld [vmem:[#allocation8 + $0x18] sm:$0xff]  ;;  %v1623_v38 = vld [vmem:[#allocation8 + $0x10] sm:$0xff] }
 0xd49   :  { %1284 = vmatpush.msra.mxu3 %v2385_v39 }
 0xd4a   :  { %v1058_v39 = vmul.f32 0.5, %v1057_v9  ;;  %v1624_v9 = vld [vmem:[#allocation8 + $0x8] sm:$0xff] }
 0xd4b   :  { %1285 = vmatpush.msra.mxu3 %v2388_v40  ;;  %v1016_v40 = vld [vmem:[#allocation2 + $0x118] sm:$0xff] }
 0xd4c   :  { %1512 = vtanh.f32 %v1058_v39  ;;  %v1625_v39 = vld [vmem:[#allocation8] sm:$0xff] }
 0xd4d   :  { %1286 = vmatpush.msra.mxu3 %v2391_v41 }
 0xd4f   :  { %1287 = vmatpush.msra.mxu3 %v2394_v42 }
 0xd51   :  { %1288 = vmatpush.msra.mxu3 %v2397_v43 }
 0xd52   :  { %v1513_v12 = vpop.eup %1512 }
 0xd53   :  { %1289 = vmatpush.msra.mxu3 %v2400_v44  ;;  %v1060_v42 = vmul.f32 0.5, %v1513_v12 }
 0xd55   :  { %1290 = vmatpush.msra.mxu3 %v2403_v45  ;;  %v1061_v14 = vadd.f32 0.5, %v1060_v42 }
 0xd57   :  { %1291 = vmatpush.msra.mxu3 %v2406_v46 }
 0xd59   :  { %1292 = vmatpush.msra.mxu3 %v2409_v47  ;;  %v2798_v47 = vld [vmem:[#allocation8 + $0x78] sm:$0xff] }
 0xdbd   :  { %v1085_v61 = vpop.f32.mrf.mxu3 }
 0xdbe   :  { %v1088_v41 = vadd.f32 %v1085_v61, %v1016_v40  ;;  %v1175_v40 = vld [vmem:[#allocation2 + $0x140] sm:$0xff] }
 0xdc0   :  { %1514 = vtanh.f32 %v1088_v41 }
 0xdc6   :  { %v1515_v43 = vpop.eup %1514 }
 0xdc7   :  { %v1090_v44 = vsub.f32 %v1515_v43, %v2727_v49 }
 0xdc9   :  { %v1091_v45 = vmul.f32 %v1090_v44, %v1061_v14 }
 0xdcb   :  { %v2794_v46 = vadd.f32 %v1091_v45, %v2727_v49  ;;  %v1096_v49 = vld [vmem:[#allocation2 + $0x130] sm:$0xff]  ;;  %v1174_v45 = vld [vmem:[#allocation2 + $0x138] sm:$0xff] }
 0xdcd   :  { %1113 = vmatmul.f32.vlgmr.msrb.gmra.mxu0 %v2794_v46  ;;  %1133 = vmatmul.f32.vlgmr.msrb.gmra.mxu1 %v2794_v46 }
 0xdce   :  { %1308 = vmatpush.msrb.mxu0 %v2798_v47  ;;  %1337 = vmatpush.msrb.mxu1 %v1595_v36 }
 0xdd0   :  { %1309 = vmatpush.msrb.mxu0 %v2801_v37  ;;  %1338 = vmatpush.msrb.mxu1 %v1597_v15 }
 0xdd2   :  { %1310 = vmatpush.msrb.mxu0 %v2804_v17  ;;  %1339 = vmatpush.msrb.mxu1 %v1599_v18 }
 0xdd4   :  { %1311 = vmatpush.msrb.mxu0 %v2807_v20  ;;  %1340 = vmatpush.msrb.mxu1 %v1601_v21 }
 0xdd6   :  { %1312 = vmatpush.msrb.mxu0 %v2810_v52  ;;  %1341 = vmatpush.msrb.mxu1 %v1603_v48 }
 0xdd8   :  { %1313 = vmatpush.msrb.mxu0 %v2813_v11  ;;  %1342 = vmatpush.msrb.mxu1 %v1605_v50 }
 0xdda   :  { %1314 = vmatpush.msrb.mxu0 %v2816_v51  ;;  %1343 = vmatpush.msrb.mxu1 %v2431_v13  ;;  %v1095_v13 = vld [vmem:[#allocation2 + $0x128] sm:$0xff] }
 0xddc   :  { %1315 = vmatpush.msrb.mxu0 %v2434_v54  ;;  %1344 = vmatpush.msrb.mxu1 %v2437_v16 }
 0xdde   :  { %1316 = vmatpush.msrb.mxu0 %v2440_v19  ;;  %1345 = vmatpush.msrb.mxu1 %v2443_v29 }
 0xde0   :  { %1317 = vmatpush.msrb.mxu0 %v2446_v22  ;;  %1346 = vmatpush.msrb.mxu1 %v2449_v56 }
 0xde2   :  { %1318 = vmatpush.msrb.mxu0 %v2452_v23  ;;  %1347 = vmatpush.msrb.mxu1 %v2455_v24  ;;  %v1607_v24 = vld [vmem:[#allocation7 + $0x98] sm:$0xff] }
 0xde4   :  { %1319 = vmatpush.msrb.mxu0 %v2458_v57  ;;  %1348 = vmatpush.msrb.mxu1 %v2461_v25  ;;  %v1608_v57 = vld [vmem:[#allocation7 + $0x88] sm:$0xff]  ;;  %v1609_v25 = vld [vmem:[#allocation7 + $0x78] sm:$0xff] }
 0xde6   :  { %1320 = vmatpush.msrb.mxu0 %v2464_v26  ;;  %1349 = vmatpush.msrb.mxu1 %v2467_v27  ;;  %v1610_v26 = vld [vmem:[#allocation7 + $0x68] sm:$0xff]  ;;  %v1611_v27 = vld [vmem:[#allocation7 + $0x58] sm:$0xff] }
 0xde8   :  { %1321 = vmatpush.msrb.mxu0 %v2470_v30  ;;  %1350 = vmatpush.msrb.mxu1 %v2473_v31  ;;  %v1612_v30 = vld [vmem:[#allocation7 + $0x48] sm:$0xff]  ;;  %v1613_v31 = vld [vmem:[#allocation7 + $0x38] sm:$0xff] }
 0xdea   :  { %1322 = vmatpush.msrb.mxu0 %v2476_v32  ;;  %1351 = vmatpush.msrb.mxu1 %v2479_v33  ;;  %v1614_v32 = vld [vmem:[#allocation7 + $0x28] sm:$0xff]  ;;  %v1615_v33 = vld [vmem:[#allocation7 + $0x18] sm:$0xff] }
 0xdec   :  { %1323 = vmatpush.msrb.mxu0 %v2482_v34  ;;  %1352 = vmatpush.msrb.mxu1 %v2485_v35  ;;  %v1616_v34 = vld [vmem:[#allocation7 + $0x8] sm:$0xff]  ;;  %v1094_v35 = vld [vmem:[#allocation2 + $0x120] sm:$0xff] }
 0xe4a   :  { %v1134_v54 = vpop.f32.mrf.mxu1  ;;  %v1114_v53 = vpop.f32.mrf.mxu0 }
 0xe4b   :  { %v1142_v16 = vadd.f32 %v1134_v54, %v1095_v13  ;;  %v1137_v5 = vadd.f32 %v1114_v53, %v1094_v35 }
 0xe4d   :  { %v1143_v19 = vmul.f32 0.5, %v1142_v16  ;;  %v1138_v6 = vmul.f32 0.5, %v1137_v5 }
 0xe4f   :  { %1516 = vtanh.f32 %v1143_v19 }
 0xe50   :  { %1518 = vtanh.f32 %v1138_v6  ;;  %v1335_v6 = vld [vmem:[#allocation2 + $0x170] sm:$0xff] }
 0xe55   :  { %v1517_v29 = vpop.eup %1516 }
 0xe56   :  { %v1145_v22 = vmul.f32 0.5, %v1517_v29  ;;  %v1519_v59 = vpop.eup %1518 }
 0xe57   :  { %v1140_v0 = vmul.f32 0.5, %v1519_v59 }
 0xe58   :  { %v1146_v56 = vadd.f32 0.5, %v1145_v22 }
 0xe59   :  { %v1141_v2 = vadd.f32 0.5, %v1140_v0 }
 0xe5a   :  { %v1147_v23 = vmul.f32 %v1146_v56, %v2794_v46 }
 0xe5c   :  { %1164 = vmatmul.f32.vlgmr.msrb.gmra.mxu2 %v1147_v23  ;;  %v1254_v23 = vld [vmem:[#allocation2 + $0x150] sm:$0xff] }
 0xe5d   :  { %1357 = vmatpush.msrb.mxu2 %v2764_v10 }
 0xe5f   :  { %1358 = vmatpush.msrb.mxu2 %v2767_v60  ;;  %v1617_v60 = vld [vmem:[#allocation8 + $0x40] sm:$0xff] }
 0xe61   :  { %1359 = vmatpush.msrb.mxu2 %v2770_v55  ;;  %v1618_v55 = vld [vmem:[#allocation8 + $0x38] sm:$0xff] }
 0xe63   :  { %1360 = vmatpush.msrb.mxu2 %v2773_v62  ;;  %v1619_v62 = vld [vmem:[#allocation8 + $0x30] sm:$0xff] }
 0xe65   :  { %1361 = vmatpush.msrb.mxu2 %v2776_v63  ;;  %v1620_v63 = vld [vmem:[#allocation8 + $0x28] sm:$0xff] }
 0xe67   :  { %1362 = vmatpush.msrb.mxu2 %v2779_v7  ;;  %v1621_v7 = vld [vmem:[#allocation8 + $0x20] sm:$0xff] }
 0xe69   :  { %1363 = vmatpush.msrb.mxu2 %v1607_v24 }
 0xe6b   :  { %1364 = vmatpush.msrb.mxu2 %v1608_v57 }
 0xe6d   :  { %1365 = vmatpush.msrb.mxu2 %v1609_v25 }
 0xe6f   :  { %1366 = vmatpush.msrb.mxu2 %v1610_v26  ;;  %v1256_v26 = vld [vmem:[#allocation2 + $0x160] sm:$0xff] }
 0xe71   :  { %1367 = vmatpush.msrb.mxu2 %v1611_v27 }
 0xe73   :  { %1368 = vmatpush.msrb.mxu2 %v1612_v30 }
 0xe75   :  { %1369 = vmatpush.msrb.mxu2 %v1613_v31 }
 0xe77   :  { %1370 = vmatpush.msrb.mxu2 %v1614_v32 }
 0xe79   :  { %1371 = vmatpush.msrb.mxu2 %v1615_v33 }
 0xe7b   :  { %1372 = vmatpush.msrb.mxu2 %v1616_v34 }
 0xedf   :  { %v1165_v28 = vpop.f32.mrf.mxu2 }
 0xee0   :  { %v1168_v58 = vadd.f32 %v1165_v28, %v1096_v49 }
 0xee2   :  { %1520 = vtanh.f32 %v1168_v58 }
 0xee8   :  { %v1521_v1 = vpop.eup %1520 }
 0xee9   :  { %v1170_v3 = vsub.f32 %v1521_v1, %v2794_v46 }
 0xeeb   :  { %v1171_v4 = vmul.f32 %v1170_v3, %v1141_v2  ;;  %v1334_v3 = vld [vmem:[#allocation2 + $0x168] sm:$0xff] }
 0xeed   :  { %v1172_v10 = vadd.f32 %v1171_v4, %v2794_v46 }
 0xeef   :  { %1193 = vmatmul.f32.vlgmr.msrb.gmra.mxu3 %v1172_v10  ;;  %1213 = vmatmul.f32.vlgmr.msra.gmra.mxu0 %v1172_v10 }
 0xef0   :  { %1388 = vmatpush.msrb.mxu3 %v2798_v47 }
 0xef2   :  { %1389 = vmatpush.msrb.mxu3 %v2801_v37  ;;  %v1176_v37 = vld [vmem:[#allocation2 + $0x148] sm:$0xff] }
 0xef4   :  { %1390 = vmatpush.msrb.mxu3 %v2804_v17 }
 0xef6   :  { %1391 = vmatpush.msrb.mxu3 %v2807_v20 }
 0xef8   :  { %1392 = vmatpush.msrb.mxu3 %v2810_v52 }
 0xefa   :  { %1393 = vmatpush.msrb.mxu3 %v2813_v11 }
 0xefc   :  { %1394 = vmatpush.msrb.mxu3 %v2816_v51  ;;  %v1255_v51 = vld [vmem:[#allocation2 + $0x158] sm:$0xff] }
 0xefe   :  { %1395 = vmatpush.msrb.mxu3 %v1617_v60 }
 0xf00   :  { %1396 = vmatpush.msrb.mxu3 %v1618_v55  ;;  %v1336_v55 = vld [vmem:[#allocation2 + $0x178] sm:$0xff] }
 0xf02   :  { %1397 = vmatpush.msrb.mxu3 %v1619_v62 }
 0xf04   :  { %1398 = vmatpush.msrb.mxu3 %v1620_v63 }
 0xf06   :  { %1399 = vmatpush.msrb.mxu3 %v1621_v7 }
 0xf08   :  { %1400 = vmatpush.msrb.mxu3 %v1622_v8 }
 0xf0a   :  { %1401 = vmatpush.msrb.mxu3 %v1623_v38 }
 0xf0c   :  { %1402 = vmatpush.msrb.mxu3 %v1624_v9 }
 0xf0e   :  { %1403 = vmatpush.msrb.mxu3 %v1625_v39 }
 0xf6c   :  { %v1214_v61 = vpop.f32.mrf.mxu0 }
 0xf6d   :  { %v1222_v41 = vadd.f32 %v1214_v61, %v1175_v40 }
 0xf6f   :  { %v1223_v12 = vmul.f32 0.5, %v1222_v41 }
 0xf71   :  { %1522 = vtanh.f32 %v1223_v12 }
 0xf72   :  { %v1194_v46 = vpop.f32.mrf.mxu3 }
 0xf73   :  { %v1217_v47 = vadd.f32 %v1194_v46, %v1174_v45 }
 0xf75   :  { %v1218_v36 = vmul.f32 0.5, %v1217_v47 }
 0xf77   :  { %v1523_v42 = vpop.eup %1522  ;;  %1524 = vtanh.f32 %v1218_v36 }
 0xf78   :  { %v1225_v43 = vmul.f32 0.5, %v1523_v42 }
 0xf7a   :  { %v1226_v14 = vadd.f32 0.5, %v1225_v43 }
 0xf7c   :  { %v1227_v44 = vmul.f32 %v1226_v14, %v1172_v10 }
 0xf7d   :  { %v1525_v18 = vpop.eup %1524 }
 0xf7e   :  { %1244 = vmatmul.f32.vlgmr.msra.gmra.mxu1 %v1227_v44  ;;  %v1220_v20 = vmul.f32 0.5, %v1525_v18 }
 0xf80   :  { %v1221_v52 = vadd.f32 0.5, %v1220_v20 }
 0xffb   :  { %v1245_v15 = vpop.f32.mrf.mxu1 }
 0xffc   :  { %v1248_v17 = vadd.f32 %v1245_v15, %v1176_v37 }
 0xffe   :  { %1526 = vtanh.f32 %v1248_v17 }
0x1004   :  { %v1527_v21 = vpop.eup %1526 }
0x1005   :  { %v1250_v48 = vsub.f32 %v1527_v21, %v1172_v10 }
0x1007   :  { %v1251_v11 = vmul.f32 %v1250_v48, %v1221_v52 }
0x1009   :  { %v1252_v50 = vadd.f32 %v1251_v11, %v1172_v10 }
0x100b   :  { %1273 = vmatmul.f32.vlgmr.msra.gmra.mxu2 %v1252_v50  ;;  %1293 = vmatmul.f32.vlgmr.msra.gmra.mxu3 %v1252_v50 }
0x108e   :  { %v1294_v13 = vpop.f32.mrf.mxu3  ;;  %v1274_v24 = vpop.f32.mrf.mxu2 }
0x108f   :  { %v1302_v54 = vadd.f32 %v1294_v13, %v1255_v51  ;;  %v1297_v57 = vadd.f32 %v1274_v24, %v1254_v23 }
0x1091   :  { %v1303_v16 = vmul.f32 0.5, %v1302_v54  ;;  %v1298_v25 = vmul.f32 0.5, %v1297_v57 }
0x1093   :  { %1528 = vtanh.f32 %v1303_v16 }
0x1094   :  { %1530 = vtanh.f32 %v1298_v25 }
0x1099   :  { %v1529_v19 = vpop.eup %1528 }
0x109a   :  { %v1305_v29 = vmul.f32 0.5, %v1529_v19  ;;  %v1531_v31 = vpop.eup %1530 }
0x109b   :  { %v1300_v32 = vmul.f32 0.5, %v1531_v31 }
0x109c   :  { %v1306_v22 = vadd.f32 0.5, %v1305_v29 }
0x109d   :  { %v1301_v34 = vadd.f32 0.5, %v1300_v32 }
0x109e   :  { %v1307_v56 = vmul.f32 %v1306_v22, %v1252_v50 }
0x10a0   :  { %1324 = vmatmul.f32.vlgmr.msrb.gmra.mxu0 %v1307_v56 }
0x111d   :  { %v1325_v27 = vpop.f32.mrf.mxu0 }
0x111e   :  { %v1328_v30 = vadd.f32 %v1325_v27, %v1256_v26 }
0x1120   :  { %1532 = vtanh.f32 %v1328_v30 }
0x1126   :  { %v1533_v33 = vpop.eup %1532 }
0x1127   :  { %v1330_v35 = vsub.f32 %v1533_v33, %v1252_v50 }
0x1129   :  { %v1331_v53 = vmul.f32 %v1330_v35, %v1301_v34 }
0x112b   :  { %v1332_v5 = vadd.f32 %v1331_v53, %v1252_v50 }
0x112d   :  { %1353 = vmatmul.f32.vlgmr.msrb.gmra.mxu1 %v1332_v5  ;;  %1373 = vmatmul.f32.vlgmr.msrb.gmra.mxu2 %v1332_v5 }
0x11aa   :  { %v1354_v4 = vpop.f32.mrf.mxu1 }
0x11ab   :  { %v1377_v10 = vadd.f32 %v1354_v4, %v1334_v3 }
0x11ad   :  { %v1378_v60 = vmul.f32 0.5, %v1377_v10 }
0x11b0   :  { %v1374_v49 = vpop.f32.mrf.mxu2 }
0x11b1   :  { %v1382_v28 = vadd.f32 %v1374_v49, %v1335_v6 }
0x11b3   :  { %v1383_v58 = vmul.f32 0.5, %v1382_v28 }
0x11b5   :  { %1534 = vtanh.f32 %v1383_v58 }
0x11b6   :  { %1536 = vtanh.f32 %v1378_v60 }
0x11bb   :  { %v1535_v59 = vpop.eup %1534 }
0x11bc   :  { %v1385_v0 = vmul.f32 0.5, %v1535_v59  ;;  %v1537_v7 = vpop.eup %1536 }
0x11bd   :  { %v1380_v8 = vmul.f32 0.5, %v1537_v7 }
0x11be   :  { %v1386_v1 = vadd.f32 0.5, %v1385_v0 }
0x11bf   :  { %v1381_v9 = vadd.f32 0.5, %v1380_v8 }
0x11c0   :  { %v1387_v2 = vmul.f32 %v1386_v1, %v1332_v5 }
0x11c2   :  { %1404 = vmatmul.f32.vlgmr.msrb.gmra.mxu3 %v1387_v2 }
0x1245   :  { %v1405_v62 = vpop.f32.mrf.mxu3 }
0x1246   :  { %v1408_v63 = vadd.f32 %v1405_v62, %v1336_v55 }
0x1248   :  { %1538 = vtanh.f32 %v1408_v63 }
0x124e   :  { %v1539_v38 = vpop.eup %1538 }
0x124f   :  { %v1410_v39 = vsub.f32 %v1539_v38, %v1332_v5 }
0x1251   :  { %v1411_v40 = vmul.f32 %v1410_v39, %v1381_v9 }
0x1253   :  { %v1412_v61 = vadd.f32 %v1411_v40, %v1332_v5 }
0x1255   :  { %1413 = vst [vmem:[#allocation10] sm:$0xff] %v1412_v61 }
0x1256   :  { %1424 = dma.vmem_to_hbm [thread:$0]  %s1420_s3, 128, %s1422_s15, [#allocation4]  }
0x1257   :  { %1752 = dma.done.wait [#allocation4], 128  }
0x1258   :  { %1753 = vsyncadd [#allocation4], 4294967168 }
0x1259   :  { %1429 = vsyncpa [#allocation3], 1 }
0x125a   :  { %1430 = vsyncpa [#allocation6], 1 }
0x125b   :  { %1431 = vsyncpa [#allocation9], 1 }
0x125c   :  { %1432 = vsyncpa [#allocation4], 1 }

</bundles_post_ra>
